<compile_context>
chip_gen: v5e
topology: v5e:2x2
jax: 0.10.0
libtpu: 0.0.40
codegen_flags: <defaults>
</compile_context>

<pallas_src>
import functools

import jax
import jax.numpy as jnp
from jax.experimental import pallas as pl
from jax.experimental.pallas import tpu as pltpu

EPS = 1e-5
K = 15          # kernel size of every conv layer
S1 = 5          # stride of conv 1
S2 = 6          # stride of convs 2-4
GRP = 30        # lcm(S1, S2): waveform grouping that makes layer 1's output grouped by 6
SLOPE = 0.3     # LeakyReLU negative slope


def _leaky(v):
    return jnp.where(v >= 0.0, v, SLOPE * v)


def _wav_encoder_kernel(xg_ref, w1_ref, w2_ref, w3_ref, w4_ref,
                        sh1_ref, sh2_ref, sh3_ref, sh4_ref,
                        o_ref,
                        act1_ref, tmp2_ref, act2_ref, tmp3_ref, act3_ref,
                        *, G1, L2, G2, L3, G3, L4, Bt):
    """Processes Bt waveform samples; all activations stay in VMEM scratch."""

    def group_conv(in_ref, w_ref, sh_ref, n_rows):
        # stride-6 conv on a grouped-by-6 input: 3 contiguous-row tap matmuls
        # accumulated back-to-back into one f32 accumulator.
        acc = jnp.dot(in_ref[pl.ds(0, n_rows), :], w_ref[0],
                      preferred_element_type=jnp.float32)
        acc = acc + jnp.dot(in_ref[pl.ds(1, n_rows), :], w_ref[1],
                            preferred_element_type=jnp.float32)
        acc = acc + jnp.dot(in_ref[pl.ds(2, n_rows), :], w_ref[2],
                            preferred_element_type=jnp.float32)
        return acc + sh_ref[...]

    def regroup(stage_ref, grp_ref, y, n_rows, n_grp, c):
        # (n_rows, c) -> grouped (n_grp, 6*c):  grp[g, a*c + ch] = y[6g + a, ch]
        stage_ref[pl.ds(0, n_rows), :] = y
        if 6 * n_grp > n_rows:   # keep padded rows finite (they hit zero weights)
            stage_ref[pl.ds(n_rows, 6 * n_grp - n_rows), :] = jnp.zeros(
                (6 * n_grp - n_rows, c), stage_ref.dtype)
        for a in range(6):
            grp_ref[:, a * c:(a + 1) * c] = stage_ref[
                pl.ds(a, n_grp, stride=6), :].astype(grp_ref.dtype)

    for s in range(Bt):        # per-sample loop (unrolled); weights stay resident
        # ---- layer 1: Conv1d(1->16,K=15,stride=5)+BN+LeakyReLU, grouped output --
        xs = xg_ref[s]                          # (G1+1, 32) bf16, 30-sample groups
        acc1 = jnp.dot(xs[0:G1], w1_ref[0], preferred_element_type=jnp.float32)
        acc1 = acc1 + jnp.dot(xs[1:G1 + 1], w1_ref[1],
                              preferred_element_type=jnp.float32)
        act1_ref[...] = _leaky(acc1 + sh1_ref[...]).astype(act1_ref.dtype)

        # ---- layer 2: Conv1d(16->32, K=15, stride=6) + BN + LeakyReLU -----------
        y2 = _leaky(group_conv(act1_ref, w2_ref, sh2_ref, L2))
        regroup(tmp2_ref, act2_ref, y2, L2, G2, 32)

        # ---- layer 3: Conv1d(32->64, K=15, stride=6) + BN + LeakyReLU -----------
        y3 = _leaky(group_conv(act2_ref, w3_ref, sh3_ref, L3))
        regroup(tmp3_ref, act3_ref, y3, L3, G3, 64)

        # ---- layer 4: Conv1d(64->32, K=15, stride=6), bias only -----------------
        o_ref[s] = group_conv(act3_ref, w4_ref, sh4_ref, L4).astype(o_ref.dtype)


def _fold_bn(b, bn):
    """Fold conv bias + inference BatchNorm into per-channel (scale, shift)."""
    if bn is None:
        return jnp.ones_like(b), b.astype(jnp.float32)
    gamma, beta, mean, var = bn
    scale = gamma / jnp.sqrt(var + EPS)
    return scale, (b - mean) * scale + beta


def _layer1_group_weights(w, scale):
    """(16,1,15) conv weights -> (2, 32, 96) group weights for the 30-sample grouping.

    out1[6g+a, c] = sum_t x_pad[30g + 5a + t] * W[c, t]
                  = xg30[g] @ W0[:, a*16+c] + xg30[g+1] @ W1[:, a*16+c].
    """
    ws = (w[:, 0, :] * scale[:, None]).T                  # (15, 16), BN-scaled
    full = jnp.zeros((40, 6, 16), jnp.float32)            # p = 5a + t in [0, 40)
    for a in range(6):
        full = full.at[S1 * a:S1 * a + K, a, :].set(ws)
    full = full.reshape(40, 96)
    wa = jnp.pad(full[:GRP], ((0, 32 - GRP), (0, 0)))          # (32, 96)
    wb = jnp.pad(full[GRP:], ((0, 32 - (40 - GRP)), (0, 0)))   # (32, 96)
    return jnp.stack([wa, wb]).astype(jnp.bfloat16)


def _group_tap_weights(w, scale):
    """(C_out, C_in, 15) -> (3, 6*C_in, C_out) group-tap weights (taps >=15 zeroed)."""
    c_out, c_in, _ = w.shape
    ws = jnp.pad(w * scale[:, None, None], ((0, 0), (0, 0), (0, 18 - K)))
    wg = ws.reshape(c_out, c_in, 3, 6)                    # [c, ci, j, a], t = 6j + a
    wg = jnp.transpose(wg, (2, 3, 1, 0))                  # [j, a, ci, c]
    return wg.reshape(3, 6 * c_in, c_out).astype(jnp.bfloat16)


def wav_encoder(wav, params, *, block_b=2):
    """wav: (B, T) float32 -> (B, L_out, 32), matching PyTorch WavEncoder.forward."""
    B, T = wav.shape
    p1, p2, p3, p4 = params
    pad = p1["pad"]
    Lp = T + 2 * pad
    L1 = (Lp - K) // S1 + 1
    L2 = (L1 - K) // S2 + 1
    L3 = (L2 - K) // S2 + 1
    L4 = (L3 - K) // S2 + 1
    assert L4 >= 1, "input waveform too short for WavEncoder"

    G1, G2, G3 = pl.cdiv(L1, 6), pl.cdiv(L2, 6), pl.cdiv(L3, 6)
    # grouped-window bounds (OOB VMEM reads are silent -> guard against shape drift)
    assert G1 >= L2 + 2 and G2 >= L3 + 2 and G3 >= L4 + 2

    # samples per grid step: largest divisor of B that is <= block_b
    Bt = max(d for d in range(1, min(block_b, B) + 1) if B % d == 0)

    # ---- group the padded waveform by 30 samples (bf16): xg[b, g, p] = x_pad[30g+p]
    Gx = G1 + 1
    x = jnp.pad(wav.astype(jnp.float32), ((0, 0), (pad, GRP * Gx - T - pad)))
    xg = x.reshape(B, Gx, GRP).astype(jnp.bfloat16)
    xg = jnp.pad(xg, ((0, 0), (0, 0), (0, 32 - GRP)))          # lanes 30 -> 32

    # ---- fold conv bias + inference BN; scale folded into the bf16 weights ------
    sc1, sh1 = _fold_bn(p1["b"], p1["bn"])
    sc2, sh2 = _fold_bn(p2["b"], p2["bn"])
    sc3, sh3 = _fold_bn(p3["b"], p3["bn"])
    sc4, sh4 = _fold_bn(p4["b"], p4["bn"])

    w1 = _layer1_group_weights(p1["w"], sc1)                   # (2, 32, 96)
    w2 = _group_tap_weights(p2["w"], sc2)                      # (3, 96, 32)
    w3 = _group_tap_weights(p3["w"], sc3)                      # (3, 192, 64)
    w4 = _group_tap_weights(p4["w"], sc4)                      # (3, 384, 32)

    sh1 = jnp.tile(sh1, 6).reshape(1, 96).astype(jnp.float32)  # shift per grouped lane
    sh2 = sh2.reshape(1, 32).astype(jnp.float32)
    sh3 = sh3.reshape(1, 64).astype(jnp.float32)
    sh4 = sh4.reshape(1, 32).astype(jnp.float32)

    kernel = functools.partial(_wav_encoder_kernel, G1=G1, L2=L2, G2=G2,
                               L3=L3, G3=G3, L4=L4, Bt=Bt)
    wmap2 = lambda i: (0, 0)
    wmap3 = lambda i: (0, 0, 0)

    out = pl.pallas_call(
        kernel,
        out_shape=jax.ShapeDtypeStruct((B, L4, 32), jnp.float32),
        grid=(B // Bt,),
        in_specs=[
            pl.BlockSpec((Bt, Gx, 32), lambda i: (i, 0, 0)),   # grouped waveform
            pl.BlockSpec((2, 32, 96), wmap3),                  # layer-1 weights
            pl.BlockSpec((3, 96, 32), wmap3),                  # layer-2 weights
            pl.BlockSpec((3, 192, 64), wmap3),                 # layer-3 weights
            pl.BlockSpec((3, 384, 32), wmap3),                 # layer-4 weights
            pl.BlockSpec((1, 96), wmap2),                      # shifts (f32)
            pl.BlockSpec((1, 32), wmap2),
            pl.BlockSpec((1, 64), wmap2),
            pl.BlockSpec((1, 32), wmap2),
        ],
        out_specs=pl.BlockSpec((Bt, L4, 32), lambda i: (i, 0, 0)),
        scratch_shapes=[                        # VMEM-resident grouped activations
            pltpu.VMEM((G1, 96), jnp.bfloat16),       # act1, grouped by 6
            pltpu.VMEM((6 * G2, 32), jnp.float32),    # layer-2 regroup staging
            pltpu.VMEM((G2, 192), jnp.bfloat16),      # act2, grouped by 6
            pltpu.VMEM((6 * G3, 64), jnp.float32),    # layer-3 regroup staging
            pltpu.VMEM((G3, 384), jnp.bfloat16),      # act3, grouped by 6
        ],
        compiler_params=pltpu.CompilerParams(dimension_semantics=("parallel",)),
    )(xg, w1, w2, w3, w4, sh1, sh2, sh3, sh4)
    return out


def init_params(key):
    # (C_in, C_out, K, stride, pad) for the 4 convs of WavEncoder
    layer_cfg = [
        (1, 16, 15, 5, 1600),
        (16, 32, 15, 6, 0),
        (32, 64, 15, 6, 0),
        (64, 32, 15, 6, 0),
    ]
    params = []
    for i, (cin, cout, k, stride, pad) in enumerate(layer_cfg):
        key, kw, kb, kg, kbt, km, kv = jax.random.split(key, 7)
        bound = 1.0 / (cin * k) ** 0.5
        w = jax.random.uniform(kw, (cout, cin, k), jnp.float32, -bound, bound)
        b = jax.random.uniform(kb, (cout,), jnp.float32, -bound, bound)
        if i < 3:  # first three convs are followed by BatchNorm1d + LeakyReLU(0.3)
            bn = (
                jax.random.uniform(kg, (cout,), jnp.float32, 0.5, 1.5),    # gamma
                jax.random.uniform(kbt, (cout,), jnp.float32, -0.1, 0.1),  # beta
                jax.random.uniform(km, (cout,), jnp.float32, -0.1, 0.1),   # running_mean
                jax.random.uniform(kv, (cout,), jnp.float32, 0.5, 1.5),    # running_var
            )
        else:
            bn = None
        params.append(dict(w=w, b=b, bn=bn, stride=stride, pad=pad))
    return params


def wav_encoder_reference(wav, params):
    """Pure-JAX reference (lax.conv, f32 HIGHEST) for correctness checking."""
    x = wav[:, None, :]
    for p in params:
        y = jax.lax.conv_general_dilated(
            x,
            p["w"],
            window_strides=(p["stride"],),
            padding=[(p["pad"], p["pad"])],
            dimension_numbers=("NCH", "OIH", "NCH"),
            precision=jax.lax.Precision.HIGHEST,
        )
        y = y + p["b"][None, :, None]
        if p["bn"] is not None:
            gamma, beta, mean, var = p["bn"]
            y = (y - mean[None, :, None]) / jnp.sqrt(var[None, :, None] + EPS)
            y = y * gamma[None, :, None] + beta[None, :, None]
            y = jnp.where(y >= 0, y, 0.3 * y)
        x = y
    return jnp.transpose(x, (0, 2, 1))


if __name__ == "__main__":
    key = jax.random.PRNGKey(0)
    kp, kx = jax.random.split(key)

    params = init_params(kp)

    B, T = 4, 3200  # small raw-waveform input; final output is (4, 4, 32)
    wav = jax.random.normal(kx, (B, T), jnp.float32)

    fwd = jax.jit(lambda w: wav_encoder(w, params, block_b=2))
    out = jax.block_until_ready(fwd(wav))

    ref = jax.block_until_ready(wav_encoder_reference(wav, params))
    assert out.shape == ref.shape == (B, 4, 32), (out.shape, ref.shape)
    # bf16 MXU operands / bf16 activations -> looser tolerance than the f32 reference.
    assert jnp.allclose(out, ref, rtol=5e-2, atol=5e-2), float(
        jnp.max(jnp.abs(out - ref))
    )

    print("KERNEL_OK")
</pallas_src>

<mosaic_0001>
module attributes {stable_mosaic.version = 11 : i64} {
  func.func @_wav_encoder_kernel(%arg0: i32, %arg1: memref<2x214x32xbf16, #tpu.memory_space<vmem>>, %arg2: memref<2x32x96xbf16, #tpu.memory_space<vmem>>, %arg3: memref<3x96x32xbf16, #tpu.memory_space<vmem>>, %arg4: memref<3x192x64xbf16, #tpu.memory_space<vmem>>, %arg5: memref<3x384x32xbf16, #tpu.memory_space<vmem>>, %arg6: memref<1x96xf32, #tpu.memory_space<vmem>>, %arg7: memref<1x32xf32, #tpu.memory_space<vmem>>, %arg8: memref<1x64xf32, #tpu.memory_space<vmem>>, %arg9: memref<1x32xf32, #tpu.memory_space<vmem>>, %arg10: memref<2x4x32xf32, #tpu.memory_space<vmem>>, %arg11: memref<213x96xbf16, #tpu.memory_space<vmem>>, %arg12: memref<216x32xf32, #tpu.memory_space<vmem>>, %arg13: memref<36x192xbf16, #tpu.memory_space<vmem>>, %arg14: memref<36x64xf32, #tpu.memory_space<vmem>>, %arg15: memref<6x384xbf16, #tpu.memory_space<vmem>>) attributes {dimension_semantics = [#tpu.dimension_semantics<parallel>], iteration_bounds = array<i64: 2>, scalar_prefetch = 0 : i64, scratch_operands = 5 : i64, tpu.core_type = #tpu.core_type<tc>, window_params = [{transform_indices = @transform_0, window_bounds = array<i64: 2, 214, 32>}, {pipeline_mode = #tpu.pipeline_mode<synchronous>, transform_indices = @transform_1, window_bounds = array<i64: 2, 32, 96>}, {pipeline_mode = #tpu.pipeline_mode<synchronous>, transform_indices = @transform_2, window_bounds = array<i64: 3, 96, 32>}, {pipeline_mode = #tpu.pipeline_mode<synchronous>, transform_indices = @transform_3, window_bounds = array<i64: 3, 192, 64>}, {pipeline_mode = #tpu.pipeline_mode<synchronous>, transform_indices = @transform_4, window_bounds = array<i64: 3, 384, 32>}, {pipeline_mode = #tpu.pipeline_mode<synchronous>, transform_indices = @transform_5, window_bounds = array<i64: 1, 96>}, {pipeline_mode = #tpu.pipeline_mode<synchronous>, transform_indices = @transform_6, window_bounds = array<i64: 1, 32>}, {pipeline_mode = #tpu.pipeline_mode<synchronous>, transform_indices = @transform_7, window_bounds = array<i64: 1, 64>}, {pipeline_mode = #tpu.pipeline_mode<synchronous>, transform_indices = @transform_8, window_bounds = array<i64: 1, 32>}, {transform_indices = @transform_9, window_bounds = array<i64: 2, 4, 32>}]} {
    %c0 = arith.constant 0 : index
    %c0_0 = arith.constant 0 : index
    %c0_1 = arith.constant 0 : index
    %0 = vector.load %arg1[%c0, %c0_0, %c0_1] : memref<2x214x32xbf16, #tpu.memory_space<vmem>>, vector<1x214x32xbf16>
    %1 = vector.shape_cast %0 : vector<1x214x32xbf16> to vector<214x32xbf16>
    %2 = vector.extract_strided_slice %1 {offsets = [0, 0], sizes = [213, 32], strides = [1, 1]} : vector<214x32xbf16> to vector<213x32xbf16>
    %c0_2 = arith.constant 0 : index
    %c0_3 = arith.constant 0 : index
    %c0_4 = arith.constant 0 : index
    %3 = vector.load %arg2[%c0_2, %c0_3, %c0_4] : memref<2x32x96xbf16, #tpu.memory_space<vmem>>, vector<1x32x96xbf16>
    %4 = vector.shape_cast %3 : vector<1x32x96xbf16> to vector<32x96xbf16>
    %cst = arith.constant dense<0.000000e+00> : vector<213x96xf32>
    %5 = tpu.matmul %2, %4, %cst {dimension_numbers = #tpu.dot_dimension_numbers<[1], [0], [0], [1], [0, 0, 1, 1], [], []>} : vector<213x32xbf16>, vector<32x96xbf16>, vector<213x96xf32> -> vector<213x96xf32>
    %6 = vector.extract_strided_slice %1 {offsets = [1, 0], sizes = [213, 32], strides = [1, 1]} : vector<214x32xbf16> to vector<213x32xbf16>
    %c1 = arith.constant 1 : index
    %c0_5 = arith.constant 0 : index
    %c0_6 = arith.constant 0 : index
    %7 = vector.load %arg2[%c1, %c0_5, %c0_6] : memref<2x32x96xbf16, #tpu.memory_space<vmem>>, vector<1x32x96xbf16>
    %8 = vector.shape_cast %7 : vector<1x32x96xbf16> to vector<32x96xbf16>
    %cst_7 = arith.constant dense<0.000000e+00> : vector<213x96xf32>
    %9 = tpu.matmul %6, %8, %cst_7 {dimension_numbers = #tpu.dot_dimension_numbers<[1], [0], [0], [1], [0, 0, 1, 1], [], []>} : vector<213x32xbf16>, vector<32x96xbf16>, vector<213x96xf32> -> vector<213x96xf32>
    %10 = arith.addf %5, %9 : vector<213x96xf32>
    %c0_8 = arith.constant 0 : index
    %c0_9 = arith.constant 0 : index
    %11 = vector.load %arg6[%c0_8, %c0_9] : memref<1x96xf32, #tpu.memory_space<vmem>>, vector<1x96xf32>
    %12 = vector.broadcast %11 : vector<1x96xf32> to vector<213x96xf32>
    %13 = arith.addf %10, %12 : vector<213x96xf32>
    %cst_10 = arith.constant 0.000000e+00 : f32
    %14 = vector.broadcast %cst_10 : f32 to vector<213x96xf32>
    %15 = arith.cmpf oge, %13, %14 : vector<213x96xf32>
    %cst_11 = arith.constant 3.000000e-01 : f32
    %16 = vector.broadcast %cst_11 : f32 to vector<213x96xf32>
    %17 = arith.mulf %16, %13 : vector<213x96xf32>
    %18 = arith.select %15, %13, %17 : vector<213x96xi1>, vector<213x96xf32>
    %19 = arith.truncf %18 : vector<213x96xf32> to vector<213x96xbf16>
    %c0_12 = arith.constant 0 : index
    %c0_13 = arith.constant 0 : index
    %20 = vector.load %arg11[%c0_12, %c0_13] : memref<213x96xbf16, #tpu.memory_space<vmem>>, vector<213x96xbf16>
    tpu.vector_store %arg11[%c0_12, %c0_13], %19 {strides = array<i32>} : memref<213x96xbf16, #tpu.memory_space<vmem>>, vector<213x96xbf16>,
    %c0_14 = arith.constant 0 : index
    %c0_15 = arith.constant 0 : index
    %21 = vector.load %arg11[%c0_14, %c0_15] : memref<213x96xbf16, #tpu.memory_space<vmem>>, vector<211x96xbf16>
    %c0_16 = arith.constant 0 : index
    %c0_17 = arith.constant 0 : index
    %c0_18 = arith.constant 0 : index
    %22 = vector.load %arg3[%c0_16, %c0_17, %c0_18] : memref<3x96x32xbf16, #tpu.memory_space<vmem>>, vector<1x96x32xbf16>
    %23 = vector.shape_cast %22 : vector<1x96x32xbf16> to vector<96x32xbf16>
    %cst_19 = arith.constant dense<0.000000e+00> : vector<211x32xf32>
    %24 = tpu.matmul %21, %23, %cst_19 {dimension_numbers = #tpu.dot_dimension_numbers<[1], [0], [0], [1], [0, 0, 1, 1], [], []>} : vector<211x96xbf16>, vector<96x32xbf16>, vector<211x32xf32> -> vector<211x32xf32>
    %c1_20 = arith.constant 1 : index
    %c0_21 = arith.constant 0 : index
    %25 = vector.load %arg11[%c1_20, %c0_21] : memref<213x96xbf16, #tpu.memory_space<vmem>>, vector<211x96xbf16>
    %c1_22 = arith.constant 1 : index
    %c0_23 = arith.constant 0 : index
    %c0_24 = arith.constant 0 : index
    %26 = vector.load %arg3[%c1_22, %c0_23, %c0_24] : memref<3x96x32xbf16, #tpu.memory_space<vmem>>, vector<1x96x32xbf16>
    %27 = vector.shape_cast %26 : vector<1x96x32xbf16> to vector<96x32xbf16>
    %cst_25 = arith.constant dense<0.000000e+00> : vector<211x32xf32>
    %28 = tpu.matmul %25, %27, %cst_25 {dimension_numbers = #tpu.dot_dimension_numbers<[1], [0], [0], [1], [0, 0, 1, 1], [], []>} : vector<211x96xbf16>, vector<96x32xbf16>, vector<211x32xf32> -> vector<211x32xf32>
    %29 = arith.addf %24, %28 : vector<211x32xf32>
    %c2 = arith.constant 2 : index
    %c0_26 = arith.constant 0 : index
    %30 = vector.load %arg11[%c2, %c0_26] : memref<213x96xbf16, #tpu.memory_space<vmem>>, vector<211x96xbf16>
    %c2_27 = arith.constant 2 : index
    %c0_28 = arith.constant 0 : index
    %c0_29 = arith.constant 0 : index
    %31 = vector.load %arg3[%c2_27, %c0_28, %c0_29] : memref<3x96x32xbf16, #tpu.memory_space<vmem>>, vector<1x96x32xbf16>
    %32 = vector.shape_cast %31 : vector<1x96x32xbf16> to vector<96x32xbf16>
    %cst_30 = arith.constant dense<0.000000e+00> : vector<211x32xf32>
    %33 = tpu.matmul %30, %32, %cst_30 {dimension_numbers = #tpu.dot_dimension_numbers<[1], [0], [0], [1], [0, 0, 1, 1], [], []>} : vector<211x96xbf16>, vector<96x32xbf16>, vector<211x32xf32> -> vector<211x32xf32>
    %34 = arith.addf %29, %33 : vector<211x32xf32>
    %c0_31 = arith.constant 0 : index
    %c0_32 = arith.constant 0 : index
    %35 = vector.load %arg7[%c0_31, %c0_32] : memref<1x32xf32, #tpu.memory_space<vmem>>, vector<1x32xf32>
    %36 = vector.broadcast %35 : vector<1x32xf32> to vector<211x32xf32>
    %37 = arith.addf %34, %36 : vector<211x32xf32>
    %cst_33 = arith.constant 0.000000e+00 : f32
    %38 = vector.broadcast %cst_33 : f32 to vector<211x32xf32>
    %39 = arith.cmpf oge, %37, %38 : vector<211x32xf32>
    %cst_34 = arith.constant 3.000000e-01 : f32
    %40 = vector.broadcast %cst_34 : f32 to vector<211x32xf32>
    %41 = arith.mulf %40, %37 : vector<211x32xf32>
    %42 = arith.select %39, %37, %41 : vector<211x32xi1>, vector<211x32xf32>
    %c0_35 = arith.constant 0 : index
    %c0_36 = arith.constant 0 : index
    %43 = vector.load %arg12[%c0_35, %c0_36] : memref<216x32xf32, #tpu.memory_space<vmem>>, vector<211x32xf32>
    tpu.vector_store %arg12[%c0_35, %c0_36], %42 {strides = array<i32>} : memref<216x32xf32, #tpu.memory_space<vmem>>, vector<211x32xf32>,
    %cst_37 = arith.constant 0.000000e+00 : f32
    %44 = vector.broadcast %cst_37 : f32 to vector<5x32xf32>
    %c211 = arith.constant 211 : index
    %c0_38 = arith.constant 0 : index
    %45 = vector.load %arg12[%c211, %c0_38] : memref<216x32xf32, #tpu.memory_space<vmem>>, vector<5x32xf32>
    tpu.vector_store %arg12[%c211, %c0_38], %44 {strides = array<i32>} : memref<216x32xf32, #tpu.memory_space<vmem>>, vector<5x32xf32>,
    %c0_39 = arith.constant 0 : index
    %c0_40 = arith.constant 0 : index
    %46 = tpu.strided_load %arg12[%c0_39, %c0_40] {strides = array<i32: 6, 1>} : memref<216x32xf32, #tpu.memory_space<vmem>>, vector<36x32xf32>
    %47 = arith.truncf %46 : vector<36x32xf32> to vector<36x32xbf16>
    %c0_41 = arith.constant 0 : index
    %c0_42 = arith.constant 0 : index
    %48 = vector.load %arg13[%c0_41, %c0_42] : memref<36x192xbf16, #tpu.memory_space<vmem>>, vector<36x32xbf16>
    tpu.vector_store %arg13[%c0_41, %c0_42], %47 {strides = array<i32>} : memref<36x192xbf16, #tpu.memory_space<vmem>>, vector<36x32xbf16>,
    %c1_43 = arith.constant 1 : index
    %c0_44 = arith.constant 0 : index
    %49 = tpu.strided_load %arg12[%c1_43, %c0_44] {strides = array<i32: 6, 1>} : memref<216x32xf32, #tpu.memory_space<vmem>>, vector<36x32xf32>
    %50 = arith.truncf %49 : vector<36x32xf32> to vector<36x32xbf16>
    %c0_45 = arith.constant 0 : index
    %c32 = arith.constant 32 : index
    %51 = vector.load %arg13[%c0_45, %c32] : memref<36x192xbf16, #tpu.memory_space<vmem>>, vector<36x32xbf16>
    tpu.vector_store %arg13[%c0_45, %c32], %50 {strides = array<i32>} : memref<36x192xbf16, #tpu.memory_space<vmem>>, vector<36x32xbf16>,
    %c2_46 = arith.constant 2 : index
    %c0_47 = arith.constant 0 : index
    %52 = tpu.strided_load %arg12[%c2_46, %c0_47] {strides = array<i32: 6, 1>} : memref<216x32xf32, #tpu.memory_space<vmem>>, vector<36x32xf32>
    %53 = arith.truncf %52 : vector<36x32xf32> to vector<36x32xbf16>
    %c0_48 = arith.constant 0 : index
    %c64 = arith.constant 64 : index
    %54 = vector.load %arg13[%c0_48, %c64] : memref<36x192xbf16, #tpu.memory_space<vmem>>, vector<36x32xbf16>
    tpu.vector_store %arg13[%c0_48, %c64], %53 {strides = array<i32>} : memref<36x192xbf16, #tpu.memory_space<vmem>>, vector<36x32xbf16>,
    %c3 = arith.constant 3 : index
    %c0_49 = arith.constant 0 : index
    %55 = tpu.strided_load %arg12[%c3, %c0_49] {strides = array<i32: 6, 1>} : memref<216x32xf32, #tpu.memory_space<vmem>>, vector<36x32xf32>
    %56 = arith.truncf %55 : vector<36x32xf32> to vector<36x32xbf16>
    %c0_50 = arith.constant 0 : index
    %c96 = arith.constant 96 : index
    %57 = vector.load %arg13[%c0_50, %c96] : memref<36x192xbf16, #tpu.memory_space<vmem>>, vector<36x32xbf16>
    tpu.vector_store %arg13[%c0_50, %c96], %56 {strides = array<i32>} : memref<36x192xbf16, #tpu.memory_space<vmem>>, vector<36x32xbf16>,
    %c4 = arith.constant 4 : index
    %c0_51 = arith.constant 0 : index
    %58 = tpu.strided_load %arg12[%c4, %c0_51] {strides = array<i32: 6, 1>} : memref<216x32xf32, #tpu.memory_space<vmem>>, vector<36x32xf32>
    %59 = arith.truncf %58 : vector<36x32xf32> to vector<36x32xbf16>
    %c0_52 = arith.constant 0 : index
    %c128 = arith.constant 128 : index
    %60 = vector.load %arg13[%c0_52, %c128] : memref<36x192xbf16, #tpu.memory_space<vmem>>, vector<36x32xbf16>
    tpu.vector_store %arg13[%c0_52, %c128], %59 {strides = array<i32>} : memref<36x192xbf16, #tpu.memory_space<vmem>>, vector<36x32xbf16>,
    %c5 = arith.constant 5 : index
    %c0_53 = arith.constant 0 : index
    %61 = tpu.strided_load %arg12[%c5, %c0_53] {strides = array<i32: 6, 1>} : memref<216x32xf32, #tpu.memory_space<vmem>>, vector<36x32xf32>
    %62 = arith.truncf %61 : vector<36x32xf32> to vector<36x32xbf16>
    %c0_54 = arith.constant 0 : index
    %c160 = arith.constant 160 : index
    %63 = vector.load %arg13[%c0_54, %c160] : memref<36x192xbf16, #tpu.memory_space<vmem>>, vector<36x32xbf16>
    tpu.vector_store %arg13[%c0_54, %c160], %62 {strides = array<i32>} : memref<36x192xbf16, #tpu.memory_space<vmem>>, vector<36x32xbf16>,
    %c0_55 = arith.constant 0 : index
    %c0_56 = arith.constant 0 : index
    %64 = vector.load %arg13[%c0_55, %c0_56] : memref<36x192xbf16, #tpu.memory_space<vmem>>, vector<33x192xbf16>
    %c0_57 = arith.constant 0 : index
    %c0_58 = arith.constant 0 : index
    %c0_59 = arith.constant 0 : index
    %65 = vector.load %arg4[%c0_57, %c0_58, %c0_59] : memref<3x192x64xbf16, #tpu.memory_space<vmem>>, vector<1x192x64xbf16>
    %66 = vector.shape_cast %65 : vector<1x192x64xbf16> to vector<192x64xbf16>
    %cst_60 = arith.constant dense<0.000000e+00> : vector<33x64xf32>
    %67 = tpu.matmul %64, %66, %cst_60 {dimension_numbers = #tpu.dot_dimension_numbers<[1], [0], [0], [1], [0, 0, 1, 1], [], []>} : vector<33x192xbf16>, vector<192x64xbf16>, vector<33x64xf32> -> vector<33x64xf32>
    %c1_61 = arith.constant 1 : index
    %c0_62 = arith.constant 0 : index
    %68 = vector.load %arg13[%c1_61, %c0_62] : memref<36x192xbf16, #tpu.memory_space<vmem>>, vector<33x192xbf16>
    %c1_63 = arith.constant 1 : index
    %c0_64 = arith.constant 0 : index
    %c0_65 = arith.constant 0 : index
    %69 = vector.load %arg4[%c1_63, %c0_64, %c0_65] : memref<3x192x64xbf16, #tpu.memory_space<vmem>>, vector<1x192x64xbf16>
    %70 = vector.shape_cast %69 : vector<1x192x64xbf16> to vector<192x64xbf16>
    %cst_66 = arith.constant dense<0.000000e+00> : vector<33x64xf32>
    %71 = tpu.matmul %68, %70, %cst_66 {dimension_numbers = #tpu.dot_dimension_numbers<[1], [0], [0], [1], [0, 0, 1, 1], [], []>} : vector<33x192xbf16>, vector<192x64xbf16>, vector<33x64xf32> -> vector<33x64xf32>
    %72 = arith.addf %67, %71 : vector<33x64xf32>
    %c2_67 = arith.constant 2 : index
    %c0_68 = arith.constant 0 : index
    %73 = vector.load %arg13[%c2_67, %c0_68] : memref<36x192xbf16, #tpu.memory_space<vmem>>, vector<33x192xbf16>
    %c2_69 = arith.constant 2 : index
    %c0_70 = arith.constant 0 : index
    %c0_71 = arith.constant 0 : index
    %74 = vector.load %arg4[%c2_69, %c0_70, %c0_71] : memref<3x192x64xbf16, #tpu.memory_space<vmem>>, vector<1x192x64xbf16>
    %75 = vector.shape_cast %74 : vector<1x192x64xbf16> to vector<192x64xbf16>
    %cst_72 = arith.constant dense<0.000000e+00> : vector<33x64xf32>
    %76 = tpu.matmul %73, %75, %cst_72 {dimension_numbers = #tpu.dot_dimension_numbers<[1], [0], [0], [1], [0, 0, 1, 1], [], []>} : vector<33x192xbf16>, vector<192x64xbf16>, vector<33x64xf32> -> vector<33x64xf32>
    %77 = arith.addf %72, %76 : vector<33x64xf32>
    %c0_73 = arith.constant 0 : index
    %c0_74 = arith.constant 0 : index
    %78 = vector.load %arg8[%c0_73, %c0_74] : memref<1x64xf32, #tpu.memory_space<vmem>>, vector<1x64xf32>
    %79 = vector.broadcast %78 : vector<1x64xf32> to vector<33x64xf32>
    %80 = arith.addf %77, %79 : vector<33x64xf32>
    %cst_75 = arith.constant 0.000000e+00 : f32
    %81 = vector.broadcast %cst_75 : f32 to vector<33x64xf32>
    %82 = arith.cmpf oge, %80, %81 : vector<33x64xf32>
    %cst_76 = arith.constant 3.000000e-01 : f32
    %83 = vector.broadcast %cst_76 : f32 to vector<33x64xf32>
    %84 = arith.mulf %83, %80 : vector<33x64xf32>
    %85 = arith.select %82, %80, %84 : vector<33x64xi1>, vector<33x64xf32>
    %c0_77 = arith.constant 0 : index
    %c0_78 = arith.constant 0 : index
    %86 = vector.load %arg14[%c0_77, %c0_78] : memref<36x64xf32, #tpu.memory_space<vmem>>, vector<33x64xf32>
    tpu.vector_store %arg14[%c0_77, %c0_78], %85 {strides = array<i32>} : memref<36x64xf32, #tpu.memory_space<vmem>>, vector<33x64xf32>,
    %cst_79 = arith.constant 0.000000e+00 : f32
    %87 = vector.broadcast %cst_79 : f32 to vector<3x64xf32>
    %c33 = arith.constant 33 : index
    %c0_80 = arith.constant 0 : index
    %88 = vector.load %arg14[%c33, %c0_80] : memref<36x64xf32, #tpu.memory_space<vmem>>, vector<3x64xf32>
    tpu.vector_store %arg14[%c33, %c0_80], %87 {strides = array<i32>} : memref<36x64xf32, #tpu.memory_space<vmem>>, vector<3x64xf32>,
    %c0_81 = arith.constant 0 : index
    %c0_82 = arith.constant 0 : index
    %89 = tpu.strided_load %arg14[%c0_81, %c0_82] {strides = array<i32: 6, 1>} : memref<36x64xf32, #tpu.memory_space<vmem>>, vector<6x64xf32>
    %90 = arith.truncf %89 : vector<6x64xf32> to vector<6x64xbf16>
    %c0_83 = arith.constant 0 : index
    %c0_84 = arith.constant 0 : index
    %91 = vector.load %arg15[%c0_83, %c0_84] : memref<6x384xbf16, #tpu.memory_space<vmem>>, vector<6x64xbf16>
    tpu.vector_store %arg15[%c0_83, %c0_84], %90 {strides = array<i32>} : memref<6x384xbf16, #tpu.memory_space<vmem>>, vector<6x64xbf16>,
    %c1_85 = arith.constant 1 : index
    %c0_86 = arith.constant 0 : index
    %92 = tpu.strided_load %arg14[%c1_85, %c0_86] {strides = array<i32: 6, 1>} : memref<36x64xf32, #tpu.memory_space<vmem>>, vector<6x64xf32>
    %93 = arith.truncf %92 : vector<6x64xf32> to vector<6x64xbf16>
    %c0_87 = arith.constant 0 : index
    %c64_88 = arith.constant 64 : index
    %94 = vector.load %arg15[%c0_87, %c64_88] : memref<6x384xbf16, #tpu.memory_space<vmem>>, vector<6x64xbf16>
    tpu.vector_store %arg15[%c0_87, %c64_88], %93 {strides = array<i32>} : memref<6x384xbf16, #tpu.memory_space<vmem>>, vector<6x64xbf16>,
    %c2_89 = arith.constant 2 : index
    %c0_90 = arith.constant 0 : index
    %95 = tpu.strided_load %arg14[%c2_89, %c0_90] {strides = array<i32: 6, 1>} : memref<36x64xf32, #tpu.memory_space<vmem>>, vector<6x64xf32>
    %96 = arith.truncf %95 : vector<6x64xf32> to vector<6x64xbf16>
    %c0_91 = arith.constant 0 : index
    %c128_92 = arith.constant 128 : index
    %97 = vector.load %arg15[%c0_91, %c128_92] : memref<6x384xbf16, #tpu.memory_space<vmem>>, vector<6x64xbf16>
    tpu.vector_store %arg15[%c0_91, %c128_92], %96 {strides = array<i32>} : memref<6x384xbf16, #tpu.memory_space<vmem>>, vector<6x64xbf16>,
    %c3_93 = arith.constant 3 : index
    %c0_94 = arith.constant 0 : index
    %98 = tpu.strided_load %arg14[%c3_93, %c0_94] {strides = array<i32: 6, 1>} : memref<36x64xf32, #tpu.memory_space<vmem>>, vector<6x64xf32>
    %99 = arith.truncf %98 : vector<6x64xf32> to vector<6x64xbf16>
    %c0_95 = arith.constant 0 : index
    %c192 = arith.constant 192 : index
    %100 = vector.load %arg15[%c0_95, %c192] : memref<6x384xbf16, #tpu.memory_space<vmem>>, vector<6x64xbf16>
    tpu.vector_store %arg15[%c0_95, %c192], %99 {strides = array<i32>} : memref<6x384xbf16, #tpu.memory_space<vmem>>, vector<6x64xbf16>,
    %c4_96 = arith.constant 4 : index
    %c0_97 = arith.constant 0 : index
    %101 = tpu.strided_load %arg14[%c4_96, %c0_97] {strides = array<i32: 6, 1>} : memref<36x64xf32, #tpu.memory_space<vmem>>, vector<6x64xf32>
    %102 = arith.truncf %101 : vector<6x64xf32> to vector<6x64xbf16>
    %c0_98 = arith.constant 0 : index
    %c256 = arith.constant 256 : index
    %103 = vector.load %arg15[%c0_98, %c256] : memref<6x384xbf16, #tpu.memory_space<vmem>>, vector<6x64xbf16>
    tpu.vector_store %arg15[%c0_98, %c256], %102 {strides = array<i32>} : memref<6x384xbf16, #tpu.memory_space<vmem>>, vector<6x64xbf16>,
    %c5_99 = arith.constant 5 : index
    %c0_100 = arith.constant 0 : index
    %104 = tpu.strided_load %arg14[%c5_99, %c0_100] {strides = array<i32: 6, 1>} : memref<36x64xf32, #tpu.memory_space<vmem>>, vector<6x64xf32>
    %105 = arith.truncf %104 : vector<6x64xf32> to vector<6x64xbf16>
    %c0_101 = arith.constant 0 : index
    %c320 = arith.constant 320 : index
    %106 = vector.load %arg15[%c0_101, %c320] : memref<6x384xbf16, #tpu.memory_space<vmem>>, vector<6x64xbf16>
    tpu.vector_store %arg15[%c0_101, %c320], %105 {strides = array<i32>} : memref<6x384xbf16, #tpu.memory_space<vmem>>, vector<6x64xbf16>,
    %c0_102 = arith.constant 0 : index
    %c0_103 = arith.constant 0 : index
    %107 = vector.load %arg15[%c0_102, %c0_103] : memref<6x384xbf16, #tpu.memory_space<vmem>>, vector<4x384xbf16>
    %c0_104 = arith.constant 0 : index
    %c0_105 = arith.constant 0 : index
    %c0_106 = arith.constant 0 : index
    %108 = vector.load %arg5[%c0_104, %c0_105, %c0_106] : memref<3x384x32xbf16, #tpu.memory_space<vmem>>, vector<1x384x32xbf16>
    %109 = vector.shape_cast %108 : vector<1x384x32xbf16> to vector<384x32xbf16>
    %cst_107 = arith.constant dense<0.000000e+00> : vector<4x32xf32>
    %110 = tpu.matmul %107, %109, %cst_107 {dimension_numbers = #tpu.dot_dimension_numbers<[1], [0], [0], [1], [0, 0, 1, 1], [], []>} : vector<4x384xbf16>, vector<384x32xbf16>, vector<4x32xf32> -> vector<4x32xf32>
    %c1_108 = arith.constant 1 : index
    %c0_109 = arith.constant 0 : index
    %111 = vector.load %arg15[%c1_108, %c0_109] : memref<6x384xbf16, #tpu.memory_space<vmem>>, vector<4x384xbf16>
    %c1_110 = arith.constant 1 : index
    %c0_111 = arith.constant 0 : index
    %c0_112 = arith.constant 0 : index
    %112 = vector.load %arg5[%c1_110, %c0_111, %c0_112] : memref<3x384x32xbf16, #tpu.memory_space<vmem>>, vector<1x384x32xbf16>
    %113 = vector.shape_cast %112 : vector<1x384x32xbf16> to vector<384x32xbf16>
    %cst_113 = arith.constant dense<0.000000e+00> : vector<4x32xf32>
    %114 = tpu.matmul %111, %113, %cst_113 {dimension_numbers = #tpu.dot_dimension_numbers<[1], [0], [0], [1], [0, 0, 1, 1], [], []>} : vector<4x384xbf16>, vector<384x32xbf16>, vector<4x32xf32> -> vector<4x32xf32>
    %115 = arith.addf %110, %114 : vector<4x32xf32>
    %c2_114 = arith.constant 2 : index
    %c0_115 = arith.constant 0 : index
    %116 = vector.load %arg15[%c2_114, %c0_115] : memref<6x384xbf16, #tpu.memory_space<vmem>>, vector<4x384xbf16>
    %c2_116 = arith.constant 2 : index
    %c0_117 = arith.constant 0 : index
    %c0_118 = arith.constant 0 : index
    %117 = vector.load %arg5[%c2_116, %c0_117, %c0_118] : memref<3x384x32xbf16, #tpu.memory_space<vmem>>, vector<1x384x32xbf16>
    %118 = vector.shape_cast %117 : vector<1x384x32xbf16> to vector<384x32xbf16>
    %cst_119 = arith.constant dense<0.000000e+00> : vector<4x32xf32>
    %119 = tpu.matmul %116, %118, %cst_119 {dimension_numbers = #tpu.dot_dimension_numbers<[1], [0], [0], [1], [0, 0, 1, 1], [], []>} : vector<4x384xbf16>, vector<384x32xbf16>, vector<4x32xf32> -> vector<4x32xf32>
    %120 = arith.addf %115, %119 : vector<4x32xf32>
    %c0_120 = arith.constant 0 : index
    %c0_121 = arith.constant 0 : index
    %121 = vector.load %arg9[%c0_120, %c0_121] : memref<1x32xf32, #tpu.memory_space<vmem>>, vector<1x32xf32>
    %122 = vector.broadcast %121 : vector<1x32xf32> to vector<4x32xf32>
    %123 = arith.addf %120, %122 : vector<4x32xf32>
    %c0_122 = arith.constant 0 : index
    %c0_123 = arith.constant 0 : index
    %c0_124 = arith.constant 0 : index
    %124 = vector.load %arg10[%c0_122, %c0_123, %c0_124] : memref<2x4x32xf32, #tpu.memory_space<vmem>>, vector<1x4x32xf32>
    %125 = vector.shape_cast %124 : vector<1x4x32xf32> to vector<4x32xf32>
    %126 = vector.shape_cast %123 : vector<4x32xf32> to vector<1x4x32xf32>
    tpu.vector_store %arg10[%c0_122, %c0_123, %c0_124], %126 {strides = array<i32>} : memref<2x4x32xf32, #tpu.memory_space<vmem>>, vector<1x4x32xf32>,
    %c1_125 = arith.constant 1 : index
    %c0_126 = arith.constant 0 : index
    %c0_127 = arith.constant 0 : index
    %127 = vector.load %arg1[%c1_125, %c0_126, %c0_127] : memref<2x214x32xbf16, #tpu.memory_space<vmem>>, vector<1x214x32xbf16>
    %128 = vector.shape_cast %127 : vector<1x214x32xbf16> to vector<214x32xbf16>
    %129 = vector.extract_strided_slice %128 {offsets = [0, 0], sizes = [213, 32], strides = [1, 1]} : vector<214x32xbf16> to vector<213x32xbf16>
    %c0_128 = arith.constant 0 : index
    %c0_129 = arith.constant 0 : index
    %c0_130 = arith.constant 0 : index
    %130 = vector.load %arg2[%c0_128, %c0_129, %c0_130] : memref<2x32x96xbf16, #tpu.memory_space<vmem>>, vector<1x32x96xbf16>
    %131 = vector.shape_cast %130 : vector<1x32x96xbf16> to vector<32x96xbf16>
    %cst_131 = arith.constant dense<0.000000e+00> : vector<213x96xf32>
    %132 = tpu.matmul %129, %131, %cst_131 {dimension_numbers = #tpu.dot_dimension_numbers<[1], [0], [0], [1], [0, 0, 1, 1], [], []>} : vector<213x32xbf16>, vector<32x96xbf16>, vector<213x96xf32> -> vector<213x96xf32>
    %133 = vector.extract_strided_slice %128 {offsets = [1, 0], sizes = [213, 32], strides = [1, 1]} : vector<214x32xbf16> to vector<213x32xbf16>
    %c1_132 = arith.constant 1 : index
    %c0_133 = arith.constant 0 : index
    %c0_134 = arith.constant 0 : index
    %134 = vector.load %arg2[%c1_132, %c0_133, %c0_134] : memref<2x32x96xbf16, #tpu.memory_space<vmem>>, vector<1x32x96xbf16>
    %135 = vector.shape_cast %134 : vector<1x32x96xbf16> to vector<32x96xbf16>
    %cst_135 = arith.constant dense<0.000000e+00> : vector<213x96xf32>
    %136 = tpu.matmul %133, %135, %cst_135 {dimension_numbers = #tpu.dot_dimension_numbers<[1], [0], [0], [1], [0, 0, 1, 1], [], []>} : vector<213x32xbf16>, vector<32x96xbf16>, vector<213x96xf32> -> vector<213x96xf32>
    %137 = arith.addf %132, %136 : vector<213x96xf32>
    %c0_136 = arith.constant 0 : index
    %c0_137 = arith.constant 0 : index
    %138 = vector.load %arg6[%c0_136, %c0_137] : memref<1x96xf32, #tpu.memory_space<vmem>>, vector<1x96xf32>
    %139 = vector.broadcast %138 : vector<1x96xf32> to vector<213x96xf32>
    %140 = arith.addf %137, %139 : vector<213x96xf32>
    %cst_138 = arith.constant 0.000000e+00 : f32
    %141 = vector.broadcast %cst_138 : f32 to vector<213x96xf32>
    %142 = arith.cmpf oge, %140, %141 : vector<213x96xf32>
    %cst_139 = arith.constant 3.000000e-01 : f32
    %143 = vector.broadcast %cst_139 : f32 to vector<213x96xf32>
    %144 = arith.mulf %143, %140 : vector<213x96xf32>
    %145 = arith.select %142, %140, %144 : vector<213x96xi1>, vector<213x96xf32>
    %146 = arith.truncf %145 : vector<213x96xf32> to vector<213x96xbf16>
    %c0_140 = arith.constant 0 : index
    %c0_141 = arith.constant 0 : index
    %147 = vector.load %arg11[%c0_140, %c0_141] : memref<213x96xbf16, #tpu.memory_space<vmem>>, vector<213x96xbf16>
    tpu.vector_store %arg11[%c0_140, %c0_141], %146 {strides = array<i32>} : memref<213x96xbf16, #tpu.memory_space<vmem>>, vector<213x96xbf16>,
    %c0_142 = arith.constant 0 : index
    %c0_143 = arith.constant 0 : index
    %148 = vector.load %arg11[%c0_142, %c0_143] : memref<213x96xbf16, #tpu.memory_space<vmem>>, vector<211x96xbf16>
    %c0_144 = arith.constant 0 : index
    %c0_145 = arith.constant 0 : index
    %c0_146 = arith.constant 0 : index
    %149 = vector.load %arg3[%c0_144, %c0_145, %c0_146] : memref<3x96x32xbf16, #tpu.memory_space<vmem>>, vector<1x96x32xbf16>
    %150 = vector.shape_cast %149 : vector<1x96x32xbf16> to vector<96x32xbf16>
    %cst_147 = arith.constant dense<0.000000e+00> : vector<211x32xf32>
    %151 = tpu.matmul %148, %150, %cst_147 {dimension_numbers = #tpu.dot_dimension_numbers<[1], [0], [0], [1], [0, 0, 1, 1], [], []>} : vector<211x96xbf16>, vector<96x32xbf16>, vector<211x32xf32> -> vector<211x32xf32>
    %c1_148 = arith.constant 1 : index
    %c0_149 = arith.constant 0 : index
    %152 = vector.load %arg11[%c1_148, %c0_149] : memref<213x96xbf16, #tpu.memory_space<vmem>>, vector<211x96xbf16>
    %c1_150 = arith.constant 1 : index
    %c0_151 = arith.constant 0 : index
    %c0_152 = arith.constant 0 : index
    %153 = vector.load %arg3[%c1_150, %c0_151, %c0_152] : memref<3x96x32xbf16, #tpu.memory_space<vmem>>, vector<1x96x32xbf16>
    %154 = vector.shape_cast %153 : vector<1x96x32xbf16> to vector<96x32xbf16>
    %cst_153 = arith.constant dense<0.000000e+00> : vector<211x32xf32>
    %155 = tpu.matmul %152, %154, %cst_153 {dimension_numbers = #tpu.dot_dimension_numbers<[1], [0], [0], [1], [0, 0, 1, 1], [], []>} : vector<211x96xbf16>, vector<96x32xbf16>, vector<211x32xf32> -> vector<211x32xf32>
    %156 = arith.addf %151, %155 : vector<211x32xf32>
    %c2_154 = arith.constant 2 : index
    %c0_155 = arith.constant 0 : index
    %157 = vector.load %arg11[%c2_154, %c0_155] : memref<213x96xbf16, #tpu.memory_space<vmem>>, vector<211x96xbf16>
    %c2_156 = arith.constant 2 : index
    %c0_157 = arith.constant 0 : index
    %c0_158 = arith.constant 0 : index
    %158 = vector.load %arg3[%c2_156, %c0_157, %c0_158] : memref<3x96x32xbf16, #tpu.memory_space<vmem>>, vector<1x96x32xbf16>
    %159 = vector.shape_cast %158 : vector<1x96x32xbf16> to vector<96x32xbf16>
    %cst_159 = arith.constant dense<0.000000e+00> : vector<211x32xf32>
    %160 = tpu.matmul %157, %159, %cst_159 {dimension_numbers = #tpu.dot_dimension_numbers<[1], [0], [0], [1], [0, 0, 1, 1], [], []>} : vector<211x96xbf16>, vector<96x32xbf16>, vector<211x32xf32> -> vector<211x32xf32>
    %161 = arith.addf %156, %160 : vector<211x32xf32>
    %c0_160 = arith.constant 0 : index
    %c0_161 = arith.constant 0 : index
    %162 = vector.load %arg7[%c0_160, %c0_161] : memref<1x32xf32, #tpu.memory_space<vmem>>, vector<1x32xf32>
    %163 = vector.broadcast %162 : vector<1x32xf32> to vector<211x32xf32>
    %164 = arith.addf %161, %163 : vector<211x32xf32>
    %cst_162 = arith.constant 0.000000e+00 : f32
    %165 = vector.broadcast %cst_162 : f32 to vector<211x32xf32>
    %166 = arith.cmpf oge, %164, %165 : vector<211x32xf32>
    %cst_163 = arith.constant 3.000000e-01 : f32
    %167 = vector.broadcast %cst_163 : f32 to vector<211x32xf32>
    %168 = arith.mulf %167, %164 : vector<211x32xf32>
    %169 = arith.select %166, %164, %168 : vector<211x32xi1>, vector<211x32xf32>
    %c0_164 = arith.constant 0 : index
    %c0_165 = arith.constant 0 : index
    %170 = vector.load %arg12[%c0_164, %c0_165] : memref<216x32xf32, #tpu.memory_space<vmem>>, vector<211x32xf32>
    tpu.vector_store %arg12[%c0_164, %c0_165], %169 {strides = array<i32>} : memref<216x32xf32, #tpu.memory_space<vmem>>, vector<211x32xf32>,
    %cst_166 = arith.constant 0.000000e+00 : f32
    %171 = vector.broadcast %cst_166 : f32 to vector<5x32xf32>
    %c211_167 = arith.constant 211 : index
    %c0_168 = arith.constant 0 : index
    %172 = vector.load %arg12[%c211_167, %c0_168] : memref<216x32xf32, #tpu.memory_space<vmem>>, vector<5x32xf32>
    tpu.vector_store %arg12[%c211_167, %c0_168], %171 {strides = array<i32>} : memref<216x32xf32, #tpu.memory_space<vmem>>, vector<5x32xf32>,
    %c0_169 = arith.constant 0 : index
    %c0_170 = arith.constant 0 : index
    %173 = tpu.strided_load %arg12[%c0_169, %c0_170] {strides = array<i32: 6, 1>} : memref<216x32xf32, #tpu.memory_space<vmem>>, vector<36x32xf32>
    %174 = arith.truncf %173 : vector<36x32xf32> to vector<36x32xbf16>
    %c0_171 = arith.constant 0 : index
    %c0_172 = arith.constant 0 : index
    %175 = vector.load %arg13[%c0_171, %c0_172] : memref<36x192xbf16, #tpu.memory_space<vmem>>, vector<36x32xbf16>
    tpu.vector_store %arg13[%c0_171, %c0_172], %174 {strides = array<i32>} : memref<36x192xbf16, #tpu.memory_space<vmem>>, vector<36x32xbf16>,
    %c1_173 = arith.constant 1 : index
    %c0_174 = arith.constant 0 : index
    %176 = tpu.strided_load %arg12[%c1_173, %c0_174] {strides = array<i32: 6, 1>} : memref<216x32xf32, #tpu.memory_space<vmem>>, vector<36x32xf32>
    %177 = arith.truncf %176 : vector<36x32xf32> to vector<36x32xbf16>
    %c0_175 = arith.constant 0 : index
    %c32_176 = arith.constant 32 : index
    %178 = vector.load %arg13[%c0_175, %c32_176] : memref<36x192xbf16, #tpu.memory_space<vmem>>, vector<36x32xbf16>
    tpu.vector_store %arg13[%c0_175, %c32_176], %177 {strides = array<i32>} : memref<36x192xbf16, #tpu.memory_space<vmem>>, vector<36x32xbf16>,
    %c2_177 = arith.constant 2 : index
    %c0_178 = arith.constant 0 : index
    %179 = tpu.strided_load %arg12[%c2_177, %c0_178] {strides = array<i32: 6, 1>} : memref<216x32xf32, #tpu.memory_space<vmem>>, vector<36x32xf32>
    %180 = arith.truncf %179 : vector<36x32xf32> to vector<36x32xbf16>
    %c0_179 = arith.constant 0 : index
    %c64_180 = arith.constant 64 : index
    %181 = vector.load %arg13[%c0_179, %c64_180] : memref<36x192xbf16, #tpu.memory_space<vmem>>, vector<36x32xbf16>
    tpu.vector_store %arg13[%c0_179, %c64_180], %180 {strides = array<i32>} : memref<36x192xbf16, #tpu.memory_space<vmem>>, vector<36x32xbf16>,
    %c3_181 = arith.constant 3 : index
    %c0_182 = arith.constant 0 : index
    %182 = tpu.strided_load %arg12[%c3_181, %c0_182] {strides = array<i32: 6, 1>} : memref<216x32xf32, #tpu.memory_space<vmem>>, vector<36x32xf32>
    %183 = arith.truncf %182 : vector<36x32xf32> to vector<36x32xbf16>
    %c0_183 = arith.constant 0 : index
    %c96_184 = arith.constant 96 : index
    %184 = vector.load %arg13[%c0_183, %c96_184] : memref<36x192xbf16, #tpu.memory_space<vmem>>, vector<36x32xbf16>
    tpu.vector_store %arg13[%c0_183, %c96_184], %183 {strides = array<i32>} : memref<36x192xbf16, #tpu.memory_space<vmem>>, vector<36x32xbf16>,
    %c4_185 = arith.constant 4 : index
    %c0_186 = arith.constant 0 : index
    %185 = tpu.strided_load %arg12[%c4_185, %c0_186] {strides = array<i32: 6, 1>} : memref<216x32xf32, #tpu.memory_space<vmem>>, vector<36x32xf32>
    %186 = arith.truncf %185 : vector<36x32xf32> to vector<36x32xbf16>
    %c0_187 = arith.constant 0 : index
    %c128_188 = arith.constant 128 : index
    %187 = vector.load %arg13[%c0_187, %c128_188] : memref<36x192xbf16, #tpu.memory_space<vmem>>, vector<36x32xbf16>
    tpu.vector_store %arg13[%c0_187, %c128_188], %186 {strides = array<i32>} : memref<36x192xbf16, #tpu.memory_space<vmem>>, vector<36x32xbf16>,
    %c5_189 = arith.constant 5 : index
    %c0_190 = arith.constant 0 : index
    %188 = tpu.strided_load %arg12[%c5_189, %c0_190] {strides = array<i32: 6, 1>} : memref<216x32xf32, #tpu.memory_space<vmem>>, vector<36x32xf32>
    %189 = arith.truncf %188 : vector<36x32xf32> to vector<36x32xbf16>
    %c0_191 = arith.constant 0 : index
    %c160_192 = arith.constant 160 : index
    %190 = vector.load %arg13[%c0_191, %c160_192] : memref<36x192xbf16, #tpu.memory_space<vmem>>, vector<36x32xbf16>
    tpu.vector_store %arg13[%c0_191, %c160_192], %189 {strides = array<i32>} : memref<36x192xbf16, #tpu.memory_space<vmem>>, vector<36x32xbf16>,
    %c0_193 = arith.constant 0 : index
    %c0_194 = arith.constant 0 : index
    %191 = vector.load %arg13[%c0_193, %c0_194] : memref<36x192xbf16, #tpu.memory_space<vmem>>, vector<33x192xbf16>
    %c0_195 = arith.constant 0 : index
    %c0_196 = arith.constant 0 : index
    %c0_197 = arith.constant 0 : index
    %192 = vector.load %arg4[%c0_195, %c0_196, %c0_197] : memref<3x192x64xbf16, #tpu.memory_space<vmem>>, vector<1x192x64xbf16>
    %193 = vector.shape_cast %192 : vector<1x192x64xbf16> to vector<192x64xbf16>
    %cst_198 = arith.constant dense<0.000000e+00> : vector<33x64xf32>
    %194 = tpu.matmul %191, %193, %cst_198 {dimension_numbers = #tpu.dot_dimension_numbers<[1], [0], [0], [1], [0, 0, 1, 1], [], []>} : vector<33x192xbf16>, vector<192x64xbf16>, vector<33x64xf32> -> vector<33x64xf32>
    %c1_199 = arith.constant 1 : index
    %c0_200 = arith.constant 0 : index
    %195 = vector.load %arg13[%c1_199, %c0_200] : memref<36x192xbf16, #tpu.memory_space<vmem>>, vector<33x192xbf16>
    %c1_201 = arith.constant 1 : index
    %c0_202 = arith.constant 0 : index
    %c0_203 = arith.constant 0 : index
    %196 = vector.load %arg4[%c1_201, %c0_202, %c0_203] : memref<3x192x64xbf16, #tpu.memory_space<vmem>>, vector<1x192x64xbf16>
    %197 = vector.shape_cast %196 : vector<1x192x64xbf16> to vector<192x64xbf16>
    %cst_204 = arith.constant dense<0.000000e+00> : vector<33x64xf32>
    %198 = tpu.matmul %195, %197, %cst_204 {dimension_numbers = #tpu.dot_dimension_numbers<[1], [0], [0], [1], [0, 0, 1, 1], [], []>} : vector<33x192xbf16>, vector<192x64xbf16>, vector<33x64xf32> -> vector<33x64xf32>
    %199 = arith.addf %194, %198 : vector<33x64xf32>
    %c2_205 = arith.constant 2 : index
    %c0_206 = arith.constant 0 : index
    %200 = vector.load %arg13[%c2_205, %c0_206] : memref<36x192xbf16, #tpu.memory_space<vmem>>, vector<33x192xbf16>
    %c2_207 = arith.constant 2 : index
    %c0_208 = arith.constant 0 : index
    %c0_209 = arith.constant 0 : index
    %201 = vector.load %arg4[%c2_207, %c0_208, %c0_209] : memref<3x192x64xbf16, #tpu.memory_space<vmem>>, vector<1x192x64xbf16>
    %202 = vector.shape_cast %201 : vector<1x192x64xbf16> to vector<192x64xbf16>
    %cst_210 = arith.constant dense<0.000000e+00> : vector<33x64xf32>
    %203 = tpu.matmul %200, %202, %cst_210 {dimension_numbers = #tpu.dot_dimension_numbers<[1], [0], [0], [1], [0, 0, 1, 1], [], []>} : vector<33x192xbf16>, vector<192x64xbf16>, vector<33x64xf32> -> vector<33x64xf32>
    %204 = arith.addf %199, %203 : vector<33x64xf32>
    %c0_211 = arith.constant 0 : index
    %c0_212 = arith.constant 0 : index
    %205 = vector.load %arg8[%c0_211, %c0_212] : memref<1x64xf32, #tpu.memory_space<vmem>>, vector<1x64xf32>
    %206 = vector.broadcast %205 : vector<1x64xf32> to vector<33x64xf32>
    %207 = arith.addf %204, %206 : vector<33x64xf32>
    %cst_213 = arith.constant 0.000000e+00 : f32
    %208 = vector.broadcast %cst_213 : f32 to vector<33x64xf32>
    %209 = arith.cmpf oge, %207, %208 : vector<33x64xf32>
    %cst_214 = arith.constant 3.000000e-01 : f32
    %210 = vector.broadcast %cst_214 : f32 to vector<33x64xf32>
    %211 = arith.mulf %210, %207 : vector<33x64xf32>
    %212 = arith.select %209, %207, %211 : vector<33x64xi1>, vector<33x64xf32>
    %c0_215 = arith.constant 0 : index
    %c0_216 = arith.constant 0 : index
    %213 = vector.load %arg14[%c0_215, %c0_216] : memref<36x64xf32, #tpu.memory_space<vmem>>, vector<33x64xf32>
    tpu.vector_store %arg14[%c0_215, %c0_216], %212 {strides = array<i32>} : memref<36x64xf32, #tpu.memory_space<vmem>>, vector<33x64xf32>,
    %cst_217 = arith.constant 0.000000e+00 : f32
    %214 = vector.broadcast %cst_217 : f32 to vector<3x64xf32>
    %c33_218 = arith.constant 33 : index
    %c0_219 = arith.constant 0 : index
    %215 = vector.load %arg14[%c33_218, %c0_219] : memref<36x64xf32, #tpu.memory_space<vmem>>, vector<3x64xf32>
    tpu.vector_store %arg14[%c33_218, %c0_219], %214 {strides = array<i32>} : memref<36x64xf32, #tpu.memory_space<vmem>>, vector<3x64xf32>,
    %c0_220 = arith.constant 0 : index
    %c0_221 = arith.constant 0 : index
    %216 = tpu.strided_load %arg14[%c0_220, %c0_221] {strides = array<i32: 6, 1>} : memref<36x64xf32, #tpu.memory_space<vmem>>, vector<6x64xf32>
    %217 = arith.truncf %216 : vector<6x64xf32> to vector<6x64xbf16>
    %c0_222 = arith.constant 0 : index
    %c0_223 = arith.constant 0 : index
    %218 = vector.load %arg15[%c0_222, %c0_223] : memref<6x384xbf16, #tpu.memory_space<vmem>>, vector<6x64xbf16>
    tpu.vector_store %arg15[%c0_222, %c0_223], %217 {strides = array<i32>} : memref<6x384xbf16, #tpu.memory_space<vmem>>, vector<6x64xbf16>,
    %c1_224 = arith.constant 1 : index
    %c0_225 = arith.constant 0 : index
    %219 = tpu.strided_load %arg14[%c1_224, %c0_225] {strides = array<i32: 6, 1>} : memref<36x64xf32, #tpu.memory_space<vmem>>, vector<6x64xf32>
    %220 = arith.truncf %219 : vector<6x64xf32> to vector<6x64xbf16>
    %c0_226 = arith.constant 0 : index
    %c64_227 = arith.constant 64 : index
    %221 = vector.load %arg15[%c0_226, %c64_227] : memref<6x384xbf16, #tpu.memory_space<vmem>>, vector<6x64xbf16>
    tpu.vector_store %arg15[%c0_226, %c64_227], %220 {strides = array<i32>} : memref<6x384xbf16, #tpu.memory_space<vmem>>, vector<6x64xbf16>,
    %c2_228 = arith.constant 2 : index
    %c0_229 = arith.constant 0 : index
    %222 = tpu.strided_load %arg14[%c2_228, %c0_229] {strides = array<i32: 6, 1>} : memref<36x64xf32, #tpu.memory_space<vmem>>, vector<6x64xf32>
    %223 = arith.truncf %222 : vector<6x64xf32> to vector<6x64xbf16>
    %c0_230 = arith.constant 0 : index
    %c128_231 = arith.constant 128 : index
    %224 = vector.load %arg15[%c0_230, %c128_231] : memref<6x384xbf16, #tpu.memory_space<vmem>>, vector<6x64xbf16>
    tpu.vector_store %arg15[%c0_230, %c128_231], %223 {strides = array<i32>} : memref<6x384xbf16, #tpu.memory_space<vmem>>, vector<6x64xbf16>,
    %c3_232 = arith.constant 3 : index
    %c0_233 = arith.constant 0 : index
    %225 = tpu.strided_load %arg14[%c3_232, %c0_233] {strides = array<i32: 6, 1>} : memref<36x64xf32, #tpu.memory_space<vmem>>, vector<6x64xf32>
    %226 = arith.truncf %225 : vector<6x64xf32> to vector<6x64xbf16>
    %c0_234 = arith.constant 0 : index
    %c192_235 = arith.constant 192 : index
    %227 = vector.load %arg15[%c0_234, %c192_235] : memref<6x384xbf16, #tpu.memory_space<vmem>>, vector<6x64xbf16>
    tpu.vector_store %arg15[%c0_234, %c192_235], %226 {strides = array<i32>} : memref<6x384xbf16, #tpu.memory_space<vmem>>, vector<6x64xbf16>,
    %c4_236 = arith.constant 4 : index
    %c0_237 = arith.constant 0 : index
    %228 = tpu.strided_load %arg14[%c4_236, %c0_237] {strides = array<i32: 6, 1>} : memref<36x64xf32, #tpu.memory_space<vmem>>, vector<6x64xf32>
    %229 = arith.truncf %228 : vector<6x64xf32> to vector<6x64xbf16>
    %c0_238 = arith.constant 0 : index
    %c256_239 = arith.constant 256 : index
    %230 = vector.load %arg15[%c0_238, %c256_239] : memref<6x384xbf16, #tpu.memory_space<vmem>>, vector<6x64xbf16>
    tpu.vector_store %arg15[%c0_238, %c256_239], %229 {strides = array<i32>} : memref<6x384xbf16, #tpu.memory_space<vmem>>, vector<6x64xbf16>,
    %c5_240 = arith.constant 5 : index
    %c0_241 = arith.constant 0 : index
    %231 = tpu.strided_load %arg14[%c5_240, %c0_241] {strides = array<i32: 6, 1>} : memref<36x64xf32, #tpu.memory_space<vmem>>, vector<6x64xf32>
    %232 = arith.truncf %231 : vector<6x64xf32> to vector<6x64xbf16>
    %c0_242 = arith.constant 0 : index
    %c320_243 = arith.constant 320 : index
    %233 = vector.load %arg15[%c0_242, %c320_243] : memref<6x384xbf16, #tpu.memory_space<vmem>>, vector<6x64xbf16>
    tpu.vector_store %arg15[%c0_242, %c320_243], %232 {strides = array<i32>} : memref<6x384xbf16, #tpu.memory_space<vmem>>, vector<6x64xbf16>,
    %c0_244 = arith.constant 0 : index
    %c0_245 = arith.constant 0 : index
    %234 = vector.load %arg15[%c0_244, %c0_245] : memref<6x384xbf16, #tpu.memory_space<vmem>>, vector<4x384xbf16>
    %c0_246 = arith.constant 0 : index
    %c0_247 = arith.constant 0 : index
    %c0_248 = arith.constant 0 : index
    %235 = vector.load %arg5[%c0_246, %c0_247, %c0_248] : memref<3x384x32xbf16, #tpu.memory_space<vmem>>, vector<1x384x32xbf16>
    %236 = vector.shape_cast %235 : vector<1x384x32xbf16> to vector<384x32xbf16>
    %cst_249 = arith.constant dense<0.000000e+00> : vector<4x32xf32>
    %237 = tpu.matmul %234, %236, %cst_249 {dimension_numbers = #tpu.dot_dimension_numbers<[1], [0], [0], [1], [0, 0, 1, 1], [], []>} : vector<4x384xbf16>, vector<384x32xbf16>, vector<4x32xf32> -> vector<4x32xf32>
    %c1_250 = arith.constant 1 : index
    %c0_251 = arith.constant 0 : index
    %238 = vector.load %arg15[%c1_250, %c0_251] : memref<6x384xbf16, #tpu.memory_space<vmem>>, vector<4x384xbf16>
    %c1_252 = arith.constant 1 : index
    %c0_253 = arith.constant 0 : index
    %c0_254 = arith.constant 0 : index
    %239 = vector.load %arg5[%c1_252, %c0_253, %c0_254] : memref<3x384x32xbf16, #tpu.memory_space<vmem>>, vector<1x384x32xbf16>
    %240 = vector.shape_cast %239 : vector<1x384x32xbf16> to vector<384x32xbf16>
    %cst_255 = arith.constant dense<0.000000e+00> : vector<4x32xf32>
    %241 = tpu.matmul %238, %240, %cst_255 {dimension_numbers = #tpu.dot_dimension_numbers<[1], [0], [0], [1], [0, 0, 1, 1], [], []>} : vector<4x384xbf16>, vector<384x32xbf16>, vector<4x32xf32> -> vector<4x32xf32>
    %242 = arith.addf %237, %241 : vector<4x32xf32>
    %c2_256 = arith.constant 2 : index
    %c0_257 = arith.constant 0 : index
    %243 = vector.load %arg15[%c2_256, %c0_257] : memref<6x384xbf16, #tpu.memory_space<vmem>>, vector<4x384xbf16>
    %c2_258 = arith.constant 2 : index
    %c0_259 = arith.constant 0 : index
    %c0_260 = arith.constant 0 : index
    %244 = vector.load %arg5[%c2_258, %c0_259, %c0_260] : memref<3x384x32xbf16, #tpu.memory_space<vmem>>, vector<1x384x32xbf16>
    %245 = vector.shape_cast %244 : vector<1x384x32xbf16> to vector<384x32xbf16>
    %cst_261 = arith.constant dense<0.000000e+00> : vector<4x32xf32>
    %246 = tpu.matmul %243, %245, %cst_261 {dimension_numbers = #tpu.dot_dimension_numbers<[1], [0], [0], [1], [0, 0, 1, 1], [], []>} : vector<4x384xbf16>, vector<384x32xbf16>, vector<4x32xf32> -> vector<4x32xf32>
    %247 = arith.addf %242, %246 : vector<4x32xf32>
    %c0_262 = arith.constant 0 : index
    %c0_263 = arith.constant 0 : index
    %248 = vector.load %arg9[%c0_262, %c0_263] : memref<1x32xf32, #tpu.memory_space<vmem>>, vector<1x32xf32>
    %249 = vector.broadcast %248 : vector<1x32xf32> to vector<4x32xf32>
    %250 = arith.addf %247, %249 : vector<4x32xf32>
    %c1_264 = arith.constant 1 : index
    %c0_265 = arith.constant 0 : index
    %c0_266 = arith.constant 0 : index
    %251 = vector.load %arg10[%c1_264, %c0_265, %c0_266] : memref<2x4x32xf32, #tpu.memory_space<vmem>>, vector<1x4x32xf32>
    %252 = vector.shape_cast %251 : vector<1x4x32xf32> to vector<4x32xf32>
    %253 = vector.shape_cast %250 : vector<4x32xf32> to vector<1x4x32xf32>
    tpu.vector_store %arg10[%c1_264, %c0_265, %c0_266], %253 {strides = array<i32>} : memref<2x4x32xf32, #tpu.memory_space<vmem>>, vector<1x4x32xf32>,
    return
  }
  func.func @transform_0(%arg0: i32) -> (i32, i32, i32) {
    %c0_i32 = arith.constant 0 : i32
    %c0_i32_0 = arith.constant 0 : i32
    %c0_i32_1 = arith.constant 0 : i32
    return %arg0, %c0_i32, %c0_i32_0 : i32, i32, i32
  }
  func.func @transform_1(%arg0: i32) -> (i32, i32, i32) {
    %c0_i32 = arith.constant 0 : i32
    %c0_i32_0 = arith.constant 0 : i32
    %c0_i32_1 = arith.constant 0 : i32
    %c0_i32_2 = arith.constant 0 : i32
    return %c0_i32, %c0_i32_0, %c0_i32_1 : i32, i32, i32
  }
  func.func @transform_2(%arg0: i32) -> (i32, i32, i32) {
    %c0_i32 = arith.constant 0 : i32
    %c0_i32_0 = arith.constant 0 : i32
    %c0_i32_1 = arith.constant 0 : i32
    %c0_i32_2 = arith.constant 0 : i32
    return %c0_i32, %c0_i32_0, %c0_i32_1 : i32, i32, i32
  }
  func.func @transform_3(%arg0: i32) -> (i32, i32, i32) {
    %c0_i32 = arith.constant 0 : i32
    %c0_i32_0 = arith.constant 0 : i32
    %c0_i32_1 = arith.constant 0 : i32
    %c0_i32_2 = arith.constant 0 : i32
    return %c0_i32, %c0_i32_0, %c0_i32_1 : i32, i32, i32
  }
  func.func @transform_4(%arg0: i32) -> (i32, i32, i32) {
    %c0_i32 = arith.constant 0 : i32
    %c0_i32_0 = arith.constant 0 : i32
    %c0_i32_1 = arith.constant 0 : i32
    %c0_i32_2 = arith.constant 0 : i32
    return %c0_i32, %c0_i32_0, %c0_i32_1 : i32, i32, i32
  }
  func.func @transform_5(%arg0: i32) -> (i32, i32) {
    %c0_i32 = arith.constant 0 : i32
    %c0_i32_0 = arith.constant 0 : i32
    %c0_i32_1 = arith.constant 0 : i32
    return %c0_i32, %c0_i32_0 : i32, i32
  }
  func.func @transform_6(%arg0: i32) -> (i32, i32) {
    %c0_i32 = arith.constant 0 : i32
    %c0_i32_0 = arith.constant 0 : i32
    %c0_i32_1 = arith.constant 0 : i32
    return %c0_i32, %c0_i32_0 : i32, i32
  }
  func.func @transform_7(%arg0: i32) -> (i32, i32) {
    %c0_i32 = arith.constant 0 : i32
    %c0_i32_0 = arith.constant 0 : i32
    %c0_i32_1 = arith.constant 0 : i32
    return %c0_i32, %c0_i32_0 : i32, i32
  }
  func.func @transform_8(%arg0: i32) -> (i32, i32) {
    %c0_i32 = arith.constant 0 : i32
    %c0_i32_0 = arith.constant 0 : i32
    %c0_i32_1 = arith.constant 0 : i32
    return %c0_i32, %c0_i32_0 : i32, i32
  }
  func.func @transform_9(%arg0: i32) -> (i32, i32, i32) {
    %c0_i32 = arith.constant 0 : i32
    %c0_i32_0 = arith.constant 0 : i32
    %c0_i32_1 = arith.constant 0 : i32
    return %arg0, %c0_i32, %c0_i32_0 : i32, i32, i32
  }
}

</mosaic_0001>

<bundles_post_ra>
// kernel: tile.6
= control target key start
LH: loop header
LB: loop body
LE: loop exit
PB: predicated region body
PF: predicated region fallthrough
CT: control target
= control target key end

     0   :  { %s22_s0 = inlined_call_operand.vmem [shape: f32[16], index: 0, kind: input, shape index: {}]   ;;  %s23_s1 = inlined_call_operand.vmem [shape: f32[6,16], index: 1, kind: output, shape index: {}]  }
   0x1   :  { %v4_v0 = vld [vmem:[%s22_s0] ss:$0 sm:$0xff] }
   0x2   :  { %5 = vst [vmem:[%s23_s1] sm:$0xff] %v4_v0 }

// kernel: tile.7
= control target key start
LH: loop header
LB: loop body
LE: loop exit
PB: predicated region body
PF: predicated region fallthrough
CT: control target
= control target key end

     0   :  { %s51_s10 = smov 80   ;;  %s52_s11 = smov 48   ;;  %vm3_vm0 = vcmask 130048   ;;  %vm9_vm1 = vcmask 786048   ;;  %vm15_vm2 = vcmask 654848   ;;  %vm21_vm3 = vcmask 523648   ;;  %s87_s0 = inlined_call_operand.vmem [shape: f32[6,16], index: 0, kind: input, shape index: {}]   ;;  %s88_s1 = inlined_call_operand.vmem [shape: f32[1,96], index: 1, kind: output, shape index: {}]  }
   0x1   :  { %v41_v0 = vld [vmem:[%s87_s0 + $0x5] sm:$0x1]   ;;  %v43_v1 = vld [vmem:[%s87_s0 + $0x3] sm:$0x1]   ;;  %v45_v2 = vld [vmem:[%s87_s0 + $0x1] sm:$0x1]  }
   0x2   :  { %7 = vrot.lane.b32.xlu0 %v41_v0, %s51_s10  ;;  %19 = vrot.lane.b32.xlu1 %v43_v1, %s52_s11  ;;  %s53_s14 = smov 16   ;;  %v42_v3 = vld [vmem:[%s87_s0 + $0x4] sm:$0x1]   ;;  %v44_v4 = vld [vmem:[%s87_s0 + $0x2] sm:$0x1]   ;;  %s54_s19 = smov 64  }
   0x3   :  { %31 = vrot.lane.b32.xlu2 %v45_v2, %s53_s14  ;;  %s55_s20 = smov 32   ;;  %v2_v5 = vld [vmem:[%s87_s0] sm:$0x1]   ;;  %vm27_vm4 = vcmask 392448   ;;  %vm33_vm5 = vcmask 261248  }
   0x4   :  { %4 = vst.msk [vmem:[#allocation0] sm:$0x1] %vm3_vm0, %v2_v5  }
   0xa   :  { %13 = vrot.lane.b32.xlu0 %v42_v3, %s54_s19  ;;  %25 = vrot.lane.b32.xlu1 %v44_v4, %s55_s20 }
  0x5d   :  { %v32_v6 = vpop.permute.xlu2 %31  }
  0x74   :  { %v8_v7 = vpop.permute.xlu0 %7   ;;  %v20_v8 = vpop.permute.xlu1 %19  }
  0x75   :  { %10 = vst.msk [vmem:[#allocation0] sm:$0x1] %vm9_vm1, %v8_v7  }
  0x7c   :  { %v14_v9 = vpop.permute.xlu0 %13   ;;  %v26_v10 = vpop.permute.xlu1 %25  }
  0x7d   :  { %16 = vst.msk [vmem:[#allocation0] sm:$0x1] %vm15_vm2, %v14_v9  }
  0x7e   :  { %22 = vst.msk [vmem:[#allocation0] sm:$0x1] %vm21_vm3, %v20_v8  }
  0x7f   :  { %28 = vst.msk [vmem:[#allocation0] sm:$0x1] %vm27_vm4, %v26_v10  }
  0x80   :  { %34 = vst.msk [vmem:[#allocation0] sm:$0x1] %vm33_vm5, %v32_v6  }
  0x87   :  { %v37_v11 = vld [vmem:[#allocation0] sm:$0x1] }
  0x88   :  { %40 = vst [vmem:[%s88_s1] sm:$0x1] %v37_v11 }

// kernel: _lambda_.1
= control target key start
LH: loop header
LB: loop body
LE: loop exit
PB: predicated region body
PF: predicated region fallthrough
CT: control target
= control target key end

     0   :  { %s11062_s0 = inlined_call_operand.vmem [shape: bf16[4,214,32], index: 0, kind: input, shape index: {}]   ;;  %s11063_s1 = inlined_call_operand.vmem [shape: bf16[2,32,96], index: 1, kind: input, shape index: {}]   ;;  %s11064_s2 = inlined_call_operand.vmem [shape: bf16[3,96,32], index: 2, kind: input, shape index: {}]   ;;  %s11065_s3 = inlined_call_operand.vmem [shape: bf16[3,192,64], index: 3, kind: input, shape index: {}]   ;;  %s11066_s4 = inlined_call_operand.vmem [shape: bf16[3,384,32], index: 4, kind: input, shape index: {}]   ;;  %s11067_s5 = inlined_call_operand.vmem [shape: f32[1,96], index: 5, kind: input, shape index: {}]   ;;  %s11068_s6 = inlined_call_operand.vmem [shape: f32[1,32], index: 6, kind: input, shape index: {}]   ;;  %s11069_s7 = inlined_call_operand.vmem [shape: f32[1,64], index: 7, kind: input, shape index: {}]   ;;  %s11070_s8 = inlined_call_operand.vmem [shape: f32[1,32], index: 8, kind: input, shape index: {}]   ;;  %s11071_s9 = inlined_call_operand.hbm [shape: f32[4,4,32], index: 9, kind: output, shape index: {}]  }
   0x1   :  { %11084 = sst [smem:[#allocation10_spill]] %s11062_s0 }
   0x2   :  { %14 = vsyncpa [#allocation8], 0 }
   0x3   :  { %16 = vsyncpa [#allocation8 + $0x1], 0  ;;  %s8938_s30 = smov 0   ;;  %s8940_s10 = smov 0  }
   0x4   :  { %s8942_s11 = smov 0   ;;  %s8944_s12 = smov 0  }
   0x5 LB: > { %s8959_s13 = sadd.s32 4294967295, %s8881_s12   ;;  %s6639_s14 = sadd.s32 4294967294, %s8881_s12   ;;  %s8881_s12 = sphi %s8944_s12, %s11106_s12   ;;  %s8877_s11 = sphi %s8942_s11, %s11105_s11   ;;  %s8873_s10 = sphi %s8940_s10, %s11104_s10   ;;  %s8869_s30 = sphi %s8938_s30, %s11103_s30  }
   0x6   : > { %s8963_s15 = sadd.s32 1, %s8881_s12   ;;  %s223_s16 = sadd.s32 1, %s8877_s11 }
   0x7   : > { %s220_s17 = ssub.s32 %s8881_s12, %s8963_s15  ;;  %p233_p0 = scmp.ne.s32.totalorder %s8877_s11, %s8873_s10 }
   0x8   : > { %p221_p1 = scmp.eq.s32.totalorder %s220_s17, 0  ;;  %p234_p2 = scmp.eq.s32.totalorder %s8959_s13, 1 }
   0x9   : > { %p239_p3 = scmp.ne.s32.totalorder %s8873_s10, %s8869_s30  ;;  %p240_p4 = scmp.eq.s32.totalorder %s6639_s14, 1 }
   0xa   : > { %s8974_s18 = scalar_select %p221_p1, %s8877_s11, %s223_s16  }
   0xb   : > { %p8976_p5 = por %p234_p2, %p233_p0  ;;  %p8980_p6 = por %p240_p4, %p239_p3 }
   0xc   : > { %p6642_p7 = scmp.ge.s32.totalorder %s8881_s12, 1  ;;  %p292_p8 = scmp.lt.s32.totalorder %s8881_s12, 3 }
   0xe   : > { %p293_p9 = pnand %p6642_p7, %p292_p8 }
   0xf   : > { %s6644_s25 = sshll.u32 (!%p293_p9), %s8959_s13, 1  ;;  %s11087_s0 = sld [smem:[#allocation10_spill]] (!%p293_p9) }
  0x10   : > { %296 = sbr.rel (%p293_p9) target bundleno = 2354 (0x932), region = 56  ;;  %p330_p10 = scmp.lt.s32.totalorder (!%p293_p9), %s6644_s25, 3 }
  0x11   : > { %s11080_s29 = smov (!%p293_p9), 96   ;;  %s11078_s14 = smov (!%p293_p9), 64  }
  0x12   : > { %s11074_s16 = smov (!%p293_p9), 32   ;;  %s11083_s22 = sand.u32 (!%p293_p9), 1, %s8873_s10  }
  0x13   : > { %s6643_s24 = sshll.u32 (!%p293_p9), %s11083_s22, 3  ;;  %s11090_s21 = smov (!%p293_p9), 96  }
  0x14   : > { %s10092_s28 = scalar_lea.vmem (!%p293_p9), [#allocation7], %s6643_s24  ;;  %s8839_s26 = scalar_lea.hbm (!%p293_p9), %s11071_s9, 16 }
  0x15   : > { %v8453_v0 = vld [vmem:[%s11063_s1 + $0x18] sm:$0xff]  ;;  %v8451_v1 = vld [vmem:[%s11063_s1 + $0x8] sm:$0xff]  ;;  %v8452_v2 = vld [vmem:[%s11063_s1 + $0x10] sm:$0xff]  ;;  %s11108_s25 = smov (!%p330_p10, %s6644_s25), 3  ;;  %vm566_vm0 = vcmask 261120   ;;  %vm944_vm3 = vcmask 781312  }
  0x16   : > { %v8450_v3 = vld [vmem:[%s11063_s1] sm:$0xff]  ;;  %615 = vmatpush.bf16.msra.mxu0 %v8453_v0  ;;  %733 = vmatpush.bf16.msra.mxu1 %v8451_v1  ;;  %v8483_v4 = vld [vmem:[%s11064_s2 + $0x88] sm:$0xff]  ;;  %s8766_s17 = smul.u32 108, %s11108_s25  ;;  %vm442_vm1 = vsmask.f32 7424  ;;  %v8481_v27 = vld [vmem:[%s11064_s2 + $0x78] sm:$0xff] }
  0x17   : > { %v8482_v14 = vld [vmem:[%s11064_s2 + $0x80] sm:$0xff]  ;;  %v8480_v46 = vld [vmem:[%s11064_s2 + $0x70] sm:$0xff]  ;;  %v8471_v53 = vld [vmem:[%s11064_s2 + $0x28] sm:$0xff]  ;;  %vm1244_vm6 = vcmask 785408   ;;  %s11092_s25 = smov 32   ;;  %s6574_s27 = sshll.u32 %s10092_s28, 4  ;;  %s6575_s27 = int_to_ptr.vmem [resolvable:$true] %s6574_s27 }
  0x18   : > { %s9005_s23 = scalar_lea.vmem %s11087_s0, %s8766_s17  ;;  %1431 = vmatpush.bf16.msra.mxu3 %v8471_v53  ;;  %v8470_v55 = vld [vmem:[%s11064_s2 + $0x20] sm:$0xff]  ;;  %v8469_v58 = vld [vmem:[%s11064_s2 + $0x18] sm:$0xff]  ;;  %v8468_v61 = vld [vmem:[%s11064_s2 + $0x10] sm:$0xff]  ;;  %s8751_s17 = sshll.u32 %s8959_s13, 3 }
  0x19   : > { %v8437_v5 = vld [vmem:[%s9005_s23] sm:$0xff]  ;;  %v8438_v6 = vld [vmem:[%s9005_s23 + $0x8] sm:$0xff]  ;;  %v8439_v15 = vld [vmem:[%s9005_s23 + $0x10] sm:$0xff] }
  0x1a   : > { %616 = vmatpush.bf16.msra.mxu0 %v8452_v2  ;;  %734 = vmatpush.bf16.msra.mxu1 %v8450_v3  ;;  %v444_v7 = vshrl.u32 %v8437_v5, 16  ;;  %v446_v8 = vshll.u32 %v8437_v5, 16  ;;  %v451_v9 = vshll.u32 %v8438_v6, 16  ;;  %v455_v16 = vshrl.u32 %v8438_v6, 16  ;;  %v8440_v21 = vld [vmem:[%s9005_s23 + $0x18] sm:$0xff]  ;;  %v8441_v28 = vld [vmem:[%s9005_s23 + $0x20] sm:$0xff] }
  0x1b   : > { %v459_v17 = vshll.u32 %v8439_v15, 16  ;;  %v463_v22 = vshrl.u32 %v8439_v15, 16  ;;  %v467_v23 = vshll.u32 %v8440_v21, 16  ;;  %v471_v29 = vshrl.u32 %v8440_v21, 16  ;;  %v8442_v34 = vld [vmem:[%s9005_s23 + $0x28] sm:$0xff]  ;;  %v8443_v40 = vld [vmem:[%s9005_s23 + $0x30] sm:$0xff] }
  0x1c   : > { %v448_v10 = vrot.slane %v446_v8, 1  ;;  %v453_v11 = vrot.slane %v451_v9, 1  ;;  %v475_v30 = vshll.u32 %v8441_v28, 16  ;;  %v479_v35 = vshrl.u32 %v8441_v28, 16  ;;  %v8444_v47 = vld [vmem:[%s9005_s23 + $0x38] sm:$0xff]  ;;  %v8445_v54 = vld [vmem:[%s9005_s23 + $0x40] sm:$0xff]  ;;  %1432 = vmatpush.bf16.msra.mxu3 %v8470_v55 }
  0x1d   : > { %6732 = vmatmul.msk.bf16.vlgmr.msra.gmra.mxu1 %vm566_vm0, %v8437_v5  ;;  %v461_v19 = vrot.slane %v459_v17, 1  ;;  %v469_v25 = vrot.slane %v467_v23, 1  ;;  %v483_v36 = vshll.u32 %v8442_v34, 16  ;;  %v487_v41 = vshrl.u32 %v8442_v34, 16  ;;  %v8467_v63 = vld [vmem:[%s11064_s2 + $0x8] sm:$0xff]  ;;  %v8466_v1 = vld [vmem:[%s11064_s2] sm:$0xff] }
  0x1e   : > { %1636 = vmatpush.bf16.msrb.mxu0 %v8483_v4  ;;  %v449_v12 = vor.u32 %v448_v10, %v444_v7  ;;  %v457_v18 = vor.u32 %v455_v16, %v453_v11  ;;  %v477_v32 = vrot.slane %v475_v30, 1  ;;  %v491_v42 = vshll.u32 %v8443_v40, 16  ;;  %v8446_v0 = vld [vmem:[%s9005_s23 + $0x48] sm:$0xff]  ;;  %v8477_v2 = vld [vmem:[%s11064_s2 + $0x58] sm:$0xff]  ;;  %v9078_v9 = vld [vmem:[%s11067_s5] ss:$0 sm:$0xff] }
  0x1f   : > { %v465_v24 = vor.u32 %v463_v22, %v461_v19  ;;  %v473_v31 = vor.u32 %v471_v29, %v469_v25  ;;  %v485_v38 = vrot.slane %v483_v36, 1  ;;  %v495_v48 = vshrl.u32 %v8443_v40, 16  ;;  %1289 = vmatpush.bf16.msra.mxu2 %v8477_v2  ;;  %v8475_v10 = vld [vmem:[%s11064_s2 + $0x48] sm:$0xff]  ;;  %v8474_v17 = vld [vmem:[%s11064_s2 + $0x40] sm:$0xff]  ;;  %v8472_v29 = vld [vmem:[%s11064_s2 + $0x30] sm:$0xff] }
  0x20   : > { %v454_v13 = vsel %vm442_vm1, %v449_v12, %v453_v11  ;;  %v462_v20 = vsel %vm442_vm1, %v457_v18, %v461_v19  ;;  %v481_v37 = vor.u32 %v479_v35, %v477_v32  ;;  %v493_v44 = vrot.slane %v491_v42, 1  ;;  %1433 = vmatpush.bf16.msra.mxu3 %v8469_v58  ;;  %v8447_v18 = vld [vmem:[%s9005_s23 + $0x50] sm:$0xff] }
  0x21   : > { %6710 = vmatmul.msk.bf16.vlgmr.msra.gmra.mxu0 %vm566_vm0, %v454_v13  ;;  %v470_v26 = vsel %vm442_vm1, %v465_v24, %v469_v25  ;;  %v478_v33 = vsel %vm442_vm1, %v473_v31, %v477_v32  ;;  %v489_v43 = vor.u32 %v487_v41, %v485_v38  ;;  %v499_v49 = vshll.u32 %v8444_v47, 16 }
  0x22   : > { %1637 = vmatpush.bf16.msrb.mxu0 %v8482_v14  ;;  %v486_v39 = vsel %vm442_vm1, %v481_v37, %v485_v38  ;;  %v497_v50 = vor.u32 %v495_v48, %v493_v44  ;;  %v503_v56 = vshrl.u32 %v8444_v47, 16  ;;  %v507_v57 = vshll.u32 %v8445_v54, 16 }
  0x23   : > { %v494_v45 = vsel %vm442_vm1, %v489_v43, %v493_v44  ;;  %v501_v51 = vrot.slane %v499_v49, 1  ;;  %v511_v3 = vshrl.u32 %v8445_v54, 16  ;;  %v515_v4 = vshll.u32 %v8446_v0, 16 }
  0x24   : > { %v509_v60 = vrot.slane %v507_v57, 1  ;;  %1434 = vmatpush.bf16.msra.mxu3 %v8468_v61  ;;  %v519_v24 = vshrl.u32 %v8446_v0, 16  ;;  %v523_v25 = vshll.u32 %v8447_v18, 16 }
  0x25   : > { %v502_v52 = vsel %vm442_vm1, %v497_v50, %v501_v51  ;;  %v505_v59 = vor.u32 %v503_v56, %v501_v51  ;;  %v517_v8 = vrot.slane %v515_v4, 1 }
  0x26   : > { %1638 = vmatpush.bf16.msrb.mxu0 %v8481_v27  ;;  %v513_v7 = vor.u32 %v511_v3, %v509_v60  ;;  %v525_v31 = vrot.slane %v523_v25, 1 }
  0x27   : > { %v510_v62 = vsel %vm442_vm1, %v505_v59, %v509_v60  ;;  %v521_v30 = vor.u32 %v519_v24, %v517_v8  ;;  %v8478_v60 = vld [vmem:[%s11064_s2 + $0x60] sm:$0xff] }
  0x28   : > { %1435 = vmatpush.bf16.msra.mxu3 %v8467_v63  ;;  %v518_v12 = vsel %vm442_vm1, %v513_v7, %v517_v8 }
  0x29   : > { %v526_v36 = vsel %vm442_vm1, %v521_v30, %v525_v31 }
  0x2a   : > { %1639 = vmatpush.bf16.msrb.mxu0 %v8480_v46 }
  0x2c   : > { %1436 = vmatpush.bf16.msra.mxu3 %v8466_v1 }
  0x2d   : > { %6733 = vmatmul.msk.bf16.gmra.mxu1 %vm566_vm0, %v8438_v6  ;;  %v8476_v6 = vld [vmem:[%s11064_s2 + $0x50] sm:$0xff] }
  0x2e   : > { %1290 = vmatpush.bf16.msra.mxu2 %v8476_v6 }
  0x31   : > { %6711 = vmatmul.msk.bf16.gmra.mxu0 %vm566_vm0, %v462_v20 }
  0x32   : > { %1291 = vmatpush.bf16.msra.mxu2 %v8475_v10 }
  0x36   : > { %1292 = vmatpush.bf16.msra.mxu2 %v8474_v17 }
  0x3d   : > { %6734 = vmatmul.msk.bf16.gmra.mxu1 %vm566_vm0, %v8439_v15  ;;  %v8479_v15 = vld [vmem:[%s11064_s2 + $0x68] sm:$0xff] }
  0x3e   : > { %1640 = vmatpush.bf16.msrb.mxu0 %v8479_v15 }
  0x41   : > { %6712 = vmatmul.msk.bf16.gmra.mxu0 %vm566_vm0, %v470_v26 }
  0x42   : > { %1641 = vmatpush.bf16.msrb.mxu0 %v8478_v60 }
  0x4d   : > { %6735 = vmatmul.msk.bf16.gmra.mxu1 %vm566_vm0, %v8440_v21  ;;  %v8473_v21 = vld [vmem:[%s11064_s2 + $0x38] sm:$0xff] }
  0x4e   : > { %1293 = vmatpush.bf16.msra.mxu2 %v8473_v21 }
  0x51   : > { %6713 = vmatmul.msk.bf16.gmra.mxu0 %vm566_vm0, %v478_v33 }
  0x52   : > { %1294 = vmatpush.bf16.msra.mxu2 %v8472_v29 }
  0x5d   : > { %6736 = vmatmul.msk.bf16.gmra.mxu1 %vm566_vm0, %v8441_v28 }
  0x61   : > { %6714 = vmatmul.msk.bf16.gmra.mxu0 %vm566_vm0, %v486_v39 }
  0x6d   : > { %6737 = vmatmul.msk.bf16.gmra.mxu1 %vm566_vm0, %v8442_v34 }
  0x71   : > { %6715 = vmatmul.msk.bf16.gmra.mxu0 %vm566_vm0, %v494_v45  ;;  %v527_v45 = vshrl.u32 %v8447_v18, 16 }
  0x73   : > { %v529_v51 = vor.u32 %v527_v45, %v525_v31 }
  0x7d   : > { %6738 = vmatmul.msk.bf16.gmra.mxu1 %vm566_vm0, %v8443_v40  ;;  %v8448_v40 = vld [vmem:[%s9005_s23 + $0x58] sm:$0xff] }
  0x7e   : > { %v531_v46 = vshll.u32 %v8448_v40, 16  ;;  %v535_v4 = vshrl.u32 %v8448_v40, 16 }
  0x81   : > { %6716 = vmatmul.msk.bf16.gmra.mxu0 %vm566_vm0, %v502_v52  ;;  %v533_v52 = vrot.slane %v531_v46, 1 }
  0x83   : > { %v534_v57 = vsel %vm442_vm1, %v529_v51, %v533_v52 }
  0x8d   : > { %6739 = vmatmul.msk.bf16.gmra.mxu1 %vm566_vm0, %v8444_v47 }
  0x91   : > { %6717 = vmatmul.msk.bf16.gmra.mxu0 %vm566_vm0, %v510_v62  ;;  %v8449_v62 = vld [vmem:[%s9005_s23 + $0x60] sm:$0xff] }
  0x9a   : > { %v736_v5 = vpop.f32.mrf.mxu1 }
  0x9d   : > { %6740 = vmatmul.msk.bf16.gmra.mxu1 %vm566_vm0, %v8445_v54 }
  0x9e   : > { %v618_v11 = vpop.f32.mrf.mxu0 }
  0x9f   : > { %v737_v13 = vadd.f32 %v736_v5, %v618_v11  ;;  %v539_v5 = vshll.u32 %v8449_v62, 16 }
  0xa1   : > { %v809_v16 = vadd.f32 %v9078_v9, %v737_v13  ;;  %6718 = vmatmul.msk.bf16.gmra.mxu0 %vm566_vm0, %v518_v12  ;;  %v541_v15 = vrot.slane %v539_v5, 1 }
  0xa2   : > { %v738_v14 = vpop.f32.mrf.mxu1 }
  0xa3   : > { %vm836_vm2 = vcmp.ge.f32.partialorder %v809_v16, 0.0  ;;  %v863_v19 = vmul.f32 0.3, %v809_v16 }
  0xa5   : > { %v890_v20 = vsel %vm836_vm2, %v809_v16, %v863_v19  ;;  %v364_v19 = vld [vmem:[%s9005_s23 + $0x68] sm:$0x7]  ;;  %vm1528_vm2 = vcmask 1046528  }
  0xa6   : > { %v917_v22 = vpack.c.bf16 %v890_v20, %v890_v20  ;;  %v620_v23 = vpop.f32.mrf.mxu0  ;;  %v427_v25 = vunpack.c.l.b16 %v364_v19 }
  0xa7   : > { %v739_v26 = vadd.f32 %v738_v14, %v620_v23  ;;  %v537_v14 = vor.u32 %v535_v4, %v533_v52 }
  0xa8   : > { %945 = vst.msk [vmem:[#allocation2] sm:$0xf] %vm944_vm3, %v917_v22  ;;  %v441_v29 = vpack.c.b16 %v427_v25, %v427_v25 }
  0xa9   : > { %v810_v28 = vadd.f32 %v9078_v9, %v739_v26  ;;  %v542_v24 = vsel %vm442_vm1, %v537_v14, %v541_v15 }
  0xaa   : > { %v741_v27 = vpop.f32.mrf.mxu1 }
  0xab   : > { %vm837_vm4 = vcmp.ge.f32.partialorder %v810_v28, 0.0  ;;  %v864_v32 = vmul.f32 0.3, %v810_v28 }
  0xad   : > { %6741 = vmatmul.msk.bf16.gmra.mxu1 %vm566_vm0, %v8446_v0  ;;  %v891_v33 = vsel %vm837_vm4, %v810_v28, %v864_v32 }
  0xae   : > { %v918_v34 = vpack.c.bf16 %v891_v33, %v891_v33  ;;  %v623_v35 = vpop.f32.mrf.mxu0 }
  0xaf   : > { %v742_v37 = vadd.f32 %v741_v27, %v623_v35  ;;  %v547_v35 = vshll.u32 %v441_v29, 16 }
  0xb0   : > { %946 = vst.msk [vmem:[#allocation2 + $0x4] sm:$0xf] %vm944_vm3, %v918_v34  ;;  %v543_v34 = vshrl.u32 %v8449_v62, 16 }
  0xb1   : > { %v811_v39 = vadd.f32 %v9078_v9, %v742_v37  ;;  %6719 = vmatmul.msk.bf16.gmra.mxu0 %vm566_vm0, %v526_v36 }
  0xb2   : > { %v743_v38 = vpop.f32.mrf.mxu1 }
  0xb3   : > { %vm838_vm5 = vcmp.ge.f32.partialorder %v811_v39, 0.0  ;;  %v865_v41 = vmul.f32 0.3, %v811_v39 }
  0xb5   : > { %v892_v42 = vsel %vm838_vm5, %v811_v39, %v865_v41 }
  0xb6   : > { %v919_v43 = vpack.c.bf16 %v892_v42, %v892_v42  ;;  %v625_v44 = vpop.f32.mrf.mxu0  ;;  %v545_v42 = vor.u32 %v543_v34, %v541_v15 }
  0xb7   : > { %v744_v47 = vadd.f32 %v743_v38, %v625_v44  ;;  %v8753_v48 = vld [vmem:[#allocation2] sm:$0xff]  }
  0xb8   : > { %947 = vst.msk [vmem:[#allocation2 + $0x8] sm:$0xf] %vm944_vm3, %v919_v43  ;;  %6868 = vmatmul.msk.bf16.vlgmr.msra.gmra.mxu3 %vm1244_vm6, %v8753_v48  ;;  %v1100_v0 = vshll.u32 %v8753_v48, 16  ;;  %v1098_v12 = vshrl.u32 %v8753_v48, 16  ;;  %v549_v43 = vrot.slane %v547_v35, 1 }
  0xb9   : > { %v812_v50 = vadd.f32 %v9078_v9, %v744_v47 }
  0xba   : > { %v746_v49 = vpop.f32.mrf.mxu1  ;;  %v1102_v10 = vrot.slane %v1100_v0, 1  ;;  %v550_v51 = vsel %vm442_vm1, %v545_v42, %v549_v43 }
  0xbb   : > { %vm839_vm7 = vcmp.ge.f32.partialorder %v812_v50, 0.0  ;;  %v866_v53 = vmul.f32 0.3, %v812_v50 }
  0xbc   : > { %v1103_v17 = vor.u32 %v1102_v10, %v1098_v12 }
  0xbd   : > { %6742 = vmatmul.msk.bf16.gmra.mxu1 %vm566_vm0, %v8447_v18  ;;  %v893_v54 = vsel %vm839_vm7, %v812_v50, %v866_v53 }
  0xbe   : > { %v920_v55 = vpack.c.bf16 %v893_v54, %v893_v54  ;;  %v628_v56 = vpop.f32.mrf.mxu0 }
  0xbf   : > { %v747_v58 = vadd.f32 %v746_v49, %v628_v56 }
  0xc0   : > { %948 = vst.msk [vmem:[#allocation2 + $0xc] sm:$0xf] %vm944_vm3, %v920_v55 }
  0xc1   : > { %v813_v61 = vadd.f32 %v9078_v9, %v747_v58  ;;  %6720 = vmatmul.msk.bf16.gmra.mxu0 %vm566_vm0, %v534_v57 }
  0xc2   : > { %v748_v59 = vpop.f32.mrf.mxu1 }
  0xc3   : > { %vm840_vm8 = vcmp.ge.f32.partialorder %v813_v61, 0.0  ;;  %v867_v63 = vmul.f32 0.3, %v813_v61 }
  0xc5   : > { %v894_v1 = vsel %vm840_vm8, %v813_v61, %v867_v63 }
  0xc6   : > { %v921_v2 = vpack.c.bf16 %v894_v1, %v894_v1  ;;  %v630_v3 = vpop.f32.mrf.mxu0  ;;  %v551_v1 = vshrl.u32 %v441_v29, 16 }
  0xc7   : > { %v749_v6 = vadd.f32 %v748_v59, %v630_v3  ;;  %v9119_v7 = vld [vmem:[#allocation2 + $0x8] sm:$0xff] }
  0xc8   : > { %949 = vst.msk [vmem:[#allocation2 + $0x10] sm:$0xf] %vm944_vm3, %v921_v2  ;;  %6869 = vmatmul.msk.bf16.gmra.mxu3 %vm1244_vm6, %v9119_v7  ;;  %v1105_v13 = vshll.u32 %v9119_v7, 16 }
  0xc9   : > { %v814_v11 = vadd.f32 %v9078_v9, %v749_v6 }
  0xca   : > { %v751_v8 = vpop.f32.mrf.mxu1  ;;  %v1107_v18 = vrot.slane %v1105_v13, 1 }
  0xcb   : > { %vm841_vm9 = vcmp.ge.f32.partialorder %v814_v11, 0.0  ;;  %v868_v16 = vmul.f32 0.3, %v814_v11 }
  0xcc   : > { %v1108_v21 = vsel %vm442_vm1, %v1103_v17, %v1107_v18 }
  0xcd   : > { %6743 = vmatmul.msk.bf16.gmra.mxu1 %vm566_vm0, %v8448_v40  ;;  %v895_v20 = vsel %vm841_vm9, %v814_v11, %v868_v16  ;;  %6830 = vmatmul.msk.bf16.vlgmr.msra.gmra.mxu2 %vm1244_vm6, %v1108_v21  ;;  %v1109_v40 = vshrl.u32 %v9119_v7, 16 }
  0xce   : > { %v922_v22 = vpack.c.bf16 %v895_v20, %v895_v20  ;;  %v633_v23 = vpop.f32.mrf.mxu0 }
  0xcf   : > { %v752_v26 = vadd.f32 %v751_v8, %v633_v23  ;;  %v1111_v45 = vor.u32 %v1109_v40, %v1107_v18  ;;  %v553_v8 = vor.u32 %v551_v1, %v549_v43 }
  0xd0   : > { %950 = vst.msk [vmem:[#allocation2 + $0x14] sm:$0xf] %vm944_vm3, %v922_v22  ;;  %v8760_v22 = vld [vmem:[#allocation2] sm:$0xf0] }
  0xd1   : > { %v815_v28 = vadd.f32 %v9078_v9, %v752_v26  ;;  %6721 = vmatmul.msk.bf16.gmra.mxu0 %vm566_vm0, %v542_v24  ;;  %v8761_v26 = vld [vmem:[#allocation2] sm:$0xe] }
  0xd2   : > { %v753_v27 = vpop.f32.mrf.mxu1 }
  0xd3   : > { %vm842_vm10 = vcmp.ge.f32.partialorder %v815_v28, 0.0  ;;  %v869_v30 = vmul.f32 0.3, %v815_v28 }
  0xd5   : > { %v896_v31 = vsel %vm842_vm10, %v815_v28, %v869_v30 }
  0xd6   : > { %v923_v32 = vpack.c.bf16 %v896_v31, %v896_v31  ;;  %v635_v33 = vpop.f32.mrf.mxu0  ;;  %v1530_v31 = vrot.slane %v9119_v7, 1 }
  0xd7   : > { %v754_v36 = vadd.f32 %v753_v27, %v635_v33  ;;  %v9134_v37 = vld [vmem:[#allocation2 + $0x10] sm:$0xff]  ;;  %v8762_v27 = vor.u32 %v8761_v26, %v8760_v22 }
  0xd8   : > { %951 = vst.msk [vmem:[#allocation2 + $0x18] sm:$0xf] %vm944_vm3, %v923_v32  ;;  %6870 = vmatmul.msk.bf16.gmra.mxu3 %vm1244_vm6, %v9134_v37  ;;  %v1113_v41 = vshll.u32 %v9134_v37, 16  ;;  %v1117_v63 = vshrl.u32 %v9134_v37, 16 }
  0xd9   : > { %v816_v39 = vadd.f32 %v9078_v9, %v754_v36  ;;  %v1529_v36 = vrot.slane %v8762_v27, 1 }
  0xda   : > { %v756_v38 = vpop.f32.mrf.mxu1  ;;  %v1115_v46 = vrot.slane %v1113_v41, 1 }
  0xdb   : > { %vm843_vm11 = vcmp.ge.f32.partialorder %v816_v39, 0.0  ;;  %v870_v44 = vmul.f32 0.3, %v816_v39  ;;  %v1531_v40 = vsel %vm1528_vm2, %v1529_v36, %v1530_v31 }
  0xdc   : > { %v1116_v48 = vsel %vm442_vm1, %v1111_v45, %v1115_v46  ;;  %v1119_v3 = vor.u32 %v1117_v63, %v1115_v46 }
  0xdd   : > { %6744 = vmatmul.msk.bf16.gmra.mxu1 %vm566_vm0, %v8449_v62  ;;  %v897_v47 = vsel %vm843_vm11, %v816_v39, %v870_v44  ;;  %6831 = vmatmul.msk.bf16.gmra.mxu2 %vm1244_vm6, %v1116_v48 }
  0xde   : > { %v924_v49 = vpack.c.bf16 %v897_v47, %v897_v47  ;;  %v638_v50 = vpop.f32.mrf.mxu0 }
  0xdf   : > { %v757_v52 = vadd.f32 %v756_v38, %v638_v50 }
  0xe0   : > { %952 = vst.msk [vmem:[#allocation2 + $0x1c] sm:$0xf] %vm944_vm3, %v924_v49 }
  0xe1   : > { %v817_v54 = vadd.f32 %v9078_v9, %v757_v52  ;;  %6722 = vmatmul.msk.bf16.gmra.mxu0 %vm566_vm0, %v550_v51 }
  0xe2   : > { %v758_v53 = vpop.f32.mrf.mxu1 }
  0xe3   : > { %vm844_vm12 = vcmp.ge.f32.partialorder %v817_v54, 0.0  ;;  %v871_v55 = vmul.f32 0.3, %v817_v54 }
  0xe5   : > { %v898_v56 = vsel %vm844_vm12, %v817_v54, %v871_v55  ;;  %v1532_v54 = vrot.slane %v9134_v37, 1 }
  0xe6   : > { %v925_v57 = vpack.c.bf16 %v898_v56, %v898_v56  ;;  %v640_v58 = vpop.f32.mrf.mxu0 }
  0xe7   : > { %v759_v59 = vadd.f32 %v758_v53, %v640_v58  ;;  %v9149_v60 = vld [vmem:[#allocation2 + $0x18] sm:$0xff] }
  0xe8   : > { %953 = vst.msk [vmem:[#allocation2 + $0x20] sm:$0xf] %vm944_vm3, %v925_v57  ;;  %6871 = vmatmul.msk.bf16.gmra.mxu3 %vm1244_vm6, %v9149_v60  ;;  %v1121_v0 = vshll.u32 %v9149_v60, 16  ;;  %v1125_v24 = vshrl.u32 %v9149_v60, 16 }
  0xe9   : > { %v818_v62 = vadd.f32 %v9078_v9, %v759_v59 }
  0xea   : > { %v761_v61 = vpop.f32.mrf.mxu1  ;;  %v1123_v4 = vrot.slane %v1121_v0, 1 }
  0xeb   : > { %vm845_vm13 = vcmp.ge.f32.partialorder %v818_v62, 0.0  ;;  %v872_v2 = vmul.f32 0.3, %v818_v62 }
  0xec   : > { %v1124_v6 = vsel %vm442_vm1, %v1119_v3, %v1123_v4 }
  0xed   : > { %6745 = vmatmul.msk.bf16.gmra.mxu1 %vm566_vm0, %v441_v29  ;;  %v899_v5 = vsel %vm845_vm13, %v818_v62, %v872_v2  ;;  %6832 = vmatmul.msk.bf16.gmra.mxu2 %vm1244_vm6, %v1124_v6  ;;  %v1127_v29 = vor.u32 %v1125_v24, %v1123_v4  ;;  %v1533_v62 = vsel %vm1528_vm2, %v1530_v31, %v1532_v54 }
  0xee   : > { %v926_v10 = vpack.c.bf16 %v899_v5, %v899_v5  ;;  %v643_v11 = vpop.f32.mrf.mxu0 }
  0xef   : > { %v762_v12 = vadd.f32 %v761_v61, %v643_v11 }
  0xf0   : > { %954 = vst.msk [vmem:[#allocation2 + $0x24] sm:$0xf] %vm944_vm3, %v926_v10 }
  0xf1   : > { %v819_v14 = vadd.f32 %v9078_v9, %v762_v12  ;;  %6723 = vmatmul.msk.bf16.gmra.mxu0 %vm566_vm0, %v553_v8 }
  0xf2   : > { %v763_v13 = vpop.f32.mrf.mxu1 }
  0xf3   : > { %vm846_vm14 = vcmp.ge.f32.partialorder %v819_v14, 0.0  ;;  %v873_v15 = vmul.f32 0.3, %v819_v14 }
  0xf5   : > { %v900_v16 = vsel %vm846_vm14, %v819_v14, %v873_v15  ;;  %v1534_v14 = vrot.slane %v9149_v60, 1 }
  0xf6   : > { %v927_v17 = vpack.c.bf16 %v900_v16, %v900_v16  ;;  %v645_v18 = vpop.f32.mrf.mxu0 }
  0xf7   : > { %v764_v19 = vadd.f32 %v763_v13, %v645_v18  ;;  %v9163_v20 = vld [vmem:[#allocation2 + $0x20] sm:$0xff]  ;;  %v1535_v22 = vsel %vm1528_vm2, %v1532_v54, %v1534_v14 }
  0xf8   : > { %955 = vst.msk [vmem:[#allocation2 + $0x28] sm:$0xf] %vm944_vm3, %v927_v17  ;;  %6872 = vmatmul.msk.bf16.gmra.mxu3 %vm1244_vm6, %v9163_v20  ;;  %v1129_v25 = vshll.u32 %v9163_v20, 16  ;;  %v1133_v49 = vshrl.u32 %v9163_v20, 16  ;;  %v1536_v36 = vrot.slane %v9163_v20, 1 }
  0xf9   : > { %v820_v23 = vadd.f32 %v9078_v9, %v764_v19 }
  0xfa   : > { %v766_v21 = vpop.f32.mrf.mxu1  ;;  %v1131_v30 = vrot.slane %v1129_v25, 1 }
  0xfb   : > { %vm847_vm15 = vcmp.ge.f32.partialorder %v820_v23, 0.0  ;;  %v874_v28 = vmul.f32 0.3, %v820_v23 }
  0xfc   : > { %v1132_v33 = vsel %vm442_vm1, %v1127_v29, %v1131_v30  ;;  %v1135_v52 = vor.u32 %v1133_v49, %v1131_v30 }
  0xfd   : > { %v901_v32 = vsel %vm847_vm15, %v820_v23, %v874_v28  ;;  %6833 = vmatmul.msk.bf16.gmra.mxu2 %vm1244_vm6, %v1132_v33 }
  0xfe   : > { %v928_v34 = vpack.c.bf16 %v901_v32, %v901_v32  ;;  %v648_v35 = vpop.f32.mrf.mxu0 }
  0xff   : > { %v767_v38 = vadd.f32 %v766_v21, %v648_v35 }
 0x100   : > { %956 = vst.msk [vmem:[#allocation2 + $0x2c] sm:$0xf] %vm944_vm3, %v928_v34 }
 0x101   : > { %v821_v41 = vadd.f32 %v9078_v9, %v767_v38  ;;  %6918 = vmatmul.msk.bf16.vlgmr.msrb.gmra.mxu0 %vm1244_vm6, %v1531_v40 }
 0x102   : > { %v768_v39 = vpop.f32.mrf.mxu1 }
 0x103   : > { %vm848_vm4 = vcmp.ge.f32.partialorder %v821_v41, 0.0  ;;  %v875_v7 = vmul.f32 0.3, %v821_v41 }
 0x105   : > { %v902_v42 = vsel %vm848_vm4, %v821_v41, %v875_v7 }
 0x106   : > { %v929_v43 = vpack.c.bf16 %v902_v42, %v902_v42  ;;  %v650_v44 = vpop.f32.mrf.mxu0 }
 0x107   : > { %v769_v45 = vadd.f32 %v768_v39, %v650_v44  ;;  %v9178_v46 = vld [vmem:[#allocation2 + $0x28] sm:$0xff] }
 0x108   : > { %957 = vst.msk [vmem:[#allocation2 + $0x30] sm:$0xf] %vm944_vm3, %v929_v43  ;;  %6873 = vmatmul.msk.bf16.gmra.mxu3 %vm1244_vm6, %v9178_v46  ;;  %v1137_v50 = vshll.u32 %v9178_v46, 16  ;;  %v1141_v8 = vshrl.u32 %v9178_v46, 16  ;;  %v1537_v43 = vsel %vm1528_vm2, %v1534_v14, %v1536_v36 }
 0x109   : > { %v822_v48 = vadd.f32 %v9078_v9, %v769_v45 }
 0x10a   : > { %v771_v47 = vpop.f32.mrf.mxu1  ;;  %v1139_v53 = vrot.slane %v1137_v50, 1 }
 0x10b   : > { %vm849_vm5 = vcmp.ge.f32.partialorder %v822_v48, 0.0  ;;  %v876_v51 = vmul.f32 0.3, %v822_v48 }
 0x10c   : > { %v1140_v56 = vsel %vm442_vm1, %v1135_v52, %v1139_v53  ;;  %v1143_v12 = vor.u32 %v1141_v8, %v1139_v53 }
 0x10d   : > { %v903_v55 = vsel %vm849_vm5, %v822_v48, %v876_v51  ;;  %6834 = vmatmul.msk.bf16.gmra.mxu2 %vm1244_vm6, %v1140_v56 }
 0x10e   : > { %v930_v57 = vpack.c.bf16 %v903_v55, %v903_v55  ;;  %v653_v58 = vpop.f32.mrf.mxu0 }
 0x10f   : > { %v772_v59 = vadd.f32 %v771_v47, %v653_v58 }
 0x110   : > { %958 = vst.msk [vmem:[#allocation2 + $0x34] sm:$0xf] %vm944_vm3, %v930_v57 }
 0x111   : > { %v823_v63 = vadd.f32 %v9078_v9, %v772_v59  ;;  %6919 = vmatmul.msk.bf16.gmra.mxu0 %vm1244_vm6, %v1533_v62  ;;  %v1538_v59 = vrot.slane %v9178_v46, 1 }
 0x112   : > { %v773_v61 = vpop.f32.mrf.mxu1 }
 0x113   : > { %vm850_vm7 = vcmp.ge.f32.partialorder %v823_v63, 0.0  ;;  %v877_v0 = vmul.f32 0.3, %v823_v63 }
 0x115   : > { %v904_v37 = vsel %vm850_vm7, %v823_v63, %v877_v0 }
 0x116   : > { %v931_v1 = vpack.c.bf16 %v904_v37, %v904_v37  ;;  %v655_v2 = vpop.f32.mrf.mxu0 }
 0x117   : > { %v774_v3 = vadd.f32 %v773_v61, %v655_v2  ;;  %v9193_v4 = vld [vmem:[#allocation2 + $0x30] sm:$0xff]  ;;  %v1539_v2 = vsel %vm1528_vm2, %v1536_v36, %v1538_v59 }
 0x118   : > { %959 = vst.msk [vmem:[#allocation2 + $0x38] sm:$0xf] %vm944_vm3, %v931_v1  ;;  %6874 = vmatmul.msk.bf16.gmra.mxu3 %vm1244_vm6, %v9193_v4  ;;  %v1145_v10 = vshll.u32 %v9193_v4, 16  ;;  %v1149_v31 = vshrl.u32 %v9193_v4, 16 }
 0x119   : > { %v824_v6 = vadd.f32 %v9078_v9, %v774_v3 }
 0x11a   : > { %v776_v5 = vpop.f32.mrf.mxu1  ;;  %v1147_v13 = vrot.slane %v1145_v10, 1 }
 0x11b   : > { %vm851_vm8 = vcmp.ge.f32.partialorder %v824_v6, 0.0  ;;  %v878_v11 = vmul.f32 0.3, %v824_v6 }
 0x11c   : > { %v1148_v16 = vsel %vm442_vm1, %v1143_v12, %v1147_v13  ;;  %v1151_v34 = vor.u32 %v1149_v31, %v1147_v13 }
 0x11d   : > { %v905_v15 = vsel %vm851_vm8, %v824_v6, %v878_v11  ;;  %6835 = vmatmul.msk.bf16.gmra.mxu2 %vm1244_vm6, %v1148_v16  ;;  %vm971_vm8 = vcmask 780288  }
 0x11e   : > { %v932_v17 = vpack.c.bf16 %v905_v15, %v905_v15  ;;  %v658_v18 = vpop.f32.mrf.mxu0 }
 0x11f   : > { %v777_v19 = vadd.f32 %v776_v5, %v658_v18 }
 0x120   : > { %960 = vst.msk [vmem:[#allocation2 + $0x3c] sm:$0xf] %vm944_vm3, %v932_v17 }
 0x121   : > { %v825_v23 = vadd.f32 %v9078_v9, %v777_v19  ;;  %6920 = vmatmul.msk.bf16.gmra.mxu0 %vm1244_vm6, %v1535_v22  ;;  %v1540_v22 = vrot.slane %v9193_v4, 1 }
 0x122   : > { %v778_v21 = vpop.f32.mrf.mxu1 }
 0x123   : > { %vm852_vm9 = vcmp.ge.f32.partialorder %v825_v23, 0.0  ;;  %v879_v24 = vmul.f32 0.3, %v825_v23 }
 0x125   : > { %v906_v60 = vsel %vm852_vm9, %v825_v23, %v879_v24  ;;  %vm972_vm9 = vsmask.f32 2304 }
 0x126   : > { %v933_v25 = vpack.c.bf16 %v906_v60, %v906_v60  ;;  %v660_v26 = vpop.f32.mrf.mxu0 }
 0x127   : > { %v779_v27 = vadd.f32 %v778_v21, %v660_v26  ;;  %v9208_v28 = vld [vmem:[#allocation2 + $0x38] sm:$0xff] }
 0x128   : > { %961 = vst.msk [vmem:[#allocation2 + $0x40] sm:$0xf] %vm944_vm3, %v933_v25  ;;  %6875 = vmatmul.msk.bf16.gmra.mxu3 %vm1244_vm6, %v9208_v28  ;;  %v1153_v32 = vshll.u32 %v9208_v28, 16  ;;  %v1157_v53 = vshrl.u32 %v9208_v28, 16 }
 0x129   : > { %v826_v30 = vadd.f32 %v9078_v9, %v779_v27 }
 0x12a   : > { %v781_v29 = vpop.f32.mrf.mxu1  ;;  %v1155_v35 = vrot.slane %v1153_v32, 1 }
 0x12b   : > { %vm853_vm10 = vcmp.ge.f32.partialorder %v826_v30, 0.0  ;;  %v880_v33 = vmul.f32 0.3, %v826_v30 }
 0x12c   : > { %v1156_v39 = vsel %vm442_vm1, %v1151_v34, %v1155_v35  ;;  %v1159_v57 = vor.u32 %v1157_v53, %v1155_v35 }
 0x12d   : > { %v907_v38 = vsel %vm853_vm10, %v826_v30, %v880_v33  ;;  %6836 = vmatmul.msk.bf16.gmra.mxu2 %vm1244_vm6, %v1156_v39 }
 0x12e   : > { %v934_v40 = vpack.c.bf16 %v907_v38, %v907_v38  ;;  %v663_v41 = vpop.f32.mrf.mxu0 }
 0x12f   : > { %v782_v7 = vadd.f32 %v781_v29, %v663_v41  ;;  %v1541_v29 = vsel %vm1528_vm2, %v1538_v59, %v1540_v22 }
 0x130   : > { %962 = vst.msk [vmem:[#allocation2 + $0x44] sm:$0xf] %vm944_vm3, %v934_v40 }
 0x131   : > { %v827_v44 = vadd.f32 %v9078_v9, %v782_v7  ;;  %6921 = vmatmul.msk.bf16.gmra.mxu0 %vm1244_vm6, %v1537_v43 }
 0x132   : > { %v783_v42 = vpop.f32.mrf.mxu1 }
 0x133   : > { %vm854_vm11 = vcmp.ge.f32.partialorder %v827_v44, 0.0  ;;  %v881_v45 = vmul.f32 0.3, %v827_v44 }
 0x135   : > { %v908_v20 = vsel %vm854_vm11, %v827_v44, %v881_v45  ;;  %vm9309_vm11 = vmand %vm971_vm8, %vm972_vm9  ;;  %vm1895_vm8 = vcmask 257024  }
 0x136   : > { %v935_v47 = vpack.c.bf16 %v908_v20, %v908_v20  ;;  %v665_v48 = vpop.f32.mrf.mxu0 }
 0x137   : > { %v784_v49 = vadd.f32 %v783_v42, %v665_v48  ;;  %v9223_v50 = vld [vmem:[#allocation2 + $0x40] sm:$0xff] }
 0x138   : > { %963 = vst.msk [vmem:[#allocation2 + $0x48] sm:$0xf] %vm944_vm3, %v935_v47  ;;  %6876 = vmatmul.msk.bf16.gmra.mxu3 %vm1244_vm6, %v9223_v50  ;;  %v1161_v54 = vshll.u32 %v9223_v50, 16  ;;  %v1165_v15 = vshrl.u32 %v9223_v50, 16  ;;  %v1542_v47 = vrot.slane %v9208_v28, 1 }
 0x139   : > { %v828_v52 = vadd.f32 %v9078_v9, %v784_v49 }
 0x13a   : > { %v786_v51 = vpop.f32.mrf.mxu1  ;;  %v1163_v58 = vrot.slane %v1161_v54, 1 }
 0x13b   : > { %vm855_vm12 = vcmp.ge.f32.partialorder %v828_v52, 0.0  ;;  %v882_v55 = vmul.f32 0.3, %v828_v52  ;;  %v9231_v56 = vpop.f32.mrf.mxu3 }
 0x13c   : > { %v1164_v62 = vsel %vm442_vm1, %v1159_v57, %v1163_v58  ;;  %v1167_v18 = vor.u32 %v1165_v15, %v1163_v58 }
 0x13d   : > { %v909_v61 = vsel %vm855_vm12, %v828_v52, %v882_v55  ;;  %6837 = vmatmul.msk.bf16.gmra.mxu2 %vm1244_vm6, %v1164_v62  ;;  %v1543_v55 = vsel %vm1528_vm2, %v1540_v22, %v1542_v47 }
 0x13e   : > { %v936_v63 = vpack.c.bf16 %v909_v61, %v909_v61  ;;  %v668_v0 = vpop.f32.mrf.mxu0 }
 0x13f   : > { %v787_v37 = vadd.f32 %v786_v51, %v668_v0 }
 0x140   : > { %964 = vst.msk [vmem:[#allocation2 + $0x4c] sm:$0xf] %vm944_vm3, %v936_v63 }
 0x141   : > { %v829_v3 = vadd.f32 %v9078_v9, %v787_v37  ;;  %6922 = vmatmul.msk.bf16.gmra.mxu0 %vm1244_vm6, %v1539_v2 }
 0x142   : > { %v788_v1 = vpop.f32.mrf.mxu1 }
 0x143   : > { %vm856_vm13 = vcmp.ge.f32.partialorder %v829_v3, 0.0  ;;  %v883_v5 = vmul.f32 0.3, %v829_v3  ;;  %v9240_v46 = vpop.f32.mrf.mxu3 }
 0x145   : > { %v910_v6 = vsel %vm856_vm13, %v829_v3, %v883_v5 }
 0x146   : > { %v937_v8 = vpack.c.bf16 %v910_v6, %v910_v6  ;;  %v670_v10 = vpop.f32.mrf.mxu0 }
 0x147   : > { %v789_v11 = vadd.f32 %v788_v1, %v670_v10  ;;  %v9242_v12 = vld [vmem:[#allocation2 + $0x48] sm:$0xff] }
 0x148   : > { %965 = vst.msk [vmem:[#allocation2 + $0x50] sm:$0xf] %vm944_vm3, %v937_v8  ;;  %6877 = vmatmul.msk.bf16.gmra.mxu3 %vm1244_vm6, %v9242_v12  ;;  %v1169_v16 = vshll.u32 %v9242_v12, 16  ;;  %v1173_v7 = vshrl.u32 %v9242_v12, 16 }
 0x149   : > { %v830_v14 = vadd.f32 %v9078_v9, %v789_v11 }
 0x14a   : > { %v791_v13 = vpop.f32.mrf.mxu1  ;;  %v1171_v19 = vrot.slane %v1169_v16, 1 }
 0x14b   : > { %vm857_vm14 = vcmp.ge.f32.partialorder %v830_v14, 0.0  ;;  %v884_v17 = vmul.f32 0.3, %v830_v14  ;;  %v9250_v21 = vpop.f32.mrf.mxu3 }
 0x14c   : > { %v1172_v24 = vsel %vm442_vm1, %v1167_v18, %v1171_v19  ;;  %v1175_v44 = vor.u32 %v1173_v7, %v1171_v19 }
 0x14d   : > { %v911_v23 = vsel %vm857_vm14, %v830_v14, %v884_v17  ;;  %6838 = vmatmul.msk.bf16.gmra.mxu2 %vm1244_vm6, %v1172_v24  ;;  %v1544_v14 = vrot.slane %v9223_v50, 1 }
 0x14e   : > { %v938_v60 = vpack.c.bf16 %v911_v23, %v911_v23  ;;  %v673_v25 = vpop.f32.mrf.mxu0 }
 0x14f   : > { %v792_v26 = vadd.f32 %v791_v13, %v673_v25  ;;  %v1545_v23 = vsel %vm1528_vm2, %v1542_v47, %v1544_v14 }
 0x150   : > { %966 = vst.msk [vmem:[#allocation2 + $0x54] sm:$0xf] %vm944_vm3, %v938_v60  ;;  %v9259_v31 = vpop.f32.mrf.mxu2 }
 0x151   : > { %v831_v30 = vadd.f32 %v9078_v9, %v792_v26  ;;  %6923 = vmatmul.msk.bf16.gmra.mxu0 %vm1244_vm6, %v1541_v29  ;;  %v974_v29 = vld [vmem:[#allocation2 + $0x68] sm:$0x7] }
 0x152   : > { %v793_v27 = vpop.f32.mrf.mxu1 }
 0x153   : > { %vm858_vm15 = vcmp.ge.f32.partialorder %v831_v30, 0.0  ;;  %v885_v4 = vmul.f32 0.3, %v831_v30  ;;  %v9261_v32 = vpop.f32.mrf.mxu3 }
 0x155   : > { %v912_v33 = vsel %vm858_vm15, %v831_v30, %v885_v4 }
 0x156   : > { %v939_v34 = vpack.c.bf16 %v912_v33, %v912_v33  ;;  %v675_v35 = vpop.f32.mrf.mxu0 }
 0x157   : > { %v794_v36 = vadd.f32 %v793_v27, %v675_v35  ;;  %v9263_v38 = vld [vmem:[#allocation2 + $0x50] sm:$0xff] }
 0x158   : > { %967 = vst.msk [vmem:[#allocation2 + $0x58] sm:$0xf] %vm944_vm3, %v939_v34  ;;  %v9267_v41 = vpop.f32.mrf.mxu2  ;;  %6878 = vmatmul.msk.bf16.gmra.mxu3 %vm1244_vm6, %v9263_v38  ;;  %v1177_v42 = vshll.u32 %v9263_v38, 16  ;;  %v1181_v5 = vshrl.u32 %v9263_v38, 16 }
 0x159   : > { %v832_v40 = vadd.f32 %v9078_v9, %v794_v36 }
 0x15a   : > { %v796_v39 = vpop.f32.mrf.mxu1  ;;  %v1179_v45 = vrot.slane %v1177_v42, 1  ;;  %v1546_v42 = vrot.slane %v9242_v12, 1 }
 0x15b   : > { %vm859_vm4 = vcmp.ge.f32.partialorder %v832_v40, 0.0  ;;  %v886_v43 = vmul.f32 0.3, %v832_v40  ;;  %v9273_v20 = vpop.f32.mrf.mxu3 }
 0x15c   : > { %v1180_v49 = vsel %vm442_vm1, %v1175_v44, %v1179_v45  ;;  %v1183_v10 = vor.u32 %v1181_v5, %v1179_v45  ;;  %v9331_v44 = vld [vmem:[%s11068_s6] ss:$0 sm:$0xff] }
 0x15d   : > { %v913_v48 = vsel %vm859_vm4, %v832_v40, %v886_v43  ;;  %6839 = vmatmul.msk.bf16.gmra.mxu2 %vm1244_vm6, %v1180_v49  ;;  %v1439_v43 = vadd.f32 %v9231_v56, %v9259_v31  ;;  %v1547_v49 = vsel %vm1528_vm2, %v1544_v14, %v1546_v42 }
 0x15e   : > { %v940_v51 = vpack.c.bf16 %v913_v48, %v913_v48  ;;  %v678_v52 = vpop.f32.mrf.mxu0 }
 0x15f   : > { %v797_v53 = vadd.f32 %v796_v39, %v678_v52 }
 0x160   : > { %968 = vst.msk [vmem:[#allocation2 + $0x5c] sm:$0xf] %vm944_vm3, %v940_v51  ;;  %v9282_v58 = vpop.f32.mrf.mxu2 }
 0x161   : > { %v833_v57 = vadd.f32 %v9078_v9, %v797_v53  ;;  %6924 = vmatmul.msk.bf16.gmra.mxu0 %vm1244_vm6, %v1543_v55  ;;  %v1441_v55 = vadd.f32 %v9240_v46, %v9267_v41  ;;  %v1548_v46 = vrot.slane %v9263_v38, 1  ;;  %v1444_v41 = vadd.f32 %v9250_v21, %v9282_v58 }
 0x162   : > { %v798_v54 = vpop.f32.mrf.mxu1 }
 0x163   : > { %vm860_vm5 = vcmp.ge.f32.partialorder %v833_v57, 0.0  ;;  %v887_v28 = vmul.f32 0.3, %v833_v57  ;;  %v9284_v59 = vpop.f32.mrf.mxu3 }
 0x165   : > { %v914_v61 = vsel %vm860_vm5, %v833_v57, %v887_v28 }
 0x166   : > { %v941_v62 = vpack.c.bf16 %v914_v61, %v914_v61  ;;  %v680_v63 = vpop.f32.mrf.mxu0 }
 0x167   : > { %v799_v0 = vadd.f32 %v798_v54, %v680_v63  ;;  %v9286_v37 = vld [vmem:[#allocation2 + $0x58] sm:$0xff] }
 0x168   : > { %969 = vst.msk [vmem:[#allocation2 + $0x60] sm:$0xf] %vm944_vm3, %v941_v62  ;;  %v9290_v3 = vpop.f32.mrf.mxu2  ;;  %6879 = vmatmul.msk.bf16.gmra.mxu3 %vm1244_vm6, %v9286_v37  ;;  %v1185_v6 = vshll.u32 %v9286_v37, 16  ;;  %v1189_v35 = vshrl.u32 %v9286_v37, 16 }
 0x169   : > { %v834_v2 = vadd.f32 %v9078_v9, %v799_v0  ;;  %v1446_v58 = vadd.f32 %v9261_v32, %v9290_v3 }
 0x16a   : > { %v801_v1 = vpop.f32.mrf.mxu1  ;;  %v1187_v11 = vrot.slane %v1185_v6, 1 }
 0x16b   : > { %vm861_vm7 = vcmp.ge.f32.partialorder %v834_v2, 0.0  ;;  %v888_v8 = vmul.f32 0.3, %v834_v2  ;;  %v9296_v13 = vpop.f32.mrf.mxu3 }
 0x16c   : > { %v1188_v16 = vsel %vm442_vm1, %v1183_v10, %v1187_v11  ;;  %v1191_v39 = vor.u32 %v1189_v35, %v1187_v11 }
 0x16d   : > { %v915_v15 = vsel %vm861_vm7, %v834_v2, %v888_v8  ;;  %6840 = vmatmul.msk.bf16.gmra.mxu2 %vm1244_vm6, %v1188_v16  ;;  %v1549_v16 = vsel %vm1528_vm2, %v1546_v42, %v1548_v46 }
 0x16e   : > { %v942_v17 = vpack.c.bf16 %v915_v15, %v915_v15  ;;  %v683_v18 = vpop.f32.mrf.mxu0 }
 0x16f   : > { %v802_v19 = vadd.f32 %v801_v1, %v683_v18 }
 0x170   : > { %970 = vst.msk [vmem:[#allocation2 + $0x64] sm:$0xf] %vm944_vm3, %v942_v17  ;;  %v9305_v60 = vpop.f32.mrf.mxu2 }
 0x171   : > { %v835_v24 = vadd.f32 %v9078_v9, %v802_v19  ;;  %6925 = vmatmul.msk.bf16.gmra.mxu0 %vm1244_vm6, %v1545_v23  ;;  %v1449_v32 = vadd.f32 %v9273_v20, %v9305_v60 }
 0x172   : > { %v803_v22 = vpop.f32.mrf.mxu1 }
 0x173   : > { %vm862_vm10 = vcmp.ge.f32.partialorder %v835_v24, 0.0  ;;  %v889_v50 = vmul.f32 0.3, %v835_v24  ;;  %v9307_v25 = vpop.f32.mrf.mxu3 }
 0x175   : > { %v916_v26 = vsel %vm862_vm10, %v835_v24, %v889_v50 }
 0x176   : > { %v943_v30 = vpack.c.bf16 %v916_v26, %v916_v26  ;;  %v685_v4 = vpop.f32.mrf.mxu0 }
 0x177   : > { %v9313_v33 = vld [vmem:[#allocation2 + $0x60] sm:$0xff] }
 0x178   : > { %v975_v9 = vsel %vm9309_vm11, %v943_v30, %v974_v29  ;;  %v9317_v34 = vpop.f32.mrf.mxu2  ;;  %6880 = vmatmul.msk.bf16.gmra.mxu3 %vm1244_vm6, %v9313_v33  ;;  %v1193_v36 = vshll.u32 %v9313_v33, 16  ;;  %v1197_v1 = vshrl.u32 %v9313_v33, 16 }
 0x179   : > { %976 = vst [vmem:[#allocation2 + $0x68] sm:$0x7] %v975_v9  ;;  %v1550_v9 = vrot.slane %v9286_v37, 1  ;;  %v1451_v20 = vadd.f32 %v9284_v59, %v9317_v34 }
 0x17a   : > { %v1195_v40 = vrot.slane %v1193_v36, 1 }
 0x17b   : > { %v9323_v7 = vpop.f32.mrf.mxu3 }
 0x17c   : > { %v1196_v45 = vsel %vm442_vm1, %v1191_v39, %v1195_v40  ;;  %v1199_v6 = vor.u32 %v1197_v1, %v1195_v40  ;;  %v1551_v39 = vsel %vm1528_vm2, %v1548_v46, %v1550_v9 }
 0x17d   : > { %6841 = vmatmul.msk.bf16.gmra.mxu2 %vm1244_vm6, %v1196_v45 }
 0x17e   : > { %v1643_v47 = vpop.f32.mrf.mxu0 }
 0x17f   : > { %v1712_v48 = vadd.f32 %v1643_v47, %v1439_v43 }
 0x180   : > { %v1003_v51 = vld [vmem:[#allocation2 + $0x68] sm:$0x3]  ;;  %v9338_v12 = vpop.f32.mrf.mxu2 }
 0x181   : > { %v1743_v52 = vadd.f32 %v9331_v44, %v1712_v48  ;;  %6926 = vmatmul.msk.bf16.gmra.mxu0 %vm1244_vm6, %v1547_v49  ;;  %v1082_v56 = vunpack.c.l.b16 %v1003_v51 }
 0x183   : > { %vm1770_vm12 = vcmp.ge.f32.partialorder %v1743_v52, 0.0  ;;  %v1797_v31 = vmul.f32 0.3, %v1743_v52  ;;  %v1096_v53 = vpack.c.b16 %v1082_v56, %v1082_v56  ;;  %v9340_v54 = vpop.f32.mrf.mxu3  ;;  %v1552_v56 = vrot.slane %v9313_v33, 1 }
 0x185   : > { %v1824_v57 = vsel %vm1770_vm12, %v1743_v52, %v1797_v31  ;;  %v1201_v28 = vshll.u32 %v1096_v53, 16  ;;  %v1205_v26 = vshrl.u32 %v1096_v53, 16  ;;  %v1454_v31 = vadd.f32 %v9296_v13, %v9338_v12 }
 0x186   : > { %1851 = vst.msk [vmem:[#allocation3] sm:$0xff] %vm566_vm0, %v1824_v57  ;;  %v1645_v61 = vpop.f32.mrf.mxu0 }
 0x187   : > { %v1713_v62 = vadd.f32 %v1645_v61, %v1441_v55  ;;  %v1203_v2 = vrot.slane %v1201_v28, 1  ;;  %v1553_v55 = vsel %vm1528_vm2, %v1550_v9, %v1552_v56  ;;  %v1508_v61 = vld [vmem:[#allocation2 + $0x68] sm:$0x7] }
 0x188   : > { %v9346_v0 = vpop.f32.mrf.mxu2  ;;  %6881 = vmatmul.msk.bf16.gmra.mxu3 %vm1244_vm6, %v1096_v53 }
 0x189   : > { %v1744_v63 = vadd.f32 %v9331_v44, %v1713_v62  ;;  %v1204_v11 = vsel %vm442_vm1, %v1199_v6, %v1203_v2  ;;  %v1207_v4 = vor.u32 %v1205_v26, %v1203_v2  ;;  %v1456_v13 = vadd.f32 %v9307_v25, %v9346_v0 }
 0x18b   : > { %vm1771_vm13 = vcmp.ge.f32.partialorder %v1744_v63, 0.0  ;;  %v1798_v5 = vmul.f32 0.3, %v1744_v63  ;;  %v9350_v8 = vpop.f32.mrf.mxu3 }
 0x18d   : > { %v1825_v10 = vsel %vm1771_vm13, %v1744_v63, %v1798_v5  ;;  %6842 = vmatmul.msk.bf16.gmra.mxu2 %vm1244_vm6, %v1204_v11  ;;  %v1525_v63 = vunpack.c.l.b16 %v1508_v61 }
 0x18e   : > { %1852 = vst.msk [vmem:[#allocation3 + $0x8] sm:$0xff] %vm566_vm0, %v1825_v10  ;;  %v1648_v14 = vpop.f32.mrf.mxu0 }
 0x18f   : > { %v1714_v15 = vadd.f32 %v1648_v14, %v1444_v41  ;;  %v1527_v25 = vpack.c.b16 %v1525_v63, %v1525_v63 }
 0x190   : > { %v9361_v18 = vpop.f32.mrf.mxu2 }
 0x191   : > { %v1745_v17 = vadd.f32 %v9331_v44, %v1714_v15  ;;  %6927 = vmatmul.msk.bf16.gmra.mxu0 %vm1244_vm6, %v1549_v16 }
 0x193   : > { %vm1772_vm14 = vcmp.ge.f32.partialorder %v1745_v17, 0.0  ;;  %v1799_v38 = vmul.f32 0.3, %v1745_v17  ;;  %v9363_v21 = vpop.f32.mrf.mxu3 }
 0x195   : > { %v1826_v19 = vsel %vm1772_vm14, %v1745_v17, %v1799_v38 }
 0x196   : > { %1853 = vst.msk [vmem:[#allocation3 + $0x10] sm:$0xff] %vm566_vm0, %v1826_v19  ;;  %v1650_v22 = vpop.f32.mrf.mxu0 }
 0x197   : > { %v1715_v23 = vadd.f32 %v1650_v22, %v1446_v58 }
 0x198   : > { %v9369_v50 = vpop.f32.mrf.mxu2 }
 0x199   : > { %v1746_v24 = vadd.f32 %v9331_v44, %v1715_v23  ;;  %v1554_v23 = vrot.slane %v1527_v25, 1 }
 0x19b   : > { %vm1773_vm15 = vcmp.ge.f32.partialorder %v1746_v24, 0.0  ;;  %v1800_v29 = vmul.f32 0.3, %v1746_v24  ;;  %v9371_v30 = vpop.f32.mrf.mxu3 }
 0x19d   : > { %v1827_v3 = vsel %vm1773_vm15, %v1746_v24, %v1800_v29  ;;  %6843 = vmatmul.msk.bf16.gmra.mxu2 %vm1244_vm6, %v1207_v4  ;;  %v1459_v24 = vadd.f32 %v9323_v7, %v9361_v18  ;;  %v1461_v7 = vadd.f32 %v9340_v54, %v9369_v50 }
 0x19e   : > { %1854 = vst.msk [vmem:[#allocation3 + $0x18] sm:$0xff] %vm566_vm0, %v1827_v3  ;;  %v1653_v35 = vpop.f32.mrf.mxu0 }
 0x19f   : > { %v1716_v36 = vadd.f32 %v1653_v35, %v1449_v32  ;;  %v1555_v32 = vsel %vm1528_vm2, %v1552_v56, %v1554_v23 }
 0x1a0   : > { %v9381_v42 = vpop.f32.mrf.mxu2 }
 0x1a1   : > { %v1747_v40 = vadd.f32 %v9331_v44, %v1716_v36  ;;  %6928 = vmatmul.msk.bf16.gmra.mxu0 %vm1244_vm6, %v1551_v39 }
 0x1a3   : > { %vm1774_vm4 = vcmp.ge.f32.partialorder %v1747_v40, 0.0  ;;  %v1801_v37 = vmul.f32 0.3, %v1747_v40  ;;  %v9383_v43 = vpop.f32.mrf.mxu3 }
 0x1a5   : > { %v1828_v60 = vsel %vm1774_vm4, %v1747_v40, %v1801_v37 }
 0x1a6   : > { %1855 = vst.msk [vmem:[#allocation3 + $0x20] sm:$0xff] %vm566_vm0, %v1828_v60  ;;  %v1655_v45 = vpop.f32.mrf.mxu0 }
 0x1a7   : > { %v1717_v47 = vadd.f32 %v1655_v45, %v1451_v20 }
 0x1a8   : > { %v9389_v49 = vpop.f32.mrf.mxu2 }
 0x1a9   : > { %v1748_v48 = vadd.f32 %v9331_v44, %v1717_v47 }
 0x1ab   : > { %vm1775_vm5 = vcmp.ge.f32.partialorder %v1748_v48, 0.0  ;;  %v1802_v51 = vmul.f32 0.3, %v1748_v48  ;;  %v9391_v52 = vpop.f32.mrf.mxu3 }
 0x1ad   : > { %v1829_v53 = vsel %vm1775_vm5, %v1748_v48, %v1802_v51  ;;  %v1464_v48 = vadd.f32 %v9350_v8, %v9381_v42  ;;  %v8509_v42 = vld [vmem:[%s11065_s3 + $0xb8] sm:$0xff] }
 0x1ae   : > { %1856 = vst.msk [vmem:[#allocation3 + $0x28] sm:$0xff] %vm566_vm0, %v1829_v53  ;;  %v1658_v59 = vpop.f32.mrf.mxu0  ;;  %2319 = vmatpush.bf16.msrb.mxu2 %v8509_v42 }
 0x1af   : > { %v1718_v34 = vadd.f32 %v1658_v59, %v1454_v31 }
 0x1b0   : > { %v9400_v28 = vpop.f32.mrf.mxu2 }
 0x1b1   : > { %v1749_v57 = vadd.f32 %v9331_v44, %v1718_v34  ;;  %6929 = vmatmul.msk.bf16.gmra.mxu0 %vm1244_vm6, %v1553_v55  ;;  %v1466_v34 = vadd.f32 %v9363_v21, %v9389_v49 }
 0x1b3   : > { %vm1776_vm7 = vcmp.ge.f32.partialorder %v1749_v57, 0.0  ;;  %v1803_v62 = vmul.f32 0.3, %v1749_v57  ;;  %v9402_v33 = vpop.f32.mrf.mxu3 }
 0x1b5   : > { %v1830_v12 = vsel %vm1776_vm7, %v1749_v57, %v1803_v62  ;;  %v1987_v1 = vld [vmem:[#allocation3 + $0x3] ss:$6 sm:$0xff]  ;;  %v1945_v2 = vld [vmem:[#allocation3 + $0x2] ss:$6 sm:$0xff] }
 0x1b6   : > { %v1903_v5 = vld [vmem:[#allocation3 + $0x1] ss:$6 sm:$0xff]  ;;  %1857 = vst.msk [vmem:[#allocation3 + $0x30] sm:$0xff] %vm566_vm0, %v1830_v12  ;;  %v1660_v6 = vpop.f32.mrf.mxu0  ;;  %v1996_v46 = vpack.c.bf16 %v1987_v1, %v1987_v1  ;;  %v1954_v41 = vpack.c.bf16 %v1945_v2, %v1945_v2  ;;  %v1881_v11 = vld [vmem:[#allocation3] ss:$6 sm:$0xff] }
 0x1b7   : > { %v1912_v10 = vpack.c.bf16 %v1903_v5, %v1903_v5  ;;  %v1719_v14 = vadd.f32 %v1660_v6, %v1456_v13  ;;  %v1890_v15 = vpack.c.bf16 %v1881_v11, %v1881_v11  ;;  %v2029_v16 = vld [vmem:[#allocation3 + $0x4] ss:$6 sm:$0xff]  ;;  %v2049_v22 = vld [vmem:[#allocation3 + $0x5] ss:$6 sm:$0xff]  ;;  %v1469_v13 = vadd.f32 %v9371_v30, %v9400_v28 }
 0x1b8   : > { %2006 = vrot.lane.b32.xlu2 %v1996_v46, %s11080_s29  ;;  %1964 = vrot.lane.b32.xlu1 %v1954_v41, %s11078_s14  ;;  %v2038_v0 = vpack.c.bf16 %v2029_v16, %v2029_v16  ;;  %v9411_v38 = vpop.f32.mrf.mxu2  ;;  %v2058_v9 = vpack.c.bf16 %v2049_v22, %v2049_v22  ;;  %v8493_v57 = vld [vmem:[%s11065_s3 + $0x38] sm:$0xff] }
 0x1b9   : > { %v1750_v17 = vadd.f32 %v9331_v44, %v1719_v14  ;;  %1922 = vrot.lane.b32.xlu0 %v1912_v10, %s11074_s16  ;;  %1896 = vst.msk [vmem:[#allocation4] sm:$0xf] %vm1895_vm8, %v1890_v15  ;;  %2419 = vmatpush.bf16.msrb.mxu3 %v8493_v57  ;;  %v8505_v2 = vld [vmem:[%s11065_s3 + $0x98] sm:$0xff]  ;;  %v1471_v30 = vadd.f32 %v9383_v43, %v9411_v38 }
 0x1ba   : > { %2043 = vst.msk [vmem:[#allocation4 + $0x4] sm:$0xf] %vm1895_vm8, %v2038_v0  ;;  %2292 = vmatpush.bf16.msrb.mxu1 %v8505_v2 }
 0x1bb   : > { %vm1777_vm9 = vcmp.ge.f32.partialorder %v1750_v17, 0.0  ;;  %v1804_v58 = vmul.f32 0.3, %v1750_v17  ;;  %v9415_v19 = vpop.f32.mrf.mxu3 }
 0x1bd   : > { %v1831_v26 = vsel %vm1777_vm9, %v1750_v17, %v1804_v58 }
 0x1be   : > { %1858 = vst.msk [vmem:[#allocation3 + $0x38] sm:$0xff] %vm566_vm0, %v1831_v26  ;;  %v1663_v29 = vpop.f32.mrf.mxu0 }
 0x1bf   : > { %v1720_v4 = vadd.f32 %v1663_v29, %v1459_v24 }
 0x1c0   : > { %v9424_v35 = vpop.f32.mrf.mxu2 }
 0x1c1   : > { %v1751_v3 = vadd.f32 %v9331_v44, %v1720_v4  ;;  %2068 = vrot.lane.b32.xlu0 %v2058_v9, %s11074_s16  ;;  %6930 = vmatmul.msk.bf16.gmra.mxu0 %vm1244_vm6, %v1555_v32  ;;  %v1474_v32 = vadd.f32 %v9391_v52, %v9424_v35 }
 0x1c3   : > { %vm1778_vm10 = vcmp.ge.f32.partialorder %v1751_v3, 0.0  ;;  %v1805_v36 = vmul.f32 0.3, %v1751_v3  ;;  %v9426_v39 = vpop.f32.mrf.mxu3 }
 0x1c5   : > { %v1832_v18 = vsel %vm1778_vm10, %v1751_v3, %v1805_v36 }
 0x1c6   : > { %1859 = vst.msk [vmem:[#allocation3 + $0x40] sm:$0xff] %vm566_vm0, %v1832_v18  ;;  %v1665_v40 = vpop.f32.mrf.mxu0 }
 0x1c7   : > { %v1721_v37 = vadd.f32 %v1665_v40, %v1461_v7 }
 0x1c8   : > { %v9432_v60 = vpop.f32.mrf.mxu2 }
 0x1c9   : > { %v1752_v20 = vadd.f32 %v9331_v44, %v1721_v37 }
 0x1cb   : > { %vm1779_vm12 = vcmp.ge.f32.partialorder %v1752_v20, 0.0  ;;  %v1806_v45 = vmul.f32 0.3, %v1752_v20  ;;  %v9434_v47 = vpop.f32.mrf.mxu3 }
 0x1cd   : > { %v1833_v51 = vsel %vm1779_vm12, %v1752_v20, %v1806_v45 }
 0x1ce   : > { %1860 = vst.msk [vmem:[#allocation3 + $0x48] sm:$0xff] %vm566_vm0, %v1833_v51  ;;  %v1668_v54 = vpop.f32.mrf.mxu0  ;;  %v8492_v51 = vld [vmem:[%s11065_s3 + $0x30] sm:$0xff] }
 0x1cf   : > { %v1722_v50 = vadd.f32 %v1668_v54, %v1464_v48  ;;  %v1476_v48 = vadd.f32 %v9402_v33, %v9432_v60  ;;  %2420 = vmatpush.bf16.msrb.mxu3 %v8492_v51 }
 0x1d0   : > { %v9441_v31 = vpop.f32.mrf.mxu2 }
 0x1d1   : > { %v1753_v56 = vadd.f32 %v9331_v44, %v1722_v50  ;;  %6931 = vmatmul.msk.bf16.gmra.mxu0 %vm1244_vm6, %v1554_v23  ;;  %v1479_v33 = vadd.f32 %v9415_v19, %v9441_v31 }
 0x1d3   : > { %vm1780_vm13 = vcmp.ge.f32.partialorder %v1753_v56, 0.0  ;;  %v1807_v53 = vmul.f32 0.3, %v1753_v56  ;;  %v9443_v59 = vpop.f32.mrf.mxu3 }
 0x1d5   : > { %v1834_v55 = vsel %vm1780_vm13, %v1753_v56, %v1807_v53 }
 0x1d6   : > { %1861 = vst.msk [vmem:[#allocation3 + $0x50] sm:$0xff] %vm566_vm0, %v1834_v55  ;;  %v1670_v8 = vpop.f32.mrf.mxu0 }
 0x1d7   : > { %v1723_v61 = vadd.f32 %v1670_v8, %v1466_v34  ;;  %v8504_v8 = vld [vmem:[%s11065_s3 + $0x90] sm:$0xff] }
 0x1d8   : > { %v9455_v63 = vpop.f32.mrf.mxu2  ;;  %2293 = vmatpush.bf16.msrb.mxu1 %v8504_v8 }
 0x1d9   : > { %v1754_v62 = vadd.f32 %v9331_v44, %v1723_v61  ;;  %v1481_v19 = vadd.f32 %v9426_v39, %v9455_v63 }
 0x1db   : > { %vm1781_vm14 = vcmp.ge.f32.partialorder %v1754_v62, 0.0  ;;  %v1808_v21 = vmul.f32 0.3, %v1754_v62  ;;  %v9457_v49 = vpop.f32.mrf.mxu3 }
 0x1dd   : > { %v1835_v12 = vsel %vm1781_vm14, %v1754_v62, %v1808_v21 }
 0x1de   : > { %1862 = vst.msk [vmem:[#allocation3 + $0x58] sm:$0xff] %vm566_vm0, %v1835_v12  ;;  %v1673_v1 = vpop.f32.mrf.mxu0 }
 0x1df   : > { %v1724_v5 = vadd.f32 %v1673_v1, %v1469_v13 }
 0x1e0   : > { %v9466_v46 = vpop.f32.mrf.mxu2 }
 0x1e1   : > { %v1755_v6 = vadd.f32 %v9331_v44, %v1724_v5 }
 0x1e3   : > { %vm1782_vm15 = vcmp.ge.f32.partialorder %v1755_v6, 0.0  ;;  %v1809_v41 = vmul.f32 0.3, %v1755_v6  ;;  %v9468_v10 = vpop.f32.mrf.mxu3 }
 0x1e5   : > { %v1836_v28 = vsel %vm1782_vm15, %v1755_v6, %v1809_v41  ;;  %v1989_v11 = vld [vmem:[#allocation3 + $0x33] ss:$6 sm:$0xff]  ;;  %v1947_v14 = vld [vmem:[#allocation3 + $0x32] ss:$6 sm:$0xff]  ;;  %v1484_v41 = vadd.f32 %v9434_v47, %v9466_v46  ;;  %vm1937_vm15 = vcmask 519424  }
 0x1e6   : > { %v1905_v15 = vld [vmem:[#allocation3 + $0x31] ss:$6 sm:$0xff]  ;;  %1863 = vst.msk [vmem:[#allocation3 + $0x60] sm:$0xff] %vm566_vm0, %v1836_v28  ;;  %v1675_v16 = vpop.f32.mrf.mxu0  ;;  %v1997_v25 = vpack.c.bf16 %v1989_v11, %v1989_v11  ;;  %v1955_v0 = vpack.c.bf16 %v1947_v14, %v1947_v14  ;;  %v1883_v58 = vld [vmem:[#allocation3 + $0x30] ss:$6 sm:$0xff] }
 0x1e7   : > { %v1913_v17 = vpack.c.bf16 %v1905_v15, %v1905_v15  ;;  %v1725_v22 = vadd.f32 %v1675_v16, %v1471_v30  ;;  %v1891_v23 = vpack.c.bf16 %v1883_v58, %v1883_v58  ;;  %v2031_v24 = vld [vmem:[#allocation3 + $0x34] ss:$6 sm:$0xff]  ;;  %v2051_v4 = vld [vmem:[#allocation3 + $0x35] ss:$6 sm:$0xff] }
 0x1e8   : > { %2008 = vrot.lane.b32.xlu2 %v1997_v25, %s11080_s29  ;;  %1966 = vrot.lane.b32.xlu1 %v1955_v0, %s11078_s14  ;;  %v2039_v26 = vpack.c.bf16 %v2031_v24, %v2031_v24  ;;  %v9477_v38 = vpop.f32.mrf.mxu2  ;;  %v2059_v7 = vpack.c.bf16 %v2051_v4, %v2051_v4  ;;  %v8508_v28 = vld [vmem:[%s11065_s3 + $0xb0] sm:$0xff]  ;;  %v8491_v11 = vld [vmem:[%s11065_s3 + $0x28] sm:$0xff] }
 0x1e9   : > { %v1756_v43 = vadd.f32 %v9331_v44, %v1725_v22  ;;  %1924 = vrot.lane.b32.xlu0 %v1913_v17, %s11074_s16  ;;  %1897 = vst.msk [vmem:[#allocation4 + $0x8] sm:$0xf] %vm1895_vm8, %v1891_v23  ;;  %2320 = vmatpush.bf16.msrb.mxu2 %v8508_v28  ;;  %v1486_v16 = vadd.f32 %v9443_v59, %v9477_v38 }
 0x1ea   : > { %2044 = vst.msk [vmem:[#allocation4 + $0xc] sm:$0xf] %vm1895_vm8, %v2039_v26  ;;  %2421 = vmatpush.bf16.msrb.mxu3 %v8491_v11 }
 0x1eb   : > { %vm1783_vm4 = vcmp.ge.f32.partialorder %v1756_v43, 0.0  ;;  %v1810_v29 = vmul.f32 0.3, %v1756_v43  ;;  %v9481_v9 = vpop.f32.mrf.mxu3 }
 0x1ed   : > { %v1837_v3 = vsel %vm1783_vm4, %v1756_v43, %v1810_v29  ;;  %v8503_v43 = vld [vmem:[%s11065_s3 + $0x88] sm:$0xff]  ;;  %vm1979_vm4 = vcmask 781824  }
 0x1ee   : > { %1864 = vst.msk [vmem:[#allocation3 + $0x68] sm:$0xff] %vm566_vm0, %v1837_v3  ;;  %v1678_v36 = vpop.f32.mrf.mxu0  ;;  %2294 = vmatpush.bf16.msrb.mxu1 %v8503_v43 }
 0x1ef   : > { %v1726_v18 = vadd.f32 %v1678_v36, %v1474_v32 }
 0x1f0   : > { %2070 = vrot.lane.b32.xlu1 %v2059_v7, %s11074_s16  ;;  %v9488_v37 = vpop.f32.mrf.mxu2 }
 0x1f1   : > { %v1757_v40 = vadd.f32 %v9331_v44, %v1726_v18  ;;  %v1489_v18 = vadd.f32 %v9457_v49, %v9488_v37 }
 0x1f3   : > { %vm1784_vm5 = vcmp.ge.f32.partialorder %v1757_v40, 0.0  ;;  %v1811_v20 = vmul.f32 0.3, %v1757_v40  ;;  %v9490_v45 = vpop.f32.mrf.mxu3 }
 0x1f5   : > { %v1838_v52 = vsel %vm1784_vm5, %v1757_v40, %v1811_v20 }
 0x1f6   : > { %1865 = vst.msk [vmem:[#allocation3 + $0x70] sm:$0xff] %vm566_vm0, %v1838_v52  ;;  %v1680_v35 = vpop.f32.mrf.mxu0 }
 0x1f7   : > { %v1727_v54 = vadd.f32 %v1680_v35, %v1476_v48 }
 0x1f8   : > { %v9499_v56 = vpop.f32.mrf.mxu2 }
 0x1f9   : > { %v1758_v50 = vadd.f32 %v9331_v44, %v1727_v54  ;;  %v1491_v54 = vadd.f32 %v9468_v10, %v9499_v56 }
 0x1fb   : > { %vm1785_vm7 = vcmp.ge.f32.partialorder %v1758_v50, 0.0  ;;  %v1812_v53 = vmul.f32 0.3, %v1758_v50  ;;  %v9501_v34 = vpop.f32.mrf.mxu3 }
 0x1fd   : > { %v1839_v60 = vsel %vm1785_vm7, %v1758_v50, %v1812_v53  ;;  %vm2021_vm7 = vcmask 1044224  }
 0x1fe   : > { %1866 = vst.msk [vmem:[#allocation3 + $0x78] sm:$0xff] %vm566_vm0, %v1839_v60  ;;  %v1683_v55 = vpop.f32.mrf.mxu0 }
 0x1ff   : > { %v1728_v42 = vadd.f32 %v1683_v55, %v1479_v33 }
 0x200   : > { %v9510_v61 = vpop.f32.mrf.mxu2 }
 0x201   : > { %v1759_v57 = vadd.f32 %v9331_v44, %v1728_v42  ;;  %v1494_v10 = vadd.f32 %v9481_v9, %v9510_v61 }
 0x203   : > { %vm1786_vm9 = vcmp.ge.f32.partialorder %v1759_v57, 0.0  ;;  %v1813_v62 = vmul.f32 0.3, %v1759_v57  ;;  %v9512_v21 = vpop.f32.mrf.mxu3 }
 0x205   : > { %v1840_v31 = vsel %vm1786_vm9, %v1759_v57, %v1813_v62  ;;  %v8490_v62 = vld [vmem:[%s11065_s3 + $0x20] sm:$0xff]  ;;  %vm1879_vm9 = vcmask 258048  }
 0x206   : > { %1867 = vst.msk [vmem:[#allocation3 + $0x80] sm:$0xff] %vm566_vm0, %v1840_v31  ;;  %v1685_v13 = vpop.f32.mrf.mxu0  ;;  %2422 = vmatpush.bf16.msrb.mxu3 %v8490_v62  ;;  %v8886_v31 = vmov 0.0  }
 0x207   : > { %v1729_v12 = vadd.f32 %v1685_v13, %v1481_v19  ;;  %1880 = vst.msk [vmem:[#allocation3 + $0xd3] sm:$0x1f] %vm1879_vm9, %v8886_v31 }
 0x208   : > { %v9518_v2 = vpop.f32.mrf.mxu2 }
 0x209   : > { %v1760_v1 = vadd.f32 %v9331_v44, %v1729_v12  ;;  %v1496_v12 = vadd.f32 %v9490_v45, %v9518_v2  ;;  %v8489_v2 = vld [vmem:[%s11065_s3 + $0x18] sm:$0xff] }
 0x20a   : > { %2423 = vmatpush.bf16.msrb.mxu3 %v8489_v2 }
 0x20b   : > { %vm1787_vm10 = vcmp.ge.f32.partialorder %v1760_v1, 0.0  ;;  %v1814_v5 = vmul.f32 0.3, %v1760_v1  ;;  %v9520_v6 = vpop.f32.mrf.mxu3 }
 0x20d   : > { %v1841_v30 = vsel %vm1787_vm10, %v1760_v1, %v1814_v5 }
 0x20e   : > { %1868 = vst.msk [vmem:[#allocation3 + $0x88] sm:$0xff] %vm566_vm0, %v1841_v30  ;;  %v1688_v39 = vpop.f32.mrf.mxu0 }
 0x20f   : > { %v1730_v63 = vadd.f32 %v1688_v39, %v1484_v41  ;;  %v8502_v41 = vld [vmem:[%s11065_s3 + $0x80] sm:$0xff] }
 0x210   : > { %v9532_v15 = vpop.f32.mrf.mxu2  ;;  %2295 = vmatpush.bf16.msrb.mxu1 %v8502_v41 }
 0x211   : > { %v1761_v14 = vadd.f32 %v9331_v44, %v1730_v63  ;;  %v1499_v28 = vadd.f32 %v9501_v34, %v9532_v15  ;;  %v8488_v34 = vld [vmem:[%s11065_s3 + $0x10] sm:$0xff]  ;;  %v8487_v15 = vld [vmem:[%s11065_s3 + $0x8] sm:$0xff] }
 0x212   : > { %v2007_v42 = vpop.permute.xlu2 %2006  ;;  %2424 = vmatpush.bf16.msrb.mxu3 %v8488_v34  ;;  %v8517_v34 = vld [vmem:[%s11065_s3 + $0xf8] sm:$0xff] }
 0x213   : > { %vm1788_vm12 = vcmp.ge.f32.partialorder %v1761_v14, 0.0  ;;  %v1815_v47 = vmul.f32 0.3, %v1761_v14  ;;  %v1505_v46 = vpop.f32.mrf.mxu3 }
 0x215   : > { %v1842_v25 = vsel %vm1788_vm12, %v1761_v14, %v1815_v47  ;;  %v2053_v0 = vld [vmem:[#allocation3 + $0x65] ss:$6 sm:$0xff]  ;;  %v1949_v17 = vld [vmem:[#allocation3 + $0x62] ss:$6 sm:$0xff] }
 0x216   : > { %v1907_v58 = vld [vmem:[#allocation3 + $0x61] ss:$6 sm:$0xff]  ;;  %1869 = vst.msk [vmem:[#allocation3 + $0x90] sm:$0xff] %vm566_vm0, %v1842_v25  ;;  %v1690_v22 = vpop.f32.mrf.mxu0  ;;  %v2060_v23 = vpack.c.bf16 %v2053_v0, %v2053_v0  ;;  %v1956_v24 = vpack.c.bf16 %v1949_v17, %v1949_v17  ;;  %v2033_v29 = vld [vmem:[#allocation3 + $0x64] ss:$6 sm:$0xff]  ;;  %2425 = vmatpush.bf16.msrb.mxu3 %v8487_v15 }
 0x217   : > { %v1914_v26 = vpack.c.bf16 %v1907_v58, %v1907_v58  ;;  %v1731_v4 = vadd.f32 %v1690_v22, %v1486_v16  ;;  %v2040_v32 = vpack.c.bf16 %v2033_v29, %v2033_v29  ;;  %v1885_v3 = vld [vmem:[#allocation3 + $0x60] ss:$6 sm:$0xff] }
 0x218   : > { %2072 = vrot.lane.b32.xlu2 %v2060_v23, %s11074_s16  ;;  %1968 = vrot.lane.b32.xlu0 %v1956_v24, %s11078_s14  ;;  %v1892_v59 = vpack.c.bf16 %v1885_v3, %v1885_v3  ;;  %v9544_v36 = vpop.f32.mrf.mxu2  ;;  %v8507_v16 = vld [vmem:[%s11065_s3 + $0xa8] sm:$0xff]  ;;  %v8501_v25 = vld [vmem:[%s11065_s3 + $0x78] sm:$0xff] }
 0x219   : > { %v1762_v38 = vadd.f32 %v9331_v44, %v1731_v4  ;;  %1926 = vrot.lane.b32.xlu1 %v1914_v26, %s11074_s16  ;;  %2045 = vst.msk [vmem:[#allocation4 + $0x14] sm:$0xf] %vm1895_vm8, %v2040_v32  ;;  %v1501_v0 = vadd.f32 %v9512_v21, %v9544_v36  ;;  %2321 = vmatpush.bf16.msrb.mxu2 %v8507_v16  ;;  %v8486_v36 = vld [vmem:[%s11065_s3] sm:$0xff]  ;;  %v8521_v15 = vld [vmem:[%s11065_s3 + $0x118] sm:$0xff] }
 0x21a   : > { %1898 = vst.msk [vmem:[#allocation4 + $0x10] sm:$0xf] %vm1895_vm8, %v1892_v59  ;;  %2296 = vmatpush.bf16.msrb.mxu1 %v8501_v25  ;;  %2426 = vmatpush.bf16.msrb.mxu3 %v8486_v36  ;;  %v8497_v25 = vld [vmem:[%s11065_s3 + $0x58] sm:$0xff] }
 0x21b   : > { %vm1789_vm13 = vcmp.ge.f32.partialorder %v1762_v38, 0.0  ;;  %v1816_v7 = vmul.f32 0.3, %v1762_v38 }
 0x21d   : > { %v1843_v40 = vsel %vm1789_vm13, %v1762_v38, %v1816_v7 }
 0x21e   : > { %1870 = vst.msk [vmem:[#allocation3 + $0x98] sm:$0xff] %vm566_vm0, %v1843_v40  ;;  %v1693_v20 = vpop.f32.mrf.mxu0  ;;  %v1991_v40 = vld [vmem:[#allocation3 + $0x63] ss:$6 sm:$0xff]  ;;  %2623 = vmatpush.bf16.msra.mxu3 %v8521_v15 }
 0x21f   : > { %v1732_v48 = vadd.f32 %v1693_v20, %v1489_v18 }
 0x220   : > { %v9552_v35 = vpop.f32.mrf.mxu2 }
 0x221   : > { %v1763_v52 = vadd.f32 %v9331_v44, %v1732_v48  ;;  %v1504_v20 = vadd.f32 %v9520_v6, %v9552_v35  ;;  %v8500_v6 = vld [vmem:[%s11065_s3 + $0x70] sm:$0xff] }
 0x222   : > { %2297 = vmatpush.bf16.msrb.mxu1 %v8500_v6 }
 0x223   : > { %vm1790_vm14 = vcmp.ge.f32.partialorder %v1763_v52, 0.0  ;;  %v1817_v51 = vmul.f32 0.3, %v1763_v52 }
 0x225   : > { %v1844_v50 = vsel %vm1790_vm14, %v1763_v52, %v1817_v51 }
 0x226   : > { %1871 = vst.msk [vmem:[#allocation3 + $0xa0] sm:$0xff] %vm566_vm0, %v1844_v50  ;;  %v1695_v53 = vpop.f32.mrf.mxu0  ;;  %v1998_v50 = vpack.c.bf16 %v1991_v40, %v1991_v40  ;;  %v8519_v40 = vld [vmem:[%s11065_s3 + $0x108] sm:$0xff] }
 0x227   : > { %v1733_v33 = vadd.f32 %v1695_v53, %v1491_v54 }
 0x228   : > { %v1363_v37 = vpop.f32.mrf.mxu2 }
 0x229   : > { %v1764_v49 = vadd.f32 %v9331_v44, %v1733_v33 }
 0x22a   : > { %v1965_v60 = vpop.permute.xlu1 %1964 }
 0x22b   : > { %vm1791_vm5 = vcmp.ge.f32.partialorder %v1764_v49, 0.0  ;;  %v1818_v55 = vmul.f32 0.3, %v1764_v49  ;;  %v1923_v8 = vpop.permute.xlu0 %1922 }
 0x22c   : > { %1938 = vst.msk [vmem:[#allocation4] sm:$0xf] %vm1937_vm15, %v1923_v8 }
 0x22d   : > { %v1845_v56 = vsel %vm1791_vm5, %v1764_v49, %v1818_v55  ;;  %1980 = vst.msk [vmem:[#allocation4] sm:$0xf] %vm1979_vm4, %v1965_v60 }
 0x22e   : > { %1872 = vst.msk [vmem:[#allocation3 + $0xa8] sm:$0xff] %vm566_vm0, %v1845_v56  ;;  %v1698_v57 = vpop.f32.mrf.mxu0 }
 0x22f   : > { %2022 = vst.msk [vmem:[#allocation4] sm:$0xf] %vm2021_vm7, %v2007_v42  ;;  %v1734_v19 = vadd.f32 %v1698_v57, %v1494_v10 }
 0x231   : > { %v1765_v9 = vadd.f32 %v9331_v44, %v1734_v19 }
 0x233   : > { %vm1792_vm10 = vcmp.ge.f32.partialorder %v1765_v9, 0.0  ;;  %v1819_v61 = vmul.f32 0.3, %v1765_v9  ;;  %v2069_v13 = vpop.permute.xlu0 %2068 }
 0x234   : > { %2083 = vst.msk [vmem:[#allocation4 + $0x4] sm:$0xf] %vm1937_vm15, %v2069_v13 }
 0x235   : > { %v1846_v1 = vsel %vm1792_vm10, %v1765_v9, %v1819_v61  ;;  %vm1877_vm10 = vcmask 256000  }
 0x236   : > { %1873 = vst.msk [vmem:[#allocation3 + $0xb0] sm:$0xff] %vm566_vm0, %v1846_v1  ;;  %v1700_v5 = vpop.f32.mrf.mxu0 }
 0x237   : > { %v1735_v30 = vadd.f32 %v1700_v5, %v1496_v12 }
 0x239   : > { %v1766_v39 = vadd.f32 %v9331_v44, %v1735_v30 }
 0x23b   : > { %vm1793_vm12 = vcmp.ge.f32.partialorder %v1766_v39, 0.0  ;;  %v1820_v63 = vmul.f32 0.3, %v1766_v39  ;;  %v2088_v5 = vld [vmem:[#allocation4] sm:$0xff] }
 0x23c   : > { %v2147_v30 = vunpack.c.l.b16 %v2088_v5  ;;  %v2465_v15 = vld [vmem:[#allocation4] sm:$0xee] }
 0x23d   : > { %v1847_v11 = vsel %vm1793_vm12, %v1766_v39, %v1820_v63  ;;  %vm11077_vm12 = vcmask 254976  }
 0x23e   : > { %1874 = vst.msk [vmem:[#allocation3 + $0xb8] sm:$0xff] %vm566_vm0, %v1847_v11  ;;  %v1703_v45 = vpop.f32.mrf.mxu0  ;;  %v8499_v11 = vld [vmem:[%s11065_s3 + $0x68] sm:$0xff] }
 0x23f   : > { %v1736_v14 = vadd.f32 %v1703_v45, %v1499_v28  ;;  %v8506_v28 = vld [vmem:[%s11065_s3 + $0xa0] sm:$0xff]  ;;  %2298 = vmatpush.bf16.msrb.mxu1 %v8499_v11 }
 0x240   : > { %2322 = vmatpush.bf16.msrb.mxu2 %v8506_v28 }
 0x241   : > { %v1767_v47 = vadd.f32 %v9331_v44, %v1736_v14 }
 0x242   : > { %v2009_v57 = vpop.permute.xlu2 %2008 }
 0x243   : > { %vm1794_vm13 = vcmp.ge.f32.partialorder %v1767_v47, 0.0  ;;  %v1821_v46 = vmul.f32 0.3, %v1767_v47 }
 0x244   : > { %2596 = vmatpush.bf16.msra.mxu2 %v8517_v34 }
 0x245   : > { %v1848_v17 = vsel %vm1794_vm13, %v1767_v47, %v1821_v46  ;;  %v2055_v58 = vld [vmem:[#allocation3 + $0x95] ss:$6 sm:$0xff]  ;;  %v1951_v22 = vld [vmem:[#allocation3 + $0x92] ss:$6 sm:$0xff]  ;;  %vm11076_vm13 = vcmask 517376  }
 0x246   : > { %v1909_v23 = vld [vmem:[#allocation3 + $0x91] ss:$6 sm:$0xff]  ;;  %1875 = vst.msk [vmem:[#allocation3 + $0xc0] sm:$0xff] %vm566_vm0, %v1848_v17  ;;  %v1705_v24 = vpop.f32.mrf.mxu0  ;;  %v2061_v26 = vpack.c.bf16 %v2055_v58, %v2055_v58  ;;  %v1957_v43 = vpack.c.bf16 %v1951_v22, %v1951_v22  ;;  %v1887_v4 = vld [vmem:[#allocation3 + $0x90] ss:$6 sm:$0xff]  ;;  %v2148_v58 = vunpack.c.h.b16 %v2088_v5 }
 0x247   : > { %v1915_v29 = vpack.c.bf16 %v1909_v23, %v1909_v23  ;;  %v1737_v32 = vadd.f32 %v1705_v24, %v1501_v0  ;;  %v1893_v3 = vpack.c.bf16 %v1887_v4, %v1887_v4  ;;  %v2035_v59 = vld [vmem:[#allocation3 + $0x94] ss:$6 sm:$0xff]  ;;  %v1993_v18 = vld [vmem:[#allocation3 + $0x93] ss:$6 sm:$0xff] }
 0x248   : > { %2074 = vrot.lane.b32.xlu0 %v2061_v26, %s11074_s16  ;;  %1970 = vrot.lane.b32.xlu1 %v1957_v43, %s11078_s14  ;;  %v2041_v21 = vpack.c.bf16 %v2035_v59, %v2035_v59  ;;  %v1999_v51 = vpack.c.bf16 %v1993_v18, %v1993_v18  ;;  %v8498_v47 = vld [vmem:[%s11065_s3 + $0x60] sm:$0xff]  ;;  %v8516_v0 = vld [vmem:[%s11065_s3 + $0xf0] sm:$0xff] }
 0x249   : > { %v1768_v38 = vadd.f32 %v9331_v44, %v1737_v32  ;;  %1928 = vrot.lane.b32.xlu2 %v1915_v29, %s11074_s16  ;;  %1899 = vst.msk [vmem:[#allocation4 + $0x18] sm:$0xf] %vm1895_vm8, %v1893_v3  ;;  %2299 = vmatpush.bf16.msrb.mxu1 %v8498_v47  ;;  %v8515_v43 = vld [vmem:[%s11065_s3 + $0xe8] sm:$0xff]  ;;  %v8520_v29 = vld [vmem:[%s11065_s3 + $0x110] sm:$0xff]  ;;  %v8514_v18 = vld [vmem:[%s11065_s3 + $0xe0] sm:$0xff] }
 0x24a   : > { %2046 = vst.msk [vmem:[#allocation4 + $0x1c] sm:$0xf] %vm1895_vm8, %v2041_v21  ;;  %2597 = vmatpush.bf16.msra.mxu2 %v8516_v0  ;;  %2624 = vmatpush.bf16.msra.mxu3 %v8520_v29 }
 0x24b   : > { %vm1795_vm14 = vcmp.ge.f32.partialorder %v1768_v38, 0.0  ;;  %v1822_v7 = vmul.f32 0.3, %v1768_v38 }
 0x24d   : > { %v1849_v48 = vsel %vm1795_vm14, %v1768_v38, %v1822_v7  ;;  %2446 = vmatpush.bf16.msra.mxu1 %v8497_v25  ;;  %v8496_v7 = vld [vmem:[%s11065_s3 + $0x50] sm:$0xff]  ;;  %vm11073_vm14 = vcmask 779776   ;;  %v2495_v25 = vunpack.c.h.b16 %v2465_v15 }
 0x24e   : > { %1876 = vst.msk [vmem:[#allocation3 + $0xc8] sm:$0xff] %vm566_vm0, %v1849_v48  ;;  %v1708_v52 = vpop.f32.mrf.mxu0  ;;  %2598 = vmatpush.bf16.msra.mxu2 %v8515_v43  ;;  %2625 = vmatpush.bf16.msra.mxu3 %v8519_v40 }
 0x24f   : > { %v1738_v54 = vadd.f32 %v1708_v52, %v1504_v20 }
 0x250   : > { %2012 = vrot.lane.b32.xlu0 %v1999_v51, %s11080_s29  ;;  %v8513_v51 = vld [vmem:[%s11065_s3 + $0xd8] sm:$0xff] }
 0x251   : > { %v1769_v53 = vadd.f32 %v9331_v44, %v1738_v54  ;;  %2010 = vrot.lane.b32.xlu2 %v1998_v50, %s11080_s29  ;;  %2447 = vmatpush.bf16.msra.mxu1 %v8496_v7  ;;  %v8518_v54 = vld [vmem:[%s11065_s3 + $0x100] sm:$0xff] }
 0x252   : > { %2599 = vmatpush.bf16.msra.mxu2 %v8514_v18  ;;  %2626 = vmatpush.bf16.msra.mxu3 %v8518_v54 }
 0x253   : > { %vm1796_vm5 = vcmp.ge.f32.partialorder %v1769_v53, 0.0  ;;  %v1823_v33 = vmul.f32 0.3, %v1769_v53 }
 0x255   : > { %v1850_v35 = vsel %vm1796_vm5, %v1769_v53, %v1823_v33  ;;  %v1995_v49 = vld [vmem:[#allocation3 + $0xc3] ss:$6 sm:$0xf]  ;;  %v1953_v37 = vld [vmem:[#allocation3 + $0xc2] ss:$6 sm:$0xf] }
 0x256   : > { %1878 = vst.msk [vmem:[#allocation3 + $0xd0] sm:$0x7] %vm1877_vm10, %v1850_v35  ;;  %v1710_v60 = vpop.f32.mrf.mxu0  ;;  %v2000_v55 = vpack.c.bf16 %v1995_v49, %v1995_v49  ;;  %v1958_v8 = vpack.c.bf16 %v1953_v37, %v1953_v37  ;;  %v1911_v10 = vld [vmem:[#allocation3 + $0xc1] ss:$6 sm:$0xf]  ;;  %vm11072_vm5 = vcmask 1042176   ;;  %2600 = vmatpush.bf16.msra.mxu2 %v8513_v51 }
 0x257   : > { %v1916_v44 = vpack.c.bf16 %v1911_v10, %v1911_v10 }
 0x258   : > { %2014 = vrot.lane.b32.xlu0 %v2000_v55, %s11080_s29  ;;  %s11091_s29 = smov 64  }
 0x259   : > { %1972 = vrot.lane.b32.xlu2 %v1958_v8, %s11078_s14  ;;  %1930 = vrot.lane.b32.xlu1 %v1916_v44, %s11074_s16 }
 0x25a   : > { %v1967_v56 = vpop.permute.xlu1 %1966 }
 0x25b   : > { %v1925_v42 = vpop.permute.xlu0 %1924 }
 0x25c   : > { %1939 = vst.msk [vmem:[#allocation4 + $0x8] sm:$0xf] %vm1937_vm15, %v1925_v42  ;;  %v8495_v42 = vld [vmem:[%s11065_s3 + $0x48] sm:$0xff] }
 0x25d   : > { %1981 = vst.msk [vmem:[#allocation4 + $0x8] sm:$0xf] %vm1979_vm4, %v1967_v56  ;;  %v2057_v62 = vld [vmem:[#allocation3 + $0xc5] ss:$6 sm:$0xf]  ;;  %2448 = vmatpush.bf16.msra.mxu1 %v8495_v42 }
 0x25e   : > { %2023 = vst.msk [vmem:[#allocation4 + $0x8] sm:$0xf] %vm2021_vm7, %v2009_v57  ;;  %v2062_v19 = vpack.c.bf16 %v2057_v62, %v2057_v62  ;;  %v1889_v9 = vld [vmem:[#allocation3 + $0xc0] ss:$6 sm:$0xf] }
 0x25f   : > { %v1894_v61 = vpack.c.bf16 %v1889_v9, %v1889_v9  ;;  %v2037_v13 = vld [vmem:[#allocation3 + $0xc4] ss:$6 sm:$0xf] }
 0x260   : > { %v2042_v12 = vpack.c.bf16 %v2037_v13, %v2037_v13  ;;  %5010 = vst.msk [vmem:[#allocation3 + $0xd3] sm:$0x1f] %vm1879_vm9, %v8886_v31  ;;  %vm2282_vm9 = vcmask 523264   ;;  %v8512_v57 = vld [vmem:[%s11065_s3 + $0xd0] sm:$0xff]  ;;  %v8494_v9 = vld [vmem:[%s11065_s3 + $0x40] sm:$0xff] }
 0x261   : > { %2076 = vrot.lane.b32.xlu1 %v2062_v19, %s11074_s16  ;;  %1901 = vst.msk [vmem:[#allocation4 + $0x20] sm:$0x3] %vm11077_vm12, %v1894_v61  ;;  %2601 = vmatpush.bf16.msra.mxu2 %v8512_v57  ;;  %v8511_v19 = vld [vmem:[%s11065_s3 + $0xc8] sm:$0xff]  ;;  %v8510_v61 = vld [vmem:[%s11065_s3 + $0xc0] sm:$0xff]  ;;  %s6573_s16 = scalar_lea.hbm %s11071_s9, %s8751_s17 }
 0x262   : > { %v2071_v1 = vpop.permute.xlu1 %2070  ;;  %2047 = vst.msk [vmem:[#allocation4 + $0x24] sm:$0x3] %vm11077_vm12, %v2042_v12  ;;  %2449 = vmatpush.bf16.msra.mxu1 %v8494_v9  ;;  %vm2675_vm12 = vcmask 516096   ;;  %s6576_s13 = sshll.u32 %s6573_s16, 4  ;;  %s6577_s13 = int_to_ptr.hbm [resolvable:$true] %s6576_s13 }
 0x263   : > { %2084 = vst.msk [vmem:[#allocation4 + $0xc] sm:$0xf] %vm1937_vm15, %v2071_v1 }
 0x265   : > { %2602 = vmatpush.bf16.msra.mxu2 %v8511_v19 }
 0x269   : > { %2603 = vmatpush.bf16.msra.mxu2 %v8510_v61 }
 0x26a   : > { %v9631_v41 = vld [vmem:[#allocation4 + $0x8] sm:$0xff] }
 0x26b   : > { %v2149_v39 = vunpack.c.l.b16 %v9631_v41  ;;  %v2150_v17 = vunpack.c.h.b16 %v9631_v41 }
 0x26d   : > { %v9636_v63 = vpack.c.b16 %v2149_v39, %v2147_v30  ;;  %v9669_v24 = vpack.c.b16 %v2150_v17, %v2148_v58  ;;  %v2499_v0 = vpack.c.b16 %v2150_v17, %v2495_v25 }
 0x26f   : > { %2427 = vmatmul.bf16.vlgmr.msrb.gmra.mxu3 %v9636_v63  ;;  %v2178_v26 = vshll.u32 %v9669_v24, 16  ;;  %v2176_v38 = vshrl.u32 %v9669_v24, 16  ;;  %v2166_v52 = vshll.u32 %v9636_v63, 16  ;;  %v2164_v55 = vshrl.u32 %v9636_v63, 16 }
 0x271   : > { %v2180_v21 = vrot.slane %v2178_v26, 1  ;;  %v2168_v49 = vrot.slane %v2166_v52, 1 }
 0x272   : > { %v2073_v45 = vpop.permute.xlu2 %2072 }
 0x273   : > { %2085 = vst.msk [vmem:[#allocation4 + $0x14] sm:$0xf] %vm1937_vm15, %v2073_v45  ;;  %v2181_v20 = vor.u32 %v2180_v21, %v2176_v38  ;;  %v2169_v10 = vor.u32 %v2168_v49, %v2164_v55  ;;  %v2494_v21 = vunpack.c.l.b16 %v2465_v15 }
 0x275   : > { %v2498_v17 = vpack.c.b16 %v2149_v39, %v2494_v21  ;;  %v8568_v21 = vld [vmem:[%s11066_s4 + $0x170] sm:$0xff] }
 0x277   : > { %v2502_v7 = vrot.slane %v2498_v17, 1 }
 0x27a   : > { %v8484_v32 = vld [vmem:[#allocation4 + $0x14] sm:$0xf] }
 0x28a   : > { %v1969_v2 = vpop.permute.xlu0 %1968 }
 0x28b   : > { %v1927_v14 = vpop.permute.xlu1 %1926 }
 0x28c   : > { %1940 = vst.msk [vmem:[#allocation4 + $0x10] sm:$0xf] %vm1937_vm15, %v1927_v14 }
 0x28d   : > { %1982 = vst.msk [vmem:[#allocation4 + $0x10] sm:$0xf] %vm1979_vm4, %v1969_v2 }
 0x2a3   : > { %v1929_v46 = vpop.permute.xlu2 %1928 }
 0x2a4   : > { %1941 = vst.msk [vmem:[#allocation4 + $0x18] sm:$0xf] %vm1937_vm15, %v1929_v46 }
 0x2ab   : > { %v2011_v16 = vpop.permute.xlu2 %2010 }
 0x2ac   : > { %2024 = vst.msk [vmem:[#allocation4 + $0x10] sm:$0xf] %vm2021_vm7, %v2011_v16 }
 0x2b3   : > { %v6958_v53 = vld [vmem:[#allocation4 + $0x10] sm:$0xf]  ;;  %v1973_v37 = vpop.permute.xlu2 %1972 }
 0x2ba   : > { %v2075_v22 = vpop.permute.xlu0 %2074  ;;  %v1971_v23 = vpop.permute.xlu1 %1970 }
 0x2bb   : > { %2086 = vst.msk [vmem:[#allocation4 + $0x1c] sm:$0xf] %vm1937_vm15, %v2075_v22  ;;  %v2505_v22 = vrot.slane %v2499_v0, 1 }
 0x2bc   : > { %1983 = vst.msk [vmem:[#allocation4 + $0x18] sm:$0xf] %vm1979_vm4, %v1971_v23 }
 0x2c2   : > { %v2013_v4 = vpop.permute.xlu0 %2012  ;;  %v6960_v3 = vld [vmem:[#allocation4 + $0x18] sm:$0xf0] }
 0x2c3   : > { %2025 = vst.msk [vmem:[#allocation4 + $0x18] sm:$0xf] %vm2021_vm7, %v2013_v4  ;;  %v9680_v59 = vor.u32 %v8484_v32, %v6960_v3 }
 0x2c5   : > { %v2183_v36 = vshll.u32 %v9680_v59, 16  ;;  %v2195_v11 = vshrl.u32 %v9680_v59, 16  ;;  %v2506_v58 = vrot.slane %v9680_v59, 1 }
 0x2c7   : > { %v2185_v48 = vrot.slane %v2183_v36, 1  ;;  %v2507_v23 = vsel %vm1528_vm2, %v2505_v22, %v2506_v58  ;;  %v8553_v22 = vld [vmem:[%s11066_s4 + $0xf8] sm:$0xff] }
 0x2c9   : > { %v2186_v50 = vsel %vm442_vm1, %v2181_v20, %v2185_v48  ;;  %v2197_v47 = vor.u32 %v2195_v11, %v2185_v48 }
 0x2ca   : > { %7012 = vmatmul.msk.bf16.vlgmr.msrb.gmra.mxu2 %vm2282_vm9, %v2186_v50  ;;  %v8485_v33 = vld [vmem:[#allocation4 + $0x14] sm:$0xf0]  ;;  %v2015_v60 = vpop.permute.xlu0 %2014 }
 0x2cb   : > { %v1931_v6 = vpop.permute.xlu1 %1930  ;;  %v9702_v35 = vor.u32 %v8485_v33, %v6958_v53 }
 0x2cc   : > { %1943 = vst.msk [vmem:[#allocation4 + $0x20] sm:$0x3] %vm11076_vm13, %v1931_v6 }
 0x2cd   : > { %1985 = vst.msk [vmem:[#allocation4 + $0x20] sm:$0x3] %vm11073_vm14, %v1973_v37  ;;  %2432 = vmatmul.bf16.gmra.mxu3 %v9702_v35  ;;  %v2171_v8 = vshll.u32 %v9702_v35, 16  ;;  %v2187_v63 = vshrl.u32 %v9702_v35, 16  ;;  %v2503_v36 = vrot.slane %v9702_v35, 1 }
 0x2ce   : > { %2027 = vst.msk [vmem:[#allocation4 + $0x20] sm:$0x3] %vm11072_vm5, %v2015_v60  ;;  %vm2677_vm5 = vcmask 518144  }
 0x2cf   : > { %v2173_v44 = vrot.slane %v2171_v8, 1  ;;  %v2504_v18 = vsel %vm1528_vm2, %v2502_v7, %v2503_v36  ;;  %2678 = vst.msk [vmem:[#allocation5 + $0x21] sm:$0x7] %vm2677_vm5, %v8886_v31 }
 0x2d1   : > { %v2174_v56 = vsel %vm442_vm1, %v2169_v10, %v2173_v44  ;;  %v2189_v2 = vor.u32 %v2187_v63, %v2173_v44 }
 0x2d2   : > { %2300 = vmatmul.bf16.vlgmr.msrb.gmra.mxu1 %v2174_v56 }
 0x2d3   : > { %v2077_v62 = vpop.permute.xlu1 %2076  ;;  %2992 = vmatpush.bf16.msrb.mxu1 %v8553_v22  ;;  %v8547_v22 = vld [vmem:[%s11066_s4 + $0xc8] sm:$0xff] }
 0x2d4   : > { %2087 = vst.msk [vmem:[#allocation4 + $0x24] sm:$0x3] %vm11076_vm13, %v2077_v62 }
 0x2db   : > { %v2092_v13 = vld [vmem:[#allocation4 + $0x20] sm:$0x11] }
 0x2dc   : > { %v2155_v12 = vunpack.c.l.b16 %v2092_v13  ;;  %v2156_v1 = vunpack.c.h.b16 %v2092_v13  ;;  %v2466_v26 = vld [vmem:[#allocation4 + $0x20] sm:$0x33] }
 0x2dd   : > { %v2497_v4 = vunpack.c.h.b16 %v2466_v26  ;;  %v2496_v40 = vunpack.c.l.b16 %v2466_v26  ;;  %v8569_v26 = vld [vmem:[%s11066_s4 + $0x178] sm:$0xff] }
 0x2de   : > { %v2161_v5 = vpack.c.b16 %v2155_v12, %v2155_v12  ;;  %v2162_v30 = vpack.c.b16 %v2156_v1, %v2156_v1  ;;  %v9762_v1 = vld [vmem:[%s11069_s7] ss:$0 sm:$0xff]  ;;  %3018 = vmatpush.bf16.msrb.mxu3 %v8569_v26  ;;  %v8563_v26 = vld [vmem:[%s11066_s4 + $0x148] sm:$0xff] }
 0x2df   : > { %v2501_v32 = vpack.c.b16 %v2497_v4, %v2497_v4  ;;  %v2500_v20 = vpack.c.b16 %v2496_v40, %v2496_v40  ;;  %v8552_v4 = vld [vmem:[%s11066_s4 + $0xf0] sm:$0xff] }
 0x2e0   : > { %2437 = vmatmul.bf16.gmra.mxu3 %v2161_v5  ;;  %v2191_v28 = vshll.u32 %v2161_v5, 16  ;;  %v2199_v45 = vshll.u32 %v2162_v30, 16  ;;  %v2203_v43 = vshrl.u32 %v2161_v5, 16  ;;  %v2205_v29 = vshrl.u32 %v2162_v30, 16  ;;  %2993 = vmatpush.bf16.msrb.mxu1 %v8552_v4  ;;  %v8562_v4 = vld [vmem:[%s11066_s4 + $0x140] sm:$0xff] }
 0x2e1   : > { %v2510_v3 = vrot.slane %v2501_v32, 1  ;;  %v2508_v48 = vrot.slane %v2500_v20, 1  ;;  %v8560_v32 = vld [vmem:[%s11066_s4 + $0x130] sm:$0xff] }
 0x2e2   : > { %v2193_v14 = vrot.slane %v2191_v28, 1  ;;  %v2201_v46 = vrot.slane %v2199_v45, 1  ;;  %3019 = vmatpush.bf16.msrb.mxu3 %v8568_v21  ;;  %v8545_v21 = vld [vmem:[%s11066_s4 + $0xb8] sm:$0xff] }
 0x2e3   : > { %v2511_v38 = vsel %vm1528_vm2, %v2506_v58, %v2510_v3  ;;  %v2509_v41 = vsel %vm1528_vm2, %v2503_v36, %v2508_v48 }
 0x2e4   : > { %v2194_v16 = vsel %vm442_vm1, %v2189_v2, %v2193_v14  ;;  %v2202_v34 = vsel %vm442_vm1, %v2197_v47, %v2201_v46 }
 0x2e5   : > { %2305 = vmatmul.bf16.gmra.mxu1 %v2194_v16  ;;  %7013 = vmatmul.msk.bf16.gmra.mxu2 %vm2282_vm9, %v2202_v34 }
 0x2f0   : > { %7138 = vmatmul.msk.bf16.vlgmr.msra.gmra.mxu3 %vm2282_vm9, %v2507_v23  ;;  %v8561_v23 = vld [vmem:[%s11066_s4 + $0x138] sm:$0xff] }
 0x2f1   : > { %3005 = vmatpush.bf16.msrb.mxu2 %v8561_v23  ;;  %v8555_v23 = vld [vmem:[%s11066_s4 + $0x108] sm:$0xff] }
 0x2f2   : > { %v2428_v39 = vpop.f32.mrf.mxu3 }
 0x2f5   : > { %2310 = vmatmul.bf16.gmra.mxu1 %v2203_v43  ;;  %7014 = vmatmul.msk.bf16.gmra.mxu2 %vm2282_vm9, %v2205_v29 }
 0x2f6   : > { %3006 = vmatpush.bf16.msrb.mxu2 %v8560_v32  ;;  %v8529_v32 = vld [vmem:[%s11066_s4 + $0x38] sm:$0xff] }
 0x2fa   : > { %v2430_v52 = vpop.f32.mrf.mxu3 }
 0x300   : > { %7139 = vmatmul.msk.bf16.gmra.mxu3 %vm2282_vm9, %v2511_v38 }
 0x305   : > { %7063 = vmatmul.msk.bf16.vlgmr.msra.gmra.mxu1 %vm2282_vm9, %v9669_v24  ;;  %2604 = vmatmul.bf16.vlgmr.msra.gmra.mxu2 %v2504_v18 }
 0x310   : > { %7140 = vmatmul.msk.bf16.gmra.mxu3 %vm2282_vm9, %v2510_v3 }
 0x315   : > { %7064 = vmatmul.msk.bf16.gmra.mxu1 %vm2282_vm9, %v9680_v59  ;;  %2609 = vmatmul.bf16.gmra.mxu2 %v2509_v41  ;;  %v8559_v41 = vld [vmem:[%s11066_s4 + $0x128] sm:$0xff] }
 0x316   : > { %3007 = vmatpush.bf16.msrb.mxu2 %v8559_v41  ;;  %v8542_v41 = vld [vmem:[%s11066_s4 + $0xa0] sm:$0xff] }
 0x325   : > { %7065 = vmatmul.msk.bf16.gmra.mxu1 %vm2282_vm9, %v2162_v30  ;;  %2614 = vmatmul.bf16.gmra.mxu2 %v2508_v48  ;;  %v8551_v48 = vld [vmem:[%s11066_s4 + $0xe8] sm:$0xff] }
 0x326   : > { %2994 = vmatpush.bf16.msrb.mxu1 %v8551_v48  ;;  %v8534_v48 = vld [vmem:[%s11066_s4 + $0x60] sm:$0xff] }
 0x34d   : > { %v2324_v24 = vpop.f32.mrf.mxu2 }
 0x34f   : > { %v2301_v51 = vpop.f32.mrf.mxu1 }
 0x350   : > { %v2433_v54 = vpop.f32.mrf.mxu3  ;;  %v2325_v62 = vadd.f32 %v2324_v24, %v2301_v51  ;;  %v8550_v24 = vld [vmem:[%s11066_s4 + $0xe0] sm:$0xff] }
 0x351   : > { %2995 = vmatpush.bf16.msrb.mxu1 %v8550_v24  ;;  %v8524_v24 = vld [vmem:[%s11066_s4 + $0x10] sm:$0xff] }
 0x352   : > { %v2429_v9 = vadd.f32 %v2428_v39, %v2325_v62  ;;  %v8567_v39 = vld [vmem:[%s11066_s4 + $0x168] sm:$0xff] }
 0x353   : > { %3020 = vmatpush.bf16.msrb.mxu3 %v8567_v39  ;;  %v8525_v39 = vld [vmem:[%s11066_s4 + $0x18] sm:$0xff] }
 0x355   : > { %v2326_v33 = vpop.f32.mrf.mxu2 }
 0x357   : > { %v2303_v50 = vpop.f32.mrf.mxu1 }
 0x358   : > { %v9751_v53 = vpop.f32.mrf.mxu3  ;;  %v2327_v30 = vadd.f32 %v2326_v33, %v2303_v50  ;;  %v8558_v50 = vld [vmem:[%s11066_s4 + $0x120] sm:$0xff] }
 0x359   : > { %3008 = vmatpush.bf16.msrb.mxu2 %v8558_v50  ;;  %v8532_v50 = vld [vmem:[%s11066_s4 + $0x50] sm:$0xff] }
 0x35a   : > { %v2431_v2 = vadd.f32 %v2430_v52, %v2327_v30 }
 0x362   : > { %v2306_v6 = vpop.f32.mrf.mxu1 }
 0x363   : > { %v9753_v35 = vpop.f32.mrf.mxu3 }
 0x368   : > { %v2329_v49 = vpop.f32.mrf.mxu2 }
 0x369   : > { %v2330_v15 = vadd.f32 %v2329_v49, %v2306_v6  ;;  %v8566_v6 = vld [vmem:[%s11066_s4 + $0x160] sm:$0xff] }
 0x36a   : > { %v2308_v37 = vpop.f32.mrf.mxu1  ;;  %3021 = vmatpush.bf16.msrb.mxu3 %v8566_v6  ;;  %v8523_v6 = vld [vmem:[%s11066_s4 + $0x8] sm:$0xff] }
 0x36b   : > { %v2440_v60 = vpop.f32.mrf.mxu3  ;;  %v2434_v29 = vadd.f32 %v2433_v54, %v2330_v15  ;;  %v8557_v15 = vld [vmem:[%s11066_s4 + $0x118] sm:$0xff] }
 0x36c   : > { %3009 = vmatpush.bf16.msrb.mxu2 %v8557_v15  ;;  %v8592_v15 = vld [vmem:[%s11066_s4 + $0x230] sm:$0xff] }
 0x370   : > { %v2331_v59 = vpop.f32.mrf.mxu2 }
 0x371   : > { %v2332_v18 = vadd.f32 %v2331_v59, %v2308_v37 }
 0x372   : > { %v9755_v55 = vpop.f32.mrf.mxu1 }
 0x373   : > { %v2628_v8 = vpop.f32.mrf.mxu3  ;;  %v2436_v54 = vadd.f32 %v9751_v53, %v2332_v18  ;;  %v8535_v18 = vld [vmem:[%s11066_s4 + $0x68] sm:$0xff] }
 0x378   : > { %v9757_v10 = vpop.f32.mrf.mxu2 }
 0x379   : > { %v2335_v59 = vadd.f32 %v9757_v10, %v9755_v55 }
 0x37a   : > { %v2313_v44 = vpop.f32.mrf.mxu1 }
 0x37b   : > { %v2630_v56 = vpop.f32.mrf.mxu3 }
 0x380   : > { %v2336_v42 = vpop.f32.mrf.mxu2 }
 0x381   : > { %v2439_v42 = vadd.f32 %v9753_v35, %v2335_v59  ;;  %v8538_v59 = vld [vmem:[%s11066_s4 + $0x80] sm:$0xff] }
 0x382   : > { %v2451_v57 = vpop.f32.mrf.mxu1 }
 0x383   : > { %v2633_v19 = vpop.f32.mrf.mxu3  ;;  %v2452_v13 = vadd.f32 %v2451_v57, %v2429_v9 }
 0x388   : > { %v2605_v61 = vpop.f32.mrf.mxu2 }
 0x389   : > { %v2629_v12 = vadd.f32 %v2628_v8, %v2605_v61 }
 0x38a   : > { %v2453_v5 = vpop.f32.mrf.mxu1 }
 0x38b   : > { %v2642_v63 = vadd.f32 %v2629_v12, %v2452_v13  ;;  %v2635_v28 = vpop.f32.mrf.mxu3  ;;  %v2454_v46 = vadd.f32 %v2453_v5, %v2431_v2 }
 0x38d   : > { %v2651_v11 = vadd.f32 %v9762_v1, %v2642_v63 }
 0x38f   : > { %vm2656_vm14 = vcmp.ge.f32.partialorder %v2651_v11, 0.0  ;;  %v2661_v45 = vmul.f32 0.3, %v2651_v11 }
 0x390   : > { %v2607_v14 = vpop.f32.mrf.mxu2 }
 0x391   : > { %v2666_v47 = vsel %vm2656_vm14, %v2651_v11, %v2661_v45  ;;  %v2631_v16 = vadd.f32 %v2630_v56, %v2607_v14 }
 0x392   : > { %2671 = vst.msk [vmem:[#allocation5] sm:$0xff] %vm2282_vm9, %v2666_v47  ;;  %v2456_v34 = vpop.f32.mrf.mxu1 }
 0x393   : > { %v2643_v25 = vadd.f32 %v2631_v16, %v2454_v46  ;;  %v2638_v0 = vpop.f32.mrf.mxu3  ;;  %v2457_v38 = vadd.f32 %v2456_v34, %v2434_v29  ;;  %v8549_v34 = vld [vmem:[%s11066_s4 + $0xd8] sm:$0xff]  ;;  %v8554_v29 = vld [vmem:[%s11066_s4 + $0x100] sm:$0xff] }
 0x394   : > { %2996 = vmatpush.bf16.msrb.mxu1 %v8549_v34  ;;  %v8584_v34 = vld [vmem:[%s11066_s4 + $0x1f0] sm:$0xff] }
 0x395   : > { %v2652_v58 = vadd.f32 %v9762_v1, %v2643_v25  ;;  %v8548_v25 = vld [vmem:[%s11066_s4 + $0xd0] sm:$0xff] }
 0x397   : > { %vm2657_vm14 = vcmp.ge.f32.partialorder %v2652_v58, 0.0  ;;  %v2662_v43 = vmul.f32 0.3, %v2652_v58 }
 0x398   : > { %v2610_v3 = vpop.f32.mrf.mxu2  ;;  %2997 = vmatpush.bf16.msrb.mxu1 %v8548_v25  ;;  %v8575_v25 = vld [vmem:[%s11066_s4 + $0x1a8] sm:$0xff] }
 0x399   : > { %v2667_v17 = vsel %vm2657_vm14, %v2652_v58, %v2662_v43  ;;  %v2634_v36 = vadd.f32 %v2633_v19, %v2610_v3  ;;  %v8564_v58 = vld [vmem:[%s11066_s4 + $0x150] sm:$0xff]  ;;  %v8546_v43 = vld [vmem:[%s11066_s4 + $0xc0] sm:$0xff]  ;;  %v8537_v3 = vld [vmem:[%s11066_s4 + $0x78] sm:$0xff] }
 0x39a   : > { %2672 = vst.msk [vmem:[#allocation5 + $0x8] sm:$0xff] %vm2282_vm9, %v2667_v17  ;;  %v2458_v7 = vpop.f32.mrf.mxu1  ;;  %v8528_v17 = vld [vmem:[%s11066_s4 + $0x30] sm:$0xff] }
 0x39b   : > { %v2644_v40 = vadd.f32 %v2634_v36, %v2457_v38  ;;  %v2640_v20 = vpop.f32.mrf.mxu3  ;;  %v2459_v37 = vadd.f32 %v2458_v7, %v2436_v54  ;;  %v8536_v38 = vld [vmem:[%s11066_s4 + $0x70] sm:$0xff]  ;;  %v8527_v7 = vld [vmem:[%s11066_s4 + $0x28] sm:$0xff] }
 0x39c   : > { %2998 = vmatpush.bf16.msrb.mxu1 %v8547_v22  ;;  %v8544_v36 = vld [vmem:[%s11066_s4 + $0xb0] sm:$0xff]  ;;  %v8526_v20 = vld [vmem:[%s11066_s4 + $0x20] sm:$0xff] }
 0x39d   : > { %v2653_v52 = vadd.f32 %v9762_v1, %v2644_v40  ;;  %v8543_v40 = vld [vmem:[%s11066_s4 + $0xa8] sm:$0xff] }
 0x39f   : > { %vm2658_vm14 = vcmp.ge.f32.partialorder %v2653_v52, 0.0  ;;  %v2663_v51 = vmul.f32 0.3, %v2653_v52 }
 0x3a0   : > { %v2612_v33 = vpop.f32.mrf.mxu2  ;;  %2999 = vmatpush.bf16.msrb.mxu1 %v8546_v43  ;;  %v8582_v43 = vld [vmem:[%s11066_s4 + $0x1e0] sm:$0xff] }
 0x3a1   : > { %v2668_v49 = vsel %vm2658_vm14, %v2653_v52, %v2663_v51  ;;  %v2636_v60 = vadd.f32 %v2635_v28, %v2612_v33  ;;  %v8533_v52 = vld [vmem:[%s11066_s4 + $0x58] sm:$0xff]  ;;  %v8540_v33 = vld [vmem:[%s11066_s4 + $0x90] sm:$0xff] }
 0x3a2   : > { %2673 = vst.msk [vmem:[#allocation5 + $0x10] sm:$0xff] %vm2282_vm9, %v2668_v49  ;;  %v2461_v53 = vpop.f32.mrf.mxu1  ;;  %v8541_v51 = vld [vmem:[%s11066_s4 + $0x98] sm:$0xff]  ;;  %v8531_v49 = vld [vmem:[%s11066_s4 + $0x48] sm:$0xff] }
 0x3a3   : > { %v2645_v8 = vadd.f32 %v2636_v60, %v2459_v37  ;;  %v2462_v19 = vadd.f32 %v2461_v53, %v2439_v42  ;;  %v8539_v37 = vld [vmem:[%s11066_s4 + $0x88] sm:$0xff]  ;;  %v8522_v60 = vld [vmem:[%s11066_s4] sm:$0xff] }
 0x3a4   : > { %3186 = vmatpush.bf16.msra.mxu1 %v8529_v32  ;;  %v8530_v53 = vld [vmem:[%s11066_s4 + $0x40] sm:$0xff] }
 0x3a5   : > { %v2654_v44 = vadd.f32 %v9762_v1, %v2645_v8 }
 0x3a7   : > { %vm2659_vm13 = vcmp.ge.f32.partialorder %v2654_v44, 0.0  ;;  %v2664_v56 = vmul.f32 0.3, %v2654_v44 }
 0x3a8   : > { %v2615_v57 = vpop.f32.mrf.mxu2  ;;  %3187 = vmatpush.bf16.msra.mxu1 %v8528_v17  ;;  %v8573_v17 = vld [vmem:[%s11066_s4 + $0x198] sm:$0xff] }
 0x3a9   : > { %v2669_v62 = vsel %vm2659_vm13, %v2654_v44, %v2664_v56  ;;  %v2639_v9 = vadd.f32 %v2638_v0, %v2615_v57  ;;  %v8556_v0 = vld [vmem:[%s11066_s4 + $0x110] sm:$0xff]  ;;  %vm11082_vm13 = vcmask 1042944  }
 0x3aa   : > { %2674 = vst.msk [vmem:[#allocation5 + $0x18] sm:$0xff] %vm2282_vm9, %v2669_v62  ;;  %v2463_v61 = vpop.f32.mrf.mxu1  ;;  %3010 = vmatpush.bf16.msrb.mxu2 %v8556_v0  ;;  %v8583_v0 = vld [vmem:[%s11066_s4 + $0x1e8] sm:$0xff] }
 0x3ab   : > { %v2646_v13 = vadd.f32 %v2639_v9, %v2462_v19 }
 0x3ac   : > { %3188 = vmatpush.bf16.msra.mxu1 %v8527_v7 }
 0x3ad   : > { %v2655_v55 = vadd.f32 %v9762_v1, %v2646_v13 }
 0x3ae   : > { %3011 = vmatpush.bf16.msrb.mxu2 %v8555_v23 }
 0x3af   : > { %vm2660_vm14 = vcmp.ge.f32.partialorder %v2655_v55, 0.0  ;;  %v2665_v10 = vmul.f32 0.3, %v2655_v55 }
 0x3b0   : > { %v2617_v12 = vpop.f32.mrf.mxu2  ;;  %3189 = vmatpush.bf16.msra.mxu1 %v8526_v20  ;;  %v8580_v20 = vld [vmem:[%s11066_s4 + $0x1d0] sm:$0xff] }
 0x3b1   : > { %v2670_v5 = vsel %vm2660_vm14, %v2655_v55, %v2665_v10  ;;  %v2708_v30 = vld [vmem:[#allocation5 + $0x5] ss:$6 sm:$0x3f]  ;;  %v2683_v11 = vld [vmem:[#allocation5 + $0x1] ss:$6 sm:$0x3f] }
 0x3b2   : > { %v2696_v63 = vld [vmem:[#allocation5 + $0x3] ss:$6 sm:$0x3f]  ;;  %2676 = vst.msk [vmem:[#allocation5 + $0x20] sm:$0x1] %vm2675_vm12, %v2670_v5  ;;  %v2709_v35 = vpack.c.bf16 %v2708_v30, %v2708_v30  ;;  %v2684_v45 = vpack.c.bf16 %v2683_v11, %v2683_v11  ;;  %3012 = vmatpush.bf16.msrb.mxu2 %v8554_v29 }
 0x3b3   : > { %v2697_v28 = vpack.c.bf16 %v2696_v63, %v2696_v63  ;;  %v2679_v2 = vld [vmem:[#allocation5] ss:$6 sm:$0x3f]  ;;  %v2704_v14 = vld [vmem:[#allocation5 + $0x4] ss:$6 sm:$0x3f] }
 0x3b4   : > { %2711 = vrot.lane.b32.xlu1 %v2709_v35, %s11078_s14  ;;  %v2680_v1 = vpack.c.bf16 %v2679_v2, %v2679_v2  ;;  %v2705_v47 = vpack.c.bf16 %v2704_v14, %v2704_v14  ;;  %5766 = vst.msk [vmem:[#allocation5 + $0x21] sm:$0x7] %vm2677_vm5, %v8886_v31  ;;  %2686 = vrot.lane.b32.xlu2 %v2684_v45, %s11078_s14  ;;  %v8565_v31 = vld [vmem:[%s11066_s4 + $0x158] sm:$0xff] }
 0x3b5   : > { %2699 = vrot.lane.b32.xlu0 %v2697_v28, %s11078_s14  ;;  %3022 = vmatpush.bf16.msrb.mxu3 %v8565_v31  ;;  %v8577_v2 = vld [vmem:[%s11066_s4 + $0x1b8] sm:$0xff]  ;;  %v8628_v31 = vld [vmem:[%s11064_s2 + $0x28] sm:$0xff] }
 0x3b6   : > { %2681 = vst.msk [vmem:[#allocation6] sm:$0x7] %vm2677_vm5, %v2680_v1  ;;  %3199 = vmatpush.bf16.msra.mxu2 %v8537_v3  ;;  %3190 = vmatpush.bf16.msra.mxu1 %v8525_v39  ;;  %v8585_v14 = vld [vmem:[%s11066_s4 + $0x1f8] sm:$0xff] }
 0x3b7   : > { %2706 = vst.msk [vmem:[#allocation6 + $0x8] sm:$0x7] %vm2677_vm5, %v2705_v47  ;;  %4565 = vmatpush.bf16.msra.mxu0 %v8628_v31 }
 0x3b9   : > { %v2692_v46 = vld [vmem:[#allocation5 + $0x2] ss:$6 sm:$0x3f]  ;;  %3023 = vmatpush.bf16.msrb.mxu3 %v8564_v58 }
 0x3ba   : > { %v2693_v16 = vpack.c.bf16 %v2692_v46, %v2692_v46  ;;  %3200 = vmatpush.bf16.msra.mxu2 %v8536_v38  ;;  %3191 = vmatpush.bf16.msra.mxu1 %v8524_v24  ;;  %v8593_v46 = vld [vmem:[%s11066_s4 + $0x238] sm:$0xff]  ;;  %v8591_v58 = vld [vmem:[%s11066_s4 + $0x228] sm:$0xff] }
 0x3bb   : > { %v8581_v38 = vld [vmem:[%s11066_s4 + $0x1d8] sm:$0xff] }
 0x3bc   : > { %2694 = vst.msk [vmem:[#allocation6 + $0x4] sm:$0x7] %vm2677_vm5, %v2693_v16  ;;  %v8576_v16 = vld [vmem:[%s11066_s4 + $0x1b0] sm:$0xff] }
 0x3bd   : > { %3024 = vmatpush.bf16.msrb.mxu3 %v8563_v26  ;;  %v8574_v26 = vld [vmem:[%s11066_s4 + $0x1a0] sm:$0xff] }
 0x3be   : > { %3201 = vmatpush.bf16.msra.mxu2 %v8535_v18  ;;  %3192 = vmatpush.bf16.msra.mxu1 %v8523_v6  ;;  %v8589_v18 = vld [vmem:[%s11066_s4 + $0x218] sm:$0xff]  ;;  %v8570_v6 = vld [vmem:[%s11066_s4 + $0x180] sm:$0xff] }
 0x3c1   : > { %3025 = vmatpush.bf16.msrb.mxu3 %v8562_v4  ;;  %v8590_v4 = vld [vmem:[%s11066_s4 + $0x220] sm:$0xff] }
 0x3c2   : > { %3202 = vmatpush.bf16.msra.mxu2 %v8534_v48  ;;  %3193 = vmatpush.bf16.msra.mxu1 %v8522_v60  ;;  %v8588_v48 = vld [vmem:[%s11066_s4 + $0x210] sm:$0xff] }
 0x3c5   : > { %3212 = vmatpush.bf16.msra.mxu3 %v8545_v21 }
 0x3c6   : > { %3203 = vmatpush.bf16.msra.mxu2 %v8533_v52  ;;  %v8571_v52 = vld [vmem:[%s11066_s4 + $0x188] sm:$0xff] }
 0x3c9   : > { %3213 = vmatpush.bf16.msra.mxu3 %v8544_v36 }
 0x3ca   : > { %3204 = vmatpush.bf16.msra.mxu2 %v8532_v50 }
 0x3cd   : > { %3214 = vmatpush.bf16.msra.mxu3 %v8543_v40  ;;  %v8572_v40 = vld [vmem:[%s11066_s4 + $0x190] sm:$0xff] }
 0x3ce   : > { %3205 = vmatpush.bf16.msra.mxu2 %v8531_v49  ;;  %v8578_v49 = vld [vmem:[%s11066_s4 + $0x1c0] sm:$0xff] }
 0x3d1   : > { %3215 = vmatpush.bf16.msra.mxu3 %v8542_v41 }
 0x3d2   : > { %3206 = vmatpush.bf16.msra.mxu2 %v8530_v53 }
 0x3d5   : > { %3216 = vmatpush.bf16.msra.mxu3 %v8541_v51  ;;  %v8579_v51 = vld [vmem:[%s11066_s4 + $0x1c8] sm:$0xff] }
 0x3d9   : > { %3217 = vmatpush.bf16.msra.mxu3 %v8540_v33 }
 0x3dd   : > { %3218 = vmatpush.bf16.msra.mxu3 %v8539_v37  ;;  %v8586_v37 = vld [vmem:[%s11066_s4 + $0x200] sm:$0xff] }
 0x3e1   : > { %3219 = vmatpush.bf16.msra.mxu3 %v8538_v59  ;;  %v8610_v59 = vld [vmem:[%s11063_s1 + $0x18] sm:$0xff] }
 0x40e   : > { %v2687_v54 = vpop.permute.xlu2 %2686 }
 0x40f   : > { %2690 = vst.msk [vmem:[#allocation6] sm:$0x7] %vm11082_vm13, %v2687_v54  ;;  %v8587_v54 = vld [vmem:[%s11066_s4 + $0x208] sm:$0xff] }
 0x426   : > { %v2712_v8 = vpop.permute.xlu1 %2711 }
 0x427   : > { %v2700_v44 = vpop.permute.xlu0 %2699  ;;  %2714 = vst.msk [vmem:[#allocation6 + $0x8] sm:$0x7] %vm11082_vm13, %v2712_v8 }
 0x428   : > { %2702 = vst.msk [vmem:[#allocation6 + $0x4] sm:$0x7] %vm11082_vm13, %v2700_v44  ;;  %v8608_v44 = vld [vmem:[%s11063_s1 + $0x8] sm:$0xff] }
 0x42e   : > { %v2766_v56 = vld [vmem:[#allocation6 + $0x8] sm:$0x7] }
 0x42f   : > { %v2765_v42 = vld [vmem:[#allocation6] sm:$0x77]  ;;  %v2820_v57 = vunpack.c.l.b16 %v2766_v56  ;;  %v2716_v22 = vld [vmem:[#allocation6 + $0x8] sm:$0x3]  ;;  %v8594_v56 = vld [vmem:[%s9005_s23 + $0x6c] sm:$0xff] }
 0x430   : > { %v2818_v62 = vunpack.c.l.b16 %v2765_v42  ;;  %v2819_v19 = vunpack.c.h.b16 %v2765_v42  ;;  %v2715_v23 = vld [vmem:[#allocation6] sm:$0x33]  ;;  %v3035_v29 = vunpack.c.l.b16 %v2716_v22  ;;  %v3226_v39 = vld [vmem:[#allocation6 + $0x8] sm:$0x6] }
 0x431   : > { %v2823_v9 = vpack.c.b16 %v2820_v57, %v2820_v57  ;;  %v3033_v32 = vunpack.c.l.b16 %v2715_v23  ;;  %v3034_v3 = vunpack.c.h.b16 %v2715_v23  ;;  %v3225_v41 = vld [vmem:[#allocation6] sm:$0x66]  ;;  %v3280_v33 = vunpack.c.l.b16 %v3226_v39  ;;  %v8598_v23 = vld [vmem:[%s9005_s23 + $0x8c] sm:$0xff] }
 0x432   : > { %v2821_v61 = vpack.c.b16 %v2818_v62, %v2818_v62  ;;  %v2822_v13 = vpack.c.b16 %v2819_v19, %v2819_v19  ;;  %v3038_v21 = vpack.c.b16 %v3035_v29, %v3035_v29  ;;  %v3278_v24 = vunpack.c.l.b16 %v3225_v41  ;;  %v8609_v62 = vld [vmem:[%s11063_s1 + $0x10] sm:$0xff]  ;;  %v8638_v22 = vld [vmem:[%s11064_s2 + $0x78] sm:$0xff] }
 0x433   : > { %v2841_v55 = vshll.u32 %v2823_v9, 16  ;;  %v2839_v5 = vshrl.u32 %v2823_v9, 16  ;;  %v3036_v36 = vpack.c.b16 %v3033_v32, %v3033_v32  ;;  %v3037_v7 = vpack.c.b16 %v3034_v3, %v3034_v3  ;;  %v8607_v9 = vld [vmem:[%s11063_s1] sm:$0xff]  ;;  %v8599_v3 = vld [vmem:[%s9005_s23 + $0x94] sm:$0xff] }
 0x434   : > { %v2827_v10 = vshll.u32 %v2821_v61, 16  ;;  %v2834_v12 = vshll.u32 %v2822_v13, 16  ;;  %v2825_v63 = vshrl.u32 %v2821_v61, 16  ;;  %v2832_v28 = vshrl.u32 %v2822_v13, 16  ;;  %v8640_v61 = vld [vmem:[%s11064_s2 + $0x88] sm:$0xff]  ;;  %v8595_v13 = vld [vmem:[%s9005_s23 + $0x74] sm:$0xff] }
 0x435   : > { %v2843_v30 = vrot.slane %v2841_v55, 1  ;;  %v3279_v50 = vunpack.c.h.b16 %v3225_v41  ;;  %v3281_v60 = vpack.c.b16 %v3278_v24, %v3278_v24  ;;  %v3283_v8 = vpack.c.b16 %v3280_v33, %v3280_v33  ;;  %v8601_v24 = vld [vmem:[%s9005_s23 + $0xa4] sm:$0xff] }
 0x436   : > { %v2829_v35 = vrot.slane %v2827_v10, 1  ;;  %v2836_v11 = vrot.slane %v2834_v12, 1  ;;  %v3587_v55 = vshll.u32 %v8594_v56, 16  ;;  %v3585_v10 = vshrl.u32 %v8594_v56, 16 }
 0x437   : > { %v2844_v45 = vor.u32 %v2843_v30, %v2839_v5  ;;  %v3282_v53 = vpack.c.b16 %v3279_v50, %v3279_v50  ;;  %v3284_v42 = vrot.slane %v3281_v60, 1  ;;  %v3286_v19 = vrot.slane %v3283_v8, 1 }
 0x438   : > { %v2830_v1 = vor.u32 %v2829_v35, %v2825_v63  ;;  %v2837_v47 = vor.u32 %v2836_v11, %v2832_v28  ;;  %v3589_v12 = vrot.slane %v3587_v55, 1  ;;  %v3592_v5 = vshll.u32 %v8595_v13, 16  ;;  %v8627_v28 = vld [vmem:[%s11064_s2 + $0x20] sm:$0xff] }
 0x439   : > { %3026 = vmatmul.bf16.vlgmr.msrb.gmra.mxu3 %v2844_v45  ;;  %v3285_v57 = vrot.slane %v3282_v53, 1  ;;  %v8639_v11 = vld [vmem:[%s11064_s2 + $0x80] sm:$0xff]  ;;  %4566 = vmatpush.bf16.msra.mxu0 %v8627_v28 }
 0x43a   : > { %3000 = vmatmul.bf16.vlgmr.msrb.gmra.mxu1 %v2830_v1  ;;  %3013 = vmatmul.bf16.vlgmr.msrb.gmra.mxu2 %v2837_v47  ;;  %v3590_v30 = vor.u32 %v3589_v12, %v3585_v10  ;;  %v3594_v63 = vrot.slane %v3592_v5, 1  ;;  %v8596_v45 = vld [vmem:[%s9005_s23 + $0x7c] sm:$0xff] }
 0x43b   : > { %3434 = vmatpush.bf16.msrb.mxu1 %v8577_v2  ;;  %3447 = vmatpush.bf16.msrb.mxu2 %v8585_v14  ;;  %v3596_v2 = vshrl.u32 %v8595_v13, 16  ;;  %v3600_v14 = vshll.u32 %v8596_v45, 16 }
 0x43c   : > { %3460 = vmatpush.bf16.msrb.mxu3 %v8593_v46  ;;  %v3595_v35 = vsel %vm442_vm1, %v3590_v30, %v3594_v63 }
 0x43d   : > { %v3598_v1 = vor.u32 %v3596_v2, %v3594_v63  ;;  %v3602_v47 = vrot.slane %v3600_v14, 1 }
 0x43f   : > { %3435 = vmatpush.bf16.msrb.mxu1 %v8576_v16  ;;  %3448 = vmatpush.bf16.msrb.mxu2 %v8584_v34  ;;  %v3603_v46 = vsel %vm442_vm1, %v3598_v1, %v3602_v47  ;;  %v8597_v16 = vld [vmem:[%s9005_s23 + $0x84] sm:$0xff]  ;;  %v3604_v34 = vshrl.u32 %v8596_v45, 16 }
 0x440   : > { %3461 = vmatpush.bf16.msrb.mxu3 %v8592_v15  ;;  %v3608_v15 = vshll.u32 %v8597_v16, 16 }
 0x441   : > { %v3606_v31 = vor.u32 %v3604_v34, %v3602_v47 }
 0x443   : > { %3436 = vmatpush.bf16.msrb.mxu1 %v8575_v25  ;;  %3449 = vmatpush.bf16.msrb.mxu2 %v8583_v0  ;;  %v3610_v25 = vrot.slane %v3608_v15, 1 }
 0x444   : > { %3462 = vmatpush.bf16.msrb.mxu3 %v8591_v58  ;;  %v8626_v58 = vld [vmem:[%s11064_s2 + $0x18] sm:$0xff] }
 0x445   : > { %v3611_v0 = vsel %vm442_vm1, %v3606_v31, %v3610_v25  ;;  %4567 = vmatpush.bf16.msra.mxu0 %v8626_v58  ;;  %v8814_v31 = vld [vmem:[%s11070_s8] ss:$0 sm:$0xff] }
 0x447   : > { %3437 = vmatpush.bf16.msrb.mxu1 %v8574_v26  ;;  %3450 = vmatpush.bf16.msrb.mxu2 %v8582_v43  ;;  %v3612_v26 = vshrl.u32 %v8597_v16, 16  ;;  %v3616_v43 = vshll.u32 %v8598_v23, 16 }
 0x448   : > { %3463 = vmatpush.bf16.msrb.mxu3 %v8590_v4 }
 0x449   : > { %3220 = vmatmul.bf16.vlgmr.msra.gmra.mxu3 %v3038_v21  ;;  %v3614_v29 = vor.u32 %v3612_v26, %v3610_v25  ;;  %v3618_v4 = vrot.slane %v3616_v43, 1  ;;  %v3620_v21 = vshrl.u32 %v8598_v23, 16  ;;  %v8624_v25 = vld [vmem:[%s11064_s2 + $0x8] sm:$0xff]  ;;  %v8623_v43 = vld [vmem:[%s11064_s2] sm:$0xff] }
 0x44a   : > { %3194 = vmatmul.bf16.vlgmr.msra.gmra.mxu1 %v3036_v36  ;;  %3207 = vmatmul.bf16.vlgmr.msra.gmra.mxu2 %v3037_v7 }
 0x44b   : > { %3438 = vmatpush.bf16.msrb.mxu1 %v8573_v17  ;;  %3451 = vmatpush.bf16.msrb.mxu2 %v8581_v38  ;;  %v3619_v32 = vsel %vm442_vm1, %v3614_v29, %v3618_v4  ;;  %v3624_v17 = vshll.u32 %v8599_v3, 16  ;;  %v3622_v38 = vor.u32 %v3620_v21, %v3618_v4  ;;  %v8634_v21 = vld [vmem:[%s11064_s2 + $0x58] sm:$0xff] }
 0x44c   : > { %3464 = vmatpush.bf16.msrb.mxu3 %v8589_v18  ;;  %v8600_v18 = vld [vmem:[%s9005_s23 + $0x9c] sm:$0xff] }
 0x44d   : > { %v3626_v36 = vrot.slane %v3624_v17, 1  ;;  %v8604_v17 = vld [vmem:[%s9005_s23 + $0xbc] sm:$0xff] }
 0x44f   : > { %3439 = vmatpush.bf16.msrb.mxu1 %v8572_v40  ;;  %3452 = vmatpush.bf16.msrb.mxu2 %v8580_v20  ;;  %v3627_v7 = vsel %vm442_vm1, %v3622_v38, %v3626_v36  ;;  %v3628_v40 = vshrl.u32 %v8599_v3, 16  ;;  %v3632_v20 = vshll.u32 %v8600_v18, 16  ;;  %v8633_v38 = vld [vmem:[%s11064_s2 + $0x50] sm:$0xff] }
 0x450   : > { %3465 = vmatpush.bf16.msrb.mxu3 %v8588_v48 }
 0x451   : > { %v3630_v48 = vor.u32 %v3628_v40, %v3626_v36  ;;  %v3634_v41 = vrot.slane %v3632_v20, 1  ;;  %v10112_v36 = vld [vmem:[%s11067_s5] ss:$0 sm:$0xff] }
 0x453   : > { %3440 = vmatpush.bf16.msrb.mxu1 %v8571_v52  ;;  %3453 = vmatpush.bf16.msrb.mxu2 %v8579_v51  ;;  %v3635_v52 = vsel %vm442_vm1, %v3630_v48, %v3634_v41  ;;  %v8625_v51 = vld [vmem:[%s11064_s2 + $0x10] sm:$0xff]  ;;  %v3664_v48 = vshll.u32 %v8604_v17, 16 }
 0x454   : > { %3466 = vmatpush.bf16.msrb.mxu3 %v8587_v54  ;;  %4568 = vmatpush.bf16.msra.mxu0 %v8625_v51  ;;  %v8637_v54 = vld [vmem:[%s11064_s2 + $0x70] sm:$0xff] }
 0x457   : > { %3441 = vmatpush.bf16.msrb.mxu1 %v8570_v6  ;;  %3454 = vmatpush.bf16.msrb.mxu2 %v8578_v49  ;;  %v3636_v49 = vshrl.u32 %v8600_v18, 16 }
 0x458   : > { %3467 = vmatpush.bf16.msrb.mxu3 %v8586_v37  ;;  %v3640_v37 = vshll.u32 %v8601_v24, 16  ;;  %4569 = vmatpush.bf16.msra.mxu0 %v8624_v25 }
 0x459   : > { %v3638_v60 = vor.u32 %v3636_v49, %v3634_v41  ;;  %v8632_v41 = vld [vmem:[%s11064_s2 + $0x48] sm:$0xff] }
 0x45a   : > { %3442 = vmatmul.bf16.vlgmr.msrb.gmra.mxu1 %v3284_v42  ;;  %3455 = vmatmul.bf16.vlgmr.msrb.gmra.mxu2 %v3285_v57  ;;  %v3642_v53 = vrot.slane %v3640_v37, 1  ;;  %v8602_v42 = vld [vmem:[%s9005_s23 + $0xac] sm:$0xff] }
 0x45b   : > { %3755 = vmatpush.bf16.msra.mxu1 %v8610_v59  ;;  %3873 = vmatpush.bf16.msra.mxu2 %v8608_v44 }
 0x45c   : > { %3468 = vmatmul.bf16.vlgmr.msrb.gmra.mxu3 %v3286_v19  ;;  %4570 = vmatpush.bf16.msra.mxu0 %v8623_v43 }
 0x45d   : > { %4423 = vmatpush.bf16.msra.mxu3 %v8634_v21 }
 0x45f   : > { %3756 = vmatpush.bf16.msra.mxu1 %v8609_v62  ;;  %3874 = vmatpush.bf16.msra.mxu2 %v8607_v9  ;;  %v3644_v9 = vshrl.u32 %v8601_v24, 16 }
 0x461   : > { %4424 = vmatpush.bf16.msra.mxu3 %v8633_v38 }
 0x463   : > { %4768 = vmatpush.bf16.msrb.mxu1 %v8640_v61  ;;  %v3648_v61 = vshll.u32 %v8602_v42, 16 }
 0x465   : > { %v3650_v55 = vrot.slane %v3648_v61, 1  ;;  %4425 = vmatpush.bf16.msra.mxu3 %v8632_v41  ;;  %v3668_v61 = vshrl.u32 %v8604_v17, 16 }
 0x467   : > { %4769 = vmatpush.bf16.msrb.mxu1 %v8639_v11  ;;  %v10077_v11 = vld [vmem:[%s9005_s23 + $0xb4] sm:$0xff] }
 0x468   : > { %v3660_v20 = vshrl.u32 %v10077_v11, 16 }
 0x46a   : > { %7616 = vmatmul.msk.bf16.vlgmr.msra.gmra.mxu1 %vm566_vm0, %v3595_v35  ;;  %7638 = vmatmul.msk.bf16.vlgmr.msra.gmra.mxu2 %vm566_vm0, %v8594_v56  ;;  %v3643_v56 = vsel %vm442_vm1, %v3638_v60, %v3642_v53 }
 0x46b   : > { %4770 = vmatpush.bf16.msrb.mxu1 %v8638_v22 }
 0x46f   : > { %4771 = vmatpush.bf16.msrb.mxu1 %v8637_v54  ;;  %v3666_v54 = vrot.slane %v3664_v48, 1 }
 0x47a   : > { %7617 = vmatmul.msk.bf16.gmra.mxu1 %vm566_vm0, %v3603_v46  ;;  %7639 = vmatmul.msk.bf16.gmra.mxu2 %vm566_vm0, %v8595_v13  ;;  %v3646_v13 = vor.u32 %v3644_v9, %v3642_v53  ;;  %v3652_v46 = vshrl.u32 %v8602_v42, 16  ;;  %v8630_v53 = vld [vmem:[%s11064_s2 + $0x38] sm:$0xff] }
 0x47c   : > { %v3651_v63 = vsel %vm442_vm1, %v3646_v13, %v3650_v55  ;;  %v3654_v58 = vor.u32 %v3652_v46, %v3650_v55 }
 0x48a   : > { %7618 = vmatmul.msk.bf16.gmra.mxu1 %vm566_vm0, %v3611_v0  ;;  %7640 = vmatmul.msk.bf16.gmra.mxu2 %vm566_vm0, %v8596_v45 }
 0x49a   : > { %7619 = vmatmul.msk.bf16.gmra.mxu1 %vm566_vm0, %v3619_v32  ;;  %7641 = vmatmul.msk.bf16.gmra.mxu2 %vm566_vm0, %v8597_v16  ;;  %v3656_v16 = vshll.u32 %v10077_v11, 16 }
 0x49c   : > { %v3658_v22 = vrot.slane %v3656_v16, 1 }
 0x49e   : > { %v3659_v32 = vsel %vm442_vm1, %v3654_v58, %v3658_v22  ;;  %v3662_v51 = vor.u32 %v3660_v20, %v3658_v22  ;;  %v8635_v58 = vld [vmem:[%s11064_s2 + $0x60] sm:$0xff] }
 0x4a0   : > { %v3667_v60 = vsel %vm442_vm1, %v3662_v51, %v3666_v54 }
 0x4aa   : > { %7620 = vmatmul.msk.bf16.gmra.mxu1 %vm566_vm0, %v3627_v7  ;;  %7642 = vmatmul.msk.bf16.gmra.mxu2 %vm566_vm0, %v8598_v23 }
 0x4b7   : > { %v3001_v39 = vpop.f32.mrf.mxu1 }
 0x4ba   : > { %7621 = vmatmul.msk.bf16.gmra.mxu1 %vm566_vm0, %v3635_v52  ;;  %7643 = vmatmul.msk.bf16.gmra.mxu2 %vm566_vm0, %v8599_v3  ;;  %v8636_v3 = vld [vmem:[%s11064_s2 + $0x68] sm:$0xff] }
 0x4bb   : > { %4772 = vmatpush.bf16.msrb.mxu1 %v8636_v3 }
 0x4bc   : > { %v3027_v50 = vpop.f32.mrf.mxu3 }
 0x4bd   : > { %v3014_v33 = vpop.f32.mrf.mxu2 }
 0x4be   : > { %v3015_v10 = vadd.f32 %v3014_v33, %v3001_v39 }
 0x4bf   : > { %v3003_v6 = vpop.f32.mrf.mxu1  ;;  %4773 = vmatpush.bf16.msrb.mxu1 %v8635_v58 }
 0x4c0   : > { %v3028_v35 = vadd.f32 %v3027_v50, %v3015_v10 }
 0x4c4   : > { %v3029_v59 = vpop.f32.mrf.mxu3 }
 0x4c5   : > { %v3016_v8 = vpop.f32.mrf.mxu2 }
 0x4c7   : > { %v3195_v44 = vpop.f32.mrf.mxu1 }
 0x4c8   : > { %v3196_v28 = vadd.f32 %v3195_v44, %v3028_v35  ;;  %v10132_v44 = vld [vmem:[%s9005_s23 + $0xc4] sm:$0xff] }
 0x4c9   : > { %v3672_v13 = vshll.u32 %v10132_v44, 16  ;;  %v3676_v25 = vshrl.u32 %v10132_v44, 16 }
 0x4ca   : > { %7622 = vmatmul.msk.bf16.gmra.mxu1 %vm566_vm0, %v3643_v56  ;;  %7644 = vmatmul.msk.bf16.gmra.mxu2 %vm566_vm0, %v8600_v18  ;;  %v8629_v56 = vld [vmem:[%s11064_s2 + $0x30] sm:$0xff] }
 0x4cc   : > { %v3221_v57 = vpop.f32.mrf.mxu3 }
 0x4cd   : > { %v3208_v62 = vpop.f32.mrf.mxu2 }
 0x4ce   : > { %v3209_v45 = vadd.f32 %v3208_v62, %v3196_v28 }
 0x4cf   : > { %v3197_v19 = vpop.f32.mrf.mxu1 }
 0x4d0   : > { %v3222_v34 = vadd.f32 %v3221_v57, %v3209_v45 }
 0x4d4   : > { %v3223_v12 = vpop.f32.mrf.mxu3 }
 0x4d5   : > { %v3210_v5 = vpop.f32.mrf.mxu2  ;;  %v3670_v12 = vor.u32 %v3668_v61, %v3666_v54 }
 0x4d6   : > { %v3674_v5 = vrot.slane %v3672_v13, 1 }
 0x4d7   : > { %v3443_v30 = vpop.f32.mrf.mxu1 }
 0x4d8   : > { %v3678_v43 = vor.u32 %v3676_v25, %v3674_v5 }
 0x4da   : > { %7623 = vmatmul.msk.bf16.gmra.mxu1 %vm566_vm0, %v3651_v63  ;;  %7645 = vmatmul.msk.bf16.gmra.mxu2 %vm566_vm0, %v8601_v24  ;;  %v8631_v24 = vld [vmem:[%s11064_s2 + $0x40] sm:$0xff] }
 0x4db   : > { %4426 = vmatpush.bf16.msra.mxu3 %v8631_v24 }
 0x4dd   : > { %v3456_v2 = vpop.f32.mrf.mxu2 }
 0x4de   : > { %v3457_v14 = vadd.f32 %v3456_v2, %v3443_v30  ;;  %v3675_v2 = vsel %vm442_vm1, %v3670_v12, %v3674_v5 }
 0x4df   : > { %v3469_v1 = vpop.f32.mrf.mxu3  ;;  %v3445_v47 = vpop.f32.mrf.mxu1  ;;  %4427 = vmatpush.bf16.msra.mxu3 %v8630_v53 }
 0x4e0   : > { %v3470_v15 = vadd.f32 %v3469_v1, %v3457_v14  ;;  %v10147_v47 = vld [vmem:[%s9005_s23 + $0xcc] sm:$0xff] }
 0x4e1   : > { %v3684_v53 = vshrl.u32 %v10147_v47, 16 }
 0x4e2   : > { %v3473_v0 = vadd.f32 %v3470_v15, %v3222_v34 }
 0x4e3   : > { %4428 = vmatpush.bf16.msra.mxu3 %v8629_v56 }
 0x4e4   : > { %v3478_v23 = vadd.f32 %v8814_v31, %v3473_v0  ;;  %v3680_v0 = vshll.u32 %v10147_v47, 16 }
 0x4e5   : > { %v3458_v26 = vpop.f32.mrf.mxu2 }
 0x4e6   : > { %3479 = vst.msk [vmem:[%s10092_s28] sm:$0xf] %vm1895_vm8, %v3478_v23 }
 0x4e7   : > { %v3471_v29 = vpop.f32.mrf.mxu3  ;;  %v3758_v4 = vpop.f32.mrf.mxu1 }
 0x4e8   : > { %v3682_v29 = vrot.slane %v3680_v0, 1 }
 0x4ea   : > { %7624 = vmatmul.msk.bf16.gmra.mxu1 %vm566_vm0, %v3659_v32  ;;  %7646 = vmatmul.msk.bf16.gmra.mxu2 %vm566_vm0, %v8602_v42  ;;  %v7551_v32 = vld [vmem:[%s9005_s23 + $0xd4] sm:$0x7]  ;;  %v3686_v56 = vor.u32 %v3684_v53, %v3682_v29  ;;  %s11102_s23 = sand.u32 1, %s8873_s10  }
 0x4eb   : > { %v3569_v20 = vunpack.c.l.b16 %v7551_v32  ;;  %s6562_s22 = scalar_lea.sflag [#allocation8], %s11102_s23 }
 0x4ed   : > { %v3876_v7 = vpop.f32.mrf.mxu2  ;;  %v3583_v24 = vpack.c.b16 %v3569_v20, %v3569_v20 }
 0x4ee   : > { %v3877_v18 = vadd.f32 %v3876_v7, %v3758_v4 }
 0x4ef   : > { %v3760_v40 = vpop.f32.mrf.mxu1 }
 0x4f0   : > { %v3949_v39 = vadd.f32 %v10112_v36, %v3877_v18 }
 0x4f2   : > { %vm3976_vm14 = vcmp.ge.f32.partialorder %v3949_v39, 0.0  ;;  %v4003_v52 = vmul.f32 0.3, %v3949_v39 }
 0x4f4   : > { %v4030_v50 = vsel %vm3976_vm14, %v3949_v39, %v4003_v52 }
 0x4f5   : > { %v4057_v33 = vpack.c.bf16 %v4030_v50, %v4030_v50  ;;  %v3878_v6 = vpop.f32.mrf.mxu2 }
 0x4f6   : > { %v3879_v49 = vadd.f32 %v3878_v6, %v3760_v40  ;;  %v3683_v40 = vsel %vm442_vm1, %v3678_v43, %v3682_v29 }
 0x4f7   : > { %4084 = vst.msk [vmem:[#allocation2] sm:$0xf] %vm944_vm3, %v4057_v33  ;;  %v3763_v37 = vpop.f32.mrf.mxu1 }
 0x4f8   : > { %v3950_v59 = vadd.f32 %v10112_v36, %v3879_v49 }
 0x4fa   : > { %vm3977_vm13 = vcmp.ge.f32.partialorder %v3950_v59, 0.0  ;;  %v4004_v8 = vmul.f32 0.3, %v3950_v59  ;;  %7625 = vmatmul.msk.bf16.gmra.mxu1 %vm566_vm0, %v3667_v60  ;;  %7647 = vmatmul.msk.bf16.gmra.mxu2 %vm566_vm0, %v10077_v11 }
 0x4fc   : > { %v4031_v42 = vsel %vm3977_vm13, %v3950_v59, %v4004_v8  ;;  %v3688_v59 = vshll.u32 %v3583_v24, 16 }
 0x4fd   : > { %v4058_v57 = vpack.c.bf16 %v4031_v42, %v4031_v42  ;;  %v3881_v62 = vpop.f32.mrf.mxu2 }
 0x4fe   : > { %v3882_v19 = vadd.f32 %v3881_v62, %v3763_v37  ;;  %v3690_v42 = vrot.slane %v3688_v59, 1 }
 0x4ff   : > { %4085 = vst.msk [vmem:[#allocation2 + $0x4] sm:$0xf] %vm944_vm3, %v4058_v57  ;;  %v3765_v9 = vpop.f32.mrf.mxu1 }
 0x500   : > { %v3951_v55 = vadd.f32 %v10112_v36, %v3882_v19 }
 0x502   : > { %vm3978_vm14 = vcmp.ge.f32.partialorder %v3951_v55, 0.0  ;;  %v4005_v10 = vmul.f32 0.3, %v3951_v55 }
 0x504   : > { %v4032_v30 = vsel %vm3978_vm14, %v3951_v55, %v4005_v10  ;;  %v3691_v55 = vsel %vm442_vm1, %v3686_v56, %v3690_v42 }
 0x505   : > { %v4059_v63 = vpack.c.bf16 %v4032_v30, %v4032_v30  ;;  %v3883_v35 = vpop.f32.mrf.mxu2 }
 0x506   : > { %v3884_v28 = vadd.f32 %v3883_v35, %v3765_v9  ;;  %v8757_v11 = vld [vmem:[#allocation2] sm:$0xff]  }
 0x507   : > { %4086 = vst.msk [vmem:[#allocation2 + $0x8] sm:$0xf] %vm944_vm3, %v4059_v63  ;;  %v3768_v45 = vpop.f32.mrf.mxu1  ;;  %7774 = vmatmul.msk.bf16.vlgmr.msra.gmra.mxu0 %vm1244_vm6, %v8757_v11  ;;  %v4235_v23 = vshll.u32 %v8757_v11, 16  ;;  %v4233_v48 = vshrl.u32 %v8757_v11, 16 }
 0x508   : > { %v3952_v14 = vadd.f32 %v10112_v36, %v3884_v28 }
 0x50a   : > { %vm3979_vm13 = vcmp.ge.f32.partialorder %v3952_v14, 0.0  ;;  %v4006_v1 = vmul.f32 0.3, %v3952_v14  ;;  %7626 = vmatmul.msk.bf16.gmra.mxu1 %vm566_vm0, %v3675_v2  ;;  %7648 = vmatmul.msk.bf16.gmra.mxu2 %vm566_vm0, %v8604_v17  ;;  %v4237_v17 = vrot.slane %v4235_v23, 1 }
 0x50c   : > { %v4033_v46 = vsel %vm3979_vm13, %v3952_v14, %v4006_v1  ;;  %v4238_v52 = vor.u32 %v4237_v17, %v4233_v48  ;;  %v8763_v48 = vld [vmem:[#allocation2] sm:$0xf0] }
 0x50d   : > { %v4060_v16 = vpack.c.bf16 %v4033_v46, %v4033_v46  ;;  %v3886_v34 = vpop.f32.mrf.mxu2 }
 0x50e   : > { %v3887_v15 = vadd.f32 %v3886_v34, %v3768_v45  ;;  %v3692_v34 = vshrl.u32 %v3583_v24, 16 }
 0x50f   : > { %4087 = vst.msk [vmem:[#allocation2 + $0xc] sm:$0xf] %vm944_vm3, %v4060_v16  ;;  %v3770_v31 = vpop.f32.mrf.mxu1 }
 0x510   : > { %v3953_v22 = vadd.f32 %v10112_v36, %v3887_v15  ;;  %v3694_v58 = vor.u32 %v3692_v34, %v3690_v42 }
 0x512   : > { %vm3980_vm14 = vcmp.ge.f32.partialorder %v3953_v22, 0.0  ;;  %v4007_v26 = vmul.f32 0.3, %v3953_v22 }
 0x514   : > { %v4034_v4 = vsel %vm3980_vm14, %v3953_v22, %v4007_v26 }
 0x515   : > { %v4061_v3 = vpack.c.bf16 %v4034_v4, %v4034_v4  ;;  %v3888_v21 = vpop.f32.mrf.mxu2 }
 0x516   : > { %v3889_v38 = vadd.f32 %v3888_v21, %v3770_v31  ;;  %v10157_v7 = vld [vmem:[#allocation2 + $0x8] sm:$0xff] }
 0x517   : > { %4088 = vst.msk [vmem:[#allocation2 + $0x10] sm:$0xf] %vm944_vm3, %v4061_v3  ;;  %v3773_v18 = vpop.f32.mrf.mxu1  ;;  %7775 = vmatmul.msk.bf16.gmra.mxu0 %vm1244_vm6, %v10157_v7  ;;  %v4240_v39 = vshll.u32 %v10157_v7, 16  ;;  %v4244_v12 = vshrl.u32 %v10157_v7, 16 }
 0x518   : > { %v3954_v41 = vadd.f32 %v10112_v36, %v3889_v38 }
 0x519   : > { %v4242_v54 = vrot.slane %v4240_v39, 1  ;;  %v8764_v39 = vld [vmem:[#allocation2] sm:$0xe] }
 0x51a   : > { %vm3981_vm13 = vcmp.ge.f32.partialorder %v3954_v41, 0.0  ;;  %v4008_v51 = vmul.f32 0.3, %v3954_v41  ;;  %7627 = vmatmul.msk.bf16.gmra.mxu1 %vm566_vm0, %v3683_v40  ;;  %7649 = vmatmul.msk.bf16.gmra.mxu2 %vm566_vm0, %v10132_v44 }
 0x51b   : > { %v4243_v33 = vsel %vm442_vm1, %v4238_v52, %v4242_v54  ;;  %v4246_v63 = vor.u32 %v4244_v12, %v4242_v54  ;;  %v8765_v52 = vor.u32 %v8764_v39, %v8763_v48 }
 0x51c   : > { %v4035_v50 = vsel %vm3981_vm13, %v3954_v41, %v4008_v51  ;;  %7736 = vmatmul.msk.bf16.vlgmr.msra.gmra.mxu3 %vm1244_vm6, %v4243_v33 }
 0x51d   : > { %v4062_v6 = vpack.c.bf16 %v4035_v50, %v4035_v50  ;;  %v3891_v49 = vpop.f32.mrf.mxu2  ;;  %v4662_v50 = vrot.slane %v10157_v7, 1 }
 0x51e   : > { %v3892_v37 = vadd.f32 %v3891_v49, %v3773_v18 }
 0x51f   : > { %4089 = vst.msk [vmem:[#allocation2 + $0x14] sm:$0xf] %vm944_vm3, %v4062_v6  ;;  %v3775_v60 = vpop.f32.mrf.mxu1 }
 0x520   : > { %v3955_v8 = vadd.f32 %v10112_v36, %v3892_v37  ;;  %v4661_v37 = vrot.slane %v8765_v52, 1 }
 0x522   : > { %vm3982_vm14 = vcmp.ge.f32.partialorder %v3955_v8, 0.0  ;;  %v4009_v44 = vmul.f32 0.3, %v3955_v8 }
 0x524   : > { %v4036_v57 = vsel %vm3982_vm14, %v3955_v8, %v4009_v44  ;;  %v4663_v8 = vsel %vm1528_vm2, %v4661_v37, %v4662_v50 }
 0x525   : > { %v4063_v62 = vpack.c.bf16 %v4036_v57, %v4036_v57  ;;  %v3893_v19 = vpop.f32.mrf.mxu2 }
 0x526   : > { %v3894_v9 = vadd.f32 %v3893_v19, %v3775_v60  ;;  %v10173_v61 = vld [vmem:[#allocation2 + $0x10] sm:$0xff] }
 0x527   : > { %4090 = vst.msk [vmem:[#allocation2 + $0x18] sm:$0xf] %vm944_vm3, %v4063_v62  ;;  %v3778_v13 = vpop.f32.mrf.mxu1  ;;  %7776 = vmatmul.msk.bf16.gmra.mxu0 %vm1244_vm6, %v10173_v61  ;;  %v4248_v5 = vshll.u32 %v10173_v61, 16  ;;  %v4252_v26 = vshrl.u32 %v10173_v61, 16 }
 0x528   : > { %v3956_v10 = vadd.f32 %v10112_v36, %v3894_v9 }
 0x529   : > { %v4250_v35 = vrot.slane %v4248_v5, 1 }
 0x52a   : > { %vm3983_vm13 = vcmp.ge.f32.partialorder %v3956_v10, 0.0  ;;  %v4010_v30 = vmul.f32 0.3, %v3956_v10  ;;  %7628 = vmatmul.msk.bf16.gmra.mxu1 %vm566_vm0, %v3691_v55  ;;  %7650 = vmatmul.msk.bf16.gmra.mxu2 %vm566_vm0, %v10147_v47 }
 0x52b   : > { %v4251_v11 = vsel %vm442_vm1, %v4246_v63, %v4250_v35  ;;  %v4254_v4 = vor.u32 %v4252_v26, %v4250_v35  ;;  %v4664_v63 = vrot.slane %v10173_v61, 1 }
 0x52c   : > { %v4037_v28 = vsel %vm3983_vm13, %v3956_v10, %v4010_v30  ;;  %7737 = vmatmul.msk.bf16.gmra.mxu3 %vm1244_vm6, %v4251_v11 }
 0x52d   : > { %v4064_v45 = vpack.c.bf16 %v4037_v28, %v4037_v28  ;;  %v3896_v2 = vpop.f32.mrf.mxu2 }
 0x52e   : > { %v3897_v14 = vadd.f32 %v3896_v2, %v3778_v13 }
 0x52f   : > { %4091 = vst.msk [vmem:[#allocation2 + $0x1c] sm:$0xf] %vm944_vm3, %v4064_v45  ;;  %v3780_v1 = vpop.f32.mrf.mxu1 }
 0x530   : > { %v3957_v46 = vadd.f32 %v10112_v36, %v3897_v14 }
 0x532   : > { %vm3984_vm14 = vcmp.ge.f32.partialorder %v3957_v46, 0.0  ;;  %v4011_v16 = vmul.f32 0.3, %v3957_v46 }
 0x534   : > { %v4038_v15 = vsel %vm3984_vm14, %v3957_v46, %v4011_v16 }
 0x535   : > { %v4065_v47 = vpack.c.bf16 %v4038_v15, %v4038_v15  ;;  %v3898_v31 = vpop.f32.mrf.mxu2 }
 0x536   : > { %v3899_v25 = vadd.f32 %v3898_v31, %v3780_v1  ;;  %v10189_v0 = vld [vmem:[#allocation2 + $0x18] sm:$0xff]  ;;  %v4665_v1 = vsel %vm1528_vm2, %v4662_v50, %v4664_v63 }
 0x537   : > { %4092 = vst.msk [vmem:[#allocation2 + $0x20] sm:$0xf] %vm944_vm3, %v4065_v47  ;;  %v3783_v22 = vpop.f32.mrf.mxu1  ;;  %7777 = vmatmul.msk.bf16.gmra.mxu0 %vm1244_vm6, %v10189_v0  ;;  %v4256_v43 = vshll.u32 %v10189_v0, 16  ;;  %v4260_v53 = vshrl.u32 %v10189_v0, 16 }
 0x538   : > { %v3958_v23 = vadd.f32 %v10112_v36, %v3899_v25 }
 0x539   : > { %v4258_v32 = vrot.slane %v4256_v43, 1 }
 0x53a   : > { %vm3985_vm13 = vcmp.ge.f32.partialorder %v3958_v23, 0.0  ;;  %v4012_v29 = vmul.f32 0.3, %v3958_v23  ;;  %7629 = vmatmul.msk.bf16.gmra.mxu1 %vm566_vm0, %v3694_v58  ;;  %7651 = vmatmul.msk.bf16.gmra.mxu2 %vm566_vm0, %v3583_v24 }
 0x53b   : > { %v4259_v21 = vsel %vm442_vm1, %v4254_v4, %v4258_v32  ;;  %v4262_v44 = vor.u32 %v4260_v53, %v4258_v32  ;;  %v4666_v4 = vrot.slane %v10189_v0, 1 }
 0x53c   : > { %v4039_v3 = vsel %vm3985_vm13, %v3958_v23, %v4012_v29  ;;  %7738 = vmatmul.msk.bf16.gmra.mxu3 %vm1244_vm6, %v4259_v21 }
 0x53d   : > { %v4066_v17 = vpack.c.bf16 %v4039_v3, %v4039_v3  ;;  %v3901_v38 = vpop.f32.mrf.mxu2 }
 0x53e   : > { %v3902_v18 = vadd.f32 %v3901_v38, %v3783_v22 }
 0x53f   : > { %4093 = vst.msk [vmem:[#allocation2 + $0x24] sm:$0xf] %vm944_vm3, %v4066_v17  ;;  %v3785_v40 = vpop.f32.mrf.mxu1 }
 0x540   : > { %v3959_v20 = vadd.f32 %v10112_v36, %v3902_v18 }
 0x542   : > { %vm3986_vm14 = vcmp.ge.f32.partialorder %v3959_v20, 0.0  ;;  %v4013_v41 = vmul.f32 0.3, %v3959_v20 }
 0x544   : > { %v4040_v51 = vsel %vm3986_vm14, %v3959_v20, %v4013_v41 }
 0x545   : > { %v4067_v54 = vpack.c.bf16 %v4040_v51, %v4040_v51  ;;  %v3903_v24 = vpop.f32.mrf.mxu2 }
 0x546   : > { %v3904_v33 = vadd.f32 %v3903_v24, %v3785_v40  ;;  %v10204_v6 = vld [vmem:[#allocation2 + $0x20] sm:$0xff]  ;;  %v4667_v40 = vsel %vm1528_vm2, %v4664_v63, %v4666_v4 }
 0x547   : > { %4094 = vst.msk [vmem:[#allocation2 + $0x28] sm:$0xf] %vm944_vm3, %v4067_v54  ;;  %v3788_v49 = vpop.f32.mrf.mxu1  ;;  %7778 = vmatmul.msk.bf16.gmra.mxu0 %vm1244_vm6, %v10204_v6  ;;  %v4264_v59 = vshll.u32 %v10204_v6, 16  ;;  %v4268_v2 = vshrl.u32 %v10204_v6, 16  ;;  %v4668_v53 = vrot.slane %v10204_v6, 1 }
 0x548   : > { %v3960_v60 = vadd.f32 %v10112_v36, %v3904_v33 }
 0x549   : > { %v4266_v56 = vrot.slane %v4264_v59, 1 }
 0x54a   : > { %vm3987_vm13 = vcmp.ge.f32.partialorder %v3960_v60, 0.0  ;;  %v4014_v7 = vmul.f32 0.3, %v3960_v60  ;;  %7824 = vmatmul.msk.bf16.vlgmr.msrb.gmra.mxu1 %vm1244_vm6, %v4663_v8 }
 0x54b   : > { %v4267_v57 = vsel %vm442_vm1, %v4262_v44, %v4266_v56  ;;  %v4270_v61 = vor.u32 %v4268_v2, %v4266_v56 }
 0x54c   : > { %v4041_v42 = vsel %vm3987_vm13, %v3960_v60, %v4014_v7  ;;  %7739 = vmatmul.msk.bf16.gmra.mxu3 %vm1244_vm6, %v4267_v57  ;;  %v4669_v57 = vsel %vm1528_vm2, %v4666_v4, %v4668_v53 }
 0x54d   : > { %v4068_v62 = vpack.c.bf16 %v4041_v42, %v4041_v42  ;;  %v3906_v19 = vpop.f32.mrf.mxu2 }
 0x54e   : > { %v3907_v9 = vadd.f32 %v3906_v19, %v3788_v49 }
 0x54f   : > { %4095 = vst.msk [vmem:[#allocation2 + $0x2c] sm:$0xf] %vm944_vm3, %v4068_v62  ;;  %v3790_v13 = vpop.f32.mrf.mxu1 }
 0x550   : > { %v3961_v55 = vadd.f32 %v10112_v36, %v3907_v9 }
 0x552   : > { %vm3988_vm14 = vcmp.ge.f32.partialorder %v3961_v55, 0.0  ;;  %v4015_v10 = vmul.f32 0.3, %v3961_v55 }
 0x554   : > { %v4042_v12 = vsel %vm3988_vm14, %v3961_v55, %v4015_v10 }
 0x555   : > { %v4069_v5 = vpack.c.bf16 %v4042_v12, %v4042_v12  ;;  %v3908_v30 = vpop.f32.mrf.mxu2 }
 0x556   : > { %v3909_v35 = vadd.f32 %v3908_v30, %v3790_v13  ;;  %v10219_v28 = vld [vmem:[#allocation2 + $0x28] sm:$0xff] }
 0x557   : > { %4096 = vst.msk [vmem:[#allocation2 + $0x30] sm:$0xf] %vm944_vm3, %v4069_v5  ;;  %v3793_v11 = vpop.f32.mrf.mxu1  ;;  %7779 = vmatmul.msk.bf16.gmra.mxu0 %vm1244_vm6, %v10219_v28  ;;  %v4272_v14 = vshll.u32 %v10219_v28, 16  ;;  %v4276_v38 = vshrl.u32 %v10219_v28, 16 }
 0x558   : > { %v3962_v45 = vadd.f32 %v10112_v36, %v3909_v35 }
 0x559   : > { %v4274_v16 = vrot.slane %v4272_v14, 1  ;;  %v4670_v14 = vrot.slane %v10219_v28, 1 }
 0x55a   : > { %vm3989_vm13 = vcmp.ge.f32.partialorder %v3962_v45, 0.0  ;;  %v4016_v46 = vmul.f32 0.3, %v3962_v45  ;;  %7825 = vmatmul.msk.bf16.gmra.mxu1 %vm1244_vm6, %v4665_v1 }
 0x55b   : > { %v4275_v15 = vsel %vm442_vm1, %v4270_v61, %v4274_v16  ;;  %v4278_v0 = vor.u32 %v4276_v38, %v4274_v16 }
 0x55c   : > { %v4043_v34 = vsel %vm3989_vm13, %v3962_v45, %v4016_v46  ;;  %7740 = vmatmul.msk.bf16.gmra.mxu3 %vm1244_vm6, %v4275_v15 }
 0x55d   : > { %v4070_v47 = vpack.c.bf16 %v4043_v34, %v4043_v34  ;;  %v3911_v31 = vpop.f32.mrf.mxu2 }
 0x55e   : > { %v3912_v25 = vadd.f32 %v3911_v31, %v3793_v11 }
 0x55f   : > { %4097 = vst.msk [vmem:[#allocation2 + $0x34] sm:$0xf] %vm944_vm3, %v4070_v47  ;;  %v3795_v58 = vpop.f32.mrf.mxu1  ;;  %v4671_v47 = vsel %vm1528_vm2, %v4668_v53, %v4670_v14 }
 0x560   : > { %v3963_v22 = vadd.f32 %v10112_v36, %v3912_v25 }
 0x562   : > { %vm3990_vm14 = vcmp.ge.f32.partialorder %v3963_v22, 0.0  ;;  %v4017_v23 = vmul.f32 0.3, %v3963_v22 }
 0x564   : > { %v4044_v26 = vsel %vm3990_vm14, %v3963_v22, %v4017_v23 }
 0x565   : > { %v4071_v43 = vpack.c.bf16 %v4044_v26, %v4044_v26  ;;  %v3913_v29 = vpop.f32.mrf.mxu2 }
 0x566   : > { %v3914_v32 = vadd.f32 %v3913_v29, %v3795_v58  ;;  %v10234_v3 = vld [vmem:[#allocation2 + $0x30] sm:$0xff] }
 0x567   : > { %4098 = vst.msk [vmem:[#allocation2 + $0x38] sm:$0xf] %vm944_vm3, %v4071_v43  ;;  %v3798_v21 = vpop.f32.mrf.mxu1  ;;  %7780 = vmatmul.msk.bf16.gmra.mxu0 %vm1244_vm6, %v10234_v3  ;;  %v4280_v18 = vshll.u32 %v10234_v3, 16  ;;  %v4284_v56 = vshrl.u32 %v10234_v3, 16 }
 0x568   : > { %v3964_v17 = vadd.f32 %v10112_v36, %v3914_v32 }
 0x569   : > { %v4282_v48 = vrot.slane %v4280_v18, 1 }
 0x56a   : > { %vm3991_vm13 = vcmp.ge.f32.partialorder %v3964_v17, 0.0  ;;  %v4018_v20 = vmul.f32 0.3, %v3964_v17  ;;  %7826 = vmatmul.msk.bf16.gmra.mxu1 %vm1244_vm6, %v4667_v40 }
 0x56b   : > { %v4283_v39 = vsel %vm442_vm1, %v4278_v0, %v4282_v48  ;;  %v4286_v6 = vor.u32 %v4284_v56, %v4282_v48 }
 0x56c   : > { %v4045_v41 = vsel %vm3991_vm13, %v3964_v17, %v4018_v20  ;;  %7741 = vmatmul.msk.bf16.gmra.mxu3 %vm1244_vm6, %v4283_v39  ;;  %v4672_v20 = vrot.slane %v10234_v3, 1 }
 0x56d   : > { %v4072_v52 = vpack.c.bf16 %v4045_v41, %v4045_v41  ;;  %v3916_v51 = vpop.f32.mrf.mxu2 }
 0x56e   : > { %v3917_v54 = vadd.f32 %v3916_v51, %v3798_v21 }
 0x56f   : > { %4099 = vst.msk [vmem:[#allocation2 + $0x3c] sm:$0xf] %vm944_vm3, %v4072_v52  ;;  %v3800_v24 = vpop.f32.mrf.mxu1 }
 0x570   : > { %v3965_v50 = vadd.f32 %v10112_v36, %v3917_v54  ;;  %v4673_v54 = vsel %vm1528_vm2, %v4670_v14, %v4672_v20 }
 0x572   : > { %vm3992_vm14 = vcmp.ge.f32.partialorder %v3965_v50, 0.0  ;;  %v4019_v33 = vmul.f32 0.3, %v3965_v50 }
 0x574   : > { %v4046_v49 = vsel %vm3992_vm14, %v3965_v50, %v4019_v33 }
 0x575   : > { %v4073_v37 = vpack.c.bf16 %v4046_v49, %v4046_v49  ;;  %v3918_v60 = vpop.f32.mrf.mxu2 }
 0x576   : > { %v3919_v59 = vadd.f32 %v3918_v60, %v3800_v24  ;;  %v10249_v8 = vld [vmem:[#allocation2 + $0x38] sm:$0xff] }
 0x577   : > { %4100 = vst.msk [vmem:[#allocation2 + $0x40] sm:$0xf] %vm944_vm3, %v4073_v37  ;;  %v3803_v7 = vpop.f32.mrf.mxu1  ;;  %7781 = vmatmul.msk.bf16.gmra.mxu0 %vm1244_vm6, %v10249_v8  ;;  %v4288_v42 = vshll.u32 %v10249_v8, 16  ;;  %v4292_v34 = vshrl.u32 %v10249_v8, 16 }
 0x578   : > { %v3966_v44 = vadd.f32 %v10112_v36, %v3919_v59 }
 0x579   : > { %v4290_v19 = vrot.slane %v4288_v42, 1 }
 0x57a   : > { %vm3993_vm13 = vcmp.ge.f32.partialorder %v3966_v44, 0.0  ;;  %v4020_v62 = vmul.f32 0.3, %v3966_v44  ;;  %7827 = vmatmul.msk.bf16.gmra.mxu1 %vm1244_vm6, %v4669_v57 }
 0x57b   : > { %v4291_v13 = vsel %vm442_vm1, %v4286_v6, %v4290_v19  ;;  %v4294_v28 = vor.u32 %v4292_v34, %v4290_v19 }
 0x57c   : > { %v4047_v9 = vsel %vm3993_vm13, %v3966_v44, %v4020_v62  ;;  %7742 = vmatmul.msk.bf16.gmra.mxu3 %vm1244_vm6, %v4291_v13 }
 0x57d   : > { %v4074_v55 = vpack.c.bf16 %v4047_v9, %v4047_v9  ;;  %v3921_v10 = vpop.f32.mrf.mxu2  ;;  %v4674_v9 = vrot.slane %v10249_v8, 1 }
 0x57e   : > { %v3922_v12 = vadd.f32 %v3921_v10, %v3803_v7 }
 0x57f   : > { %4101 = vst.msk [vmem:[#allocation2 + $0x44] sm:$0xf] %vm944_vm3, %v4074_v55  ;;  %v3805_v5 = vpop.f32.mrf.mxu1 }
 0x580   : > { %v3967_v30 = vadd.f32 %v10112_v36, %v3922_v12 }
 0x582   : > { %vm3994_vm14 = vcmp.ge.f32.partialorder %v3967_v30, 0.0  ;;  %v4021_v63 = vmul.f32 0.3, %v3967_v30 }
 0x584   : > { %v4048_v35 = vsel %vm3994_vm14, %v3967_v30, %v4021_v63  ;;  %v10263_v11 = vpop.f32.mrf.mxu0 }
 0x585   : > { %v4075_v45 = vpack.c.bf16 %v4048_v35, %v4048_v35  ;;  %v3923_v2 = vpop.f32.mrf.mxu2  ;;  %v4675_v35 = vsel %vm1528_vm2, %v4672_v20, %v4674_v9 }
 0x586   : > { %v3924_v1 = vadd.f32 %v3923_v2, %v3805_v5  ;;  %v10266_v46 = vld [vmem:[#allocation2 + $0x40] sm:$0xff] }
 0x587   : > { %4102 = vst.msk [vmem:[#allocation2 + $0x48] sm:$0xf] %vm944_vm3, %v4075_v45  ;;  %v3808_v61 = vpop.f32.mrf.mxu1  ;;  %7782 = vmatmul.msk.bf16.gmra.mxu0 %vm1244_vm6, %v10266_v46  ;;  %v4296_v15 = vshll.u32 %v10266_v46, 16  ;;  %v4300_v52 = vshrl.u32 %v10266_v46, 16 }
 0x588   : > { %v3968_v16 = vadd.f32 %v10112_v36, %v3924_v1 }
 0x589   : > { %v4298_v25 = vrot.slane %v4296_v15, 1 }
 0x58a   : > { %vm3995_vm13 = vcmp.ge.f32.partialorder %v3968_v16, 0.0  ;;  %v4022_v31 = vmul.f32 0.3, %v3968_v16  ;;  %7828 = vmatmul.msk.bf16.gmra.mxu1 %vm1244_vm6, %v4671_v47 }
 0x58b   : > { %v4299_v23 = vsel %vm442_vm1, %v4294_v28, %v4298_v25  ;;  %v4302_v3 = vor.u32 %v4300_v52, %v4298_v25 }
 0x58c   : > { %v4049_v58 = vsel %vm3995_vm13, %v3968_v16, %v4022_v31  ;;  %v10276_v22 = vpop.f32.mrf.mxu0  ;;  %7743 = vmatmul.msk.bf16.gmra.mxu3 %vm1244_vm6, %v4299_v23 }
 0x58d   : > { %v4076_v26 = vpack.c.bf16 %v4049_v58, %v4049_v58  ;;  %v3926_v43 = vpop.f32.mrf.mxu2 }
 0x58e   : > { %v3927_v29 = vadd.f32 %v3926_v43, %v3808_v61 }
 0x58f   : > { %4103 = vst.msk [vmem:[#allocation2 + $0x4c] sm:$0xf] %vm944_vm3, %v4076_v26  ;;  %v3810_v4 = vpop.f32.mrf.mxu1 }
 0x590   : > { %v3969_v32 = vadd.f32 %v10112_v36, %v3927_v29  ;;  %v4676_v29 = vrot.slane %v10266_v46, 1 }
 0x592   : > { %vm3996_vm14 = vcmp.ge.f32.partialorder %v3969_v32, 0.0  ;;  %v4023_v21 = vmul.f32 0.3, %v3969_v32 }
 0x594   : > { %v4050_v17 = vsel %vm3996_vm14, %v3969_v32, %v4023_v21  ;;  %v10282_v40 = vpop.f32.mrf.mxu0 }
 0x595   : > { %v4077_v38 = vpack.c.bf16 %v4050_v17, %v4050_v17  ;;  %v3928_v18 = vpop.f32.mrf.mxu2 }
 0x596   : > { %v3929_v0 = vadd.f32 %v3928_v18, %v3810_v4  ;;  %v10285_v48 = vld [vmem:[#allocation2 + $0x48] sm:$0xff] }
 0x597   : > { %4104 = vst.msk [vmem:[#allocation2 + $0x50] sm:$0xf] %vm944_vm3, %v4077_v38  ;;  %v3813_v41 = vpop.f32.mrf.mxu1  ;;  %7783 = vmatmul.msk.bf16.gmra.mxu0 %vm1244_vm6, %v10285_v48  ;;  %v4304_v51 = vshll.u32 %v10285_v48, 16  ;;  %v4308_v30 = vshrl.u32 %v10285_v48, 16 }
 0x598   : > { %v3970_v39 = vadd.f32 %v10112_v36, %v3929_v0  ;;  %v4677_v0 = vsel %vm1528_vm2, %v4674_v9, %v4676_v29  ;;  %v10357_v9 = vld [vmem:[%s11068_s6] ss:$0 sm:$0xff] }
 0x599   : > { %v4306_v50 = vrot.slane %v4304_v51, 1 }
 0x59a   : > { %vm3997_vm13 = vcmp.ge.f32.partialorder %v3970_v39, 0.0  ;;  %v4024_v24 = vmul.f32 0.3, %v3970_v39  ;;  %7829 = vmatmul.msk.bf16.gmra.mxu1 %vm1244_vm6, %v4673_v54 }
 0x59b   : > { %v4307_v49 = vsel %vm442_vm1, %v4302_v3, %v4306_v50  ;;  %v4310_v45 = vor.u32 %v4308_v30, %v4306_v50 }
 0x59c   : > { %v4051_v33 = vsel %vm3997_vm13, %v3970_v39, %v4024_v24  ;;  %7744 = vmatmul.msk.bf16.gmra.mxu3 %vm1244_vm6, %v4307_v49  ;;  %v10297_v53 = vpop.f32.mrf.mxu0 }
 0x59d   : > { %v4078_v37 = vpack.c.bf16 %v4051_v33, %v4051_v33  ;;  %v3931_v60 = vpop.f32.mrf.mxu2 }
 0x59e   : > { %v3932_v59 = vadd.f32 %v3931_v60, %v3813_v41 }
 0x59f   : > { %4105 = vst.msk [vmem:[#allocation2 + $0x54] sm:$0xf] %vm944_vm3, %v4078_v37  ;;  %v3815_v7 = vpop.f32.mrf.mxu1  ;;  %v10301_v56 = vpop.f32.mrf.mxu3 }
 0x5a0   : > { %v3971_v44 = vadd.f32 %v10112_v36, %v3932_v59 }
 0x5a2   : > { %vm3998_vm14 = vcmp.ge.f32.partialorder %v3971_v44, 0.0  ;;  %v4025_v42 = vmul.f32 0.3, %v3971_v44 }
 0x5a4   : > { %v4052_v57 = vsel %vm3998_vm14, %v3971_v44, %v4025_v42  ;;  %v10303_v19 = vpop.f32.mrf.mxu0  ;;  %v4678_v42 = vrot.slane %v10285_v48, 1 }
 0x5a5   : > { %v4079_v62 = vpack.c.bf16 %v4052_v57, %v4052_v57  ;;  %v3933_v6 = vpop.f32.mrf.mxu2 }
 0x5a6   : > { %v3934_v13 = vadd.f32 %v3933_v6, %v3815_v7  ;;  %v10306_v55 = vld [vmem:[#allocation2 + $0x50] sm:$0xff]  ;;  %v4110_v6 = vld [vmem:[#allocation2 + $0x68] sm:$0x7] }
 0x5a7   : > { %4106 = vst.msk [vmem:[#allocation2 + $0x58] sm:$0xf] %vm944_vm3, %v4079_v62  ;;  %v3818_v10 = vpop.f32.mrf.mxu1  ;;  %v10310_v5 = vpop.f32.mrf.mxu3  ;;  %7784 = vmatmul.msk.bf16.gmra.mxu0 %vm1244_vm6, %v10306_v55  ;;  %v4312_v63 = vshll.u32 %v10306_v55, 16  ;;  %v4316_v18 = vshrl.u32 %v10306_v55, 16  ;;  %v4573_v62 = vadd.f32 %v10263_v11, %v10301_v56  ;;  %v4679_v56 = vsel %vm1528_vm2, %v4676_v29, %v4678_v42 }
 0x5a8   : > { %v3972_v12 = vadd.f32 %v10112_v36, %v3934_v13 }
 0x5a9   : > { %v4314_v2 = vrot.slane %v4312_v63, 1 }
 0x5aa   : > { %vm3999_vm13 = vcmp.ge.f32.partialorder %v3972_v12, 0.0  ;;  %v4026_v8 = vmul.f32 0.3, %v3972_v12  ;;  %7830 = vmatmul.msk.bf16.gmra.mxu1 %vm1244_vm6, %v4675_v35 }
 0x5ab   : > { %v4315_v1 = vsel %vm442_vm1, %v4310_v45, %v4314_v2  ;;  %v4318_v41 = vor.u32 %v4316_v18, %v4314_v2 }
 0x5ac   : > { %v4053_v14 = vsel %vm3999_vm13, %v3972_v12, %v4026_v8  ;;  %7745 = vmatmul.msk.bf16.gmra.mxu3 %vm1244_vm6, %v4315_v1  ;;  %v10320_v34 = vpop.f32.mrf.mxu0 }
 0x5ad   : > { %v4080_v61 = vpack.c.bf16 %v4053_v14, %v4053_v14  ;;  %v3936_v16 = vpop.f32.mrf.mxu2  ;;  %v4575_v14 = vadd.f32 %v10276_v22, %v10310_v5 }
 0x5ae   : > { %v3937_v15 = vadd.f32 %v3936_v16, %v3818_v10 }
 0x5af   : > { %4107 = vst.msk [vmem:[#allocation2 + $0x5c] sm:$0xf] %vm944_vm3, %v4080_v61  ;;  %v3820_v47 = vpop.f32.mrf.mxu1  ;;  %v10324_v28 = vpop.f32.mrf.mxu3 }
 0x5b0   : > { %v3973_v31 = vadd.f32 %v10112_v36, %v3937_v15  ;;  %v4578_v22 = vadd.f32 %v10282_v40, %v10324_v28 }
 0x5b2   : > { %vm4000_vm14 = vcmp.ge.f32.partialorder %v3973_v31, 0.0  ;;  %v4027_v25 = vmul.f32 0.3, %v3973_v31 }
 0x5b4   : > { %v4054_v58 = vsel %vm4000_vm14, %v3973_v31, %v4027_v25  ;;  %v10326_v43 = vpop.f32.mrf.mxu0 }
 0x5b5   : > { %v4081_v23 = vpack.c.bf16 %v4054_v58, %v4054_v58  ;;  %v3938_v26 = vpop.f32.mrf.mxu2 }
 0x5b6   : > { %v3939_v4 = vadd.f32 %v3938_v26, %v3820_v47  ;;  %v10329_v32 = vld [vmem:[#allocation2 + $0x58] sm:$0xff] }
 0x5b7   : > { %4108 = vst.msk [vmem:[#allocation2 + $0x60] sm:$0xf] %vm944_vm3, %v4081_v23  ;;  %v3823_v21 = vpop.f32.mrf.mxu1  ;;  %v10333_v38 = vpop.f32.mrf.mxu3  ;;  %7785 = vmatmul.msk.bf16.gmra.mxu0 %vm1244_vm6, %v10329_v32  ;;  %v4320_v20 = vshll.u32 %v10329_v32, 16  ;;  %v4324_v11 = vshrl.u32 %v10329_v32, 16 }
 0x5b8   : > { %v3974_v17 = vadd.f32 %v10112_v36, %v3939_v4  ;;  %v4680_v4 = vrot.slane %v10306_v55, 1 }
 0x5b9   : > { %v4322_v39 = vrot.slane %v4320_v20, 1 }
 0x5ba   : > { %vm4001_vm13 = vcmp.ge.f32.partialorder %v3974_v17, 0.0  ;;  %v4028_v46 = vmul.f32 0.3, %v3974_v17  ;;  %7831 = vmatmul.msk.bf16.gmra.mxu1 %vm1244_vm6, %v4677_v0 }
 0x5bb   : > { %v4323_v51 = vsel %vm442_vm1, %v4318_v41, %v4322_v39  ;;  %v4326_v27 = vor.u32 %v4324_v11, %v4322_v39 }
 0x5bc   : > { %v4055_v52 = vsel %vm4001_vm13, %v3974_v17, %v4028_v46  ;;  %7746 = vmatmul.msk.bf16.gmra.mxu3 %vm1244_vm6, %v4323_v51  ;;  %v10343_v3 = vpop.f32.mrf.mxu0  ;;  %v4681_v46 = vsel %vm1528_vm2, %v4678_v42, %v4680_v4 }
 0x5bd   : > { %v4082_v54 = vpack.c.bf16 %v4055_v52, %v4055_v52  ;;  %v3941_v24 = vpop.f32.mrf.mxu2  ;;  %v4580_v52 = vadd.f32 %v10297_v53, %v10333_v38 }
 0x5be   : > { %v3942_v50 = vadd.f32 %v3941_v24, %v3823_v21 }
 0x5bf   : > { %4109 = vst.msk [vmem:[#allocation2 + $0x64] sm:$0xf] %vm944_vm3, %v4082_v54  ;;  %v3825_v33 = vpop.f32.mrf.mxu1  ;;  %v10347_v37 = vpop.f32.mrf.mxu3 }
 0x5c0   : > { %v3975_v49 = vadd.f32 %v10112_v36, %v3942_v50 }
 0x5c2   : > { %vm4002_vm14 = vcmp.ge.f32.partialorder %v3975_v49, 0.0  ;;  %v4029_v60 = vmul.f32 0.3, %v3975_v49 }
 0x5c4   : > { %v4056_v59 = vsel %vm4002_vm14, %v3975_v49, %v4029_v60  ;;  %v10349_v44 = vpop.f32.mrf.mxu0 }
 0x5c5   : > { %v4083_v7 = vpack.c.bf16 %v4056_v59, %v4056_v59  ;;  %v3943_v57 = vpop.f32.mrf.mxu2  ;;  %v4682_v59 = vrot.slane %v10329_v32, 1 }
 0x5c6   : > { %v10359_v36 = vld [vmem:[#allocation2 + $0x60] sm:$0xff] }
 0x5c7   : > { %v4111_v13 = vsel %vm9309_vm11, %v4083_v7, %v4110_v6  ;;  %v4775_v10 = vpop.f32.mrf.mxu1  ;;  %v10363_v30 = vpop.f32.mrf.mxu3  ;;  %7786 = vmatmul.msk.bf16.gmra.mxu0 %vm1244_vm6, %v10359_v36  ;;  %v4328_v48 = vshll.u32 %v10359_v36, 16  ;;  %v4332_v20 = vshrl.u32 %v10359_v36, 16  ;;  %v4583_v7 = vadd.f32 %v10303_v19, %v10347_v37 }
 0x5c8   : > { %4112 = vst [vmem:[#allocation2 + $0x68] sm:$0x7] %v4111_v13  ;;  %v4844_v12 = vadd.f32 %v4775_v10, %v4573_v62  ;;  %v4683_v62 = vsel %vm1528_vm2, %v4680_v4, %v4682_v59  ;;  %v4585_v37 = vadd.f32 %v10320_v34, %v10363_v30 }
 0x5c9   : > { %v4330_v35 = vrot.slane %v4328_v48, 1 }
 0x5ca   : > { %v4875_v63 = vadd.f32 %v10357_v9, %v4844_v12  ;;  %7832 = vmatmul.msk.bf16.gmra.mxu1 %vm1244_vm6, %v4679_v56 }
 0x5cb   : > { %v4331_v45 = vsel %vm442_vm1, %v4326_v27, %v4330_v35  ;;  %v4334_v55 = vor.u32 %v4332_v20, %v4330_v35 }
 0x5cc   : > { %vm4902_vm3 = vcmp.ge.f32.partialorder %v4875_v63, 0.0  ;;  %v4929_v8 = vmul.f32 0.3, %v4875_v63  ;;  %7747 = vmatmul.msk.bf16.gmra.mxu3 %vm1244_vm6, %v4331_v45  ;;  %v10374_v2 = vpop.f32.mrf.mxu0 }
 0x5ce   : > { %v4956_v1 = vsel %vm4902_vm3, %v4875_v63, %v4929_v8  ;;  %v4684_v8 = vrot.slane %v10359_v36, 1 }
 0x5cf   : > { %4983 = vst.msk [vmem:[#allocation3] sm:$0xff] %vm566_vm0, %v4956_v1  ;;  %v4777_v61 = vpop.f32.mrf.mxu1  ;;  %v4139_v16 = vld [vmem:[#allocation2 + $0x68] sm:$0x3]  ;;  %v10379_v47 = vpop.f32.mrf.mxu3 }
 0x5d0   : > { %v4845_v15 = vadd.f32 %v4777_v61, %v4575_v14  ;;  %v4217_v31 = vunpack.c.l.b16 %v4139_v16  ;;  %v4588_v45 = vadd.f32 %v10326_v43, %v10379_v47  ;;  %v4685_v61 = vsel %vm1528_vm2, %v4682_v59, %v4684_v8 }
 0x5d2   : > { %v4876_v25 = vadd.f32 %v10357_v9, %v4845_v15  ;;  %v4231_v58 = vpack.c.b16 %v4217_v31, %v4217_v31  ;;  %v4642_v15 = vld [vmem:[#allocation2 + $0x68] sm:$0x7] }
 0x5d4   : > { %vm4903_vm11 = vcmp.ge.f32.partialorder %v4876_v25, 0.0  ;;  %v4930_v23 = vmul.f32 0.3, %v4876_v25  ;;  %v4336_v26 = vshll.u32 %v4231_v58, 16  ;;  %v10382_v29 = vpop.f32.mrf.mxu0  ;;  %v4340_v6 = vshrl.u32 %v4231_v58, 16 }
 0x5d6   : > { %v4957_v5 = vsel %vm4903_vm11, %v4876_v25, %v4930_v23  ;;  %v4338_v0 = vrot.slane %v4336_v26, 1  ;;  %v4658_v25 = vunpack.c.l.b16 %v4642_v15 }
 0x5d7   : > { %4984 = vst.msk [vmem:[#allocation3 + $0x8] sm:$0xff] %vm566_vm0, %v4957_v5  ;;  %v4780_v21 = vpop.f32.mrf.mxu1  ;;  %v10388_v18 = vpop.f32.mrf.mxu3  ;;  %7787 = vmatmul.msk.bf16.gmra.mxu0 %vm1244_vm6, %v4231_v58 }
 0x5d8   : > { %v4846_v17 = vadd.f32 %v4780_v21, %v4578_v22  ;;  %v4339_v28 = vsel %vm442_vm1, %v4334_v55, %v4338_v0  ;;  %v4342_v10 = vor.u32 %v4340_v6, %v4338_v0  ;;  %v4590_v43 = vadd.f32 %v10343_v3, %v10388_v18 }
 0x5d9   : > { %v4660_v3 = vpack.c.b16 %v4658_v25, %v4658_v25 }
 0x5da   : > { %v4877_v41 = vadd.f32 %v10357_v9, %v4846_v17  ;;  %7833 = vmatmul.msk.bf16.gmra.mxu1 %vm1244_vm6, %v4681_v46 }
 0x5dc   : > { %vm4904_vm13 = vcmp.ge.f32.partialorder %v4877_v41, 0.0  ;;  %v4931_v40 = vmul.f32 0.3, %v4877_v41  ;;  %7748 = vmatmul.msk.bf16.gmra.mxu3 %vm1244_vm6, %v4339_v28  ;;  %v10397_v39 = vpop.f32.mrf.mxu0 }
 0x5de   : > { %v4958_v51 = vsel %vm4904_vm13, %v4877_v41, %v4931_v40 }
 0x5df   : > { %4985 = vst.msk [vmem:[#allocation3 + $0x10] sm:$0xff] %vm566_vm0, %v4958_v51  ;;  %v4782_v54 = vpop.f32.mrf.mxu1  ;;  %v10402_v50 = vpop.f32.mrf.mxu3  ;;  %v4686_v51 = vrot.slane %v4660_v3, 1 }
 0x5e0   : > { %v4847_v24 = vadd.f32 %v4782_v54, %v4580_v52  ;;  %v4593_v54 = vadd.f32 %v10349_v44, %v10402_v50 }
 0x5e2   : > { %v4878_v33 = vadd.f32 %v10357_v9, %v4847_v24 }
 0x5e4   : > { %vm4905_vm14 = vcmp.ge.f32.partialorder %v4878_v33, 0.0  ;;  %v4932_v49 = vmul.f32 0.3, %v4878_v33  ;;  %v10405_v60 = vpop.f32.mrf.mxu0 }
 0x5e6   : > { %v4959_v42 = vsel %vm4905_vm14, %v4878_v33, %v4932_v49 }
 0x5e7   : > { %4986 = vst.msk [vmem:[#allocation3 + $0x18] sm:$0xff] %vm566_vm0, %v4959_v42  ;;  %v4785_v53 = vpop.f32.mrf.mxu1  ;;  %v10411_v57 = vpop.f32.mrf.mxu3  ;;  %v4687_v42 = vsel %vm1528_vm2, %v4684_v8, %v4686_v51 }
 0x5e8   : > { %v4848_v38 = vadd.f32 %v4785_v53, %v4583_v7  ;;  %v4595_v44 = vadd.f32 %v10374_v2, %v10411_v57 }
 0x5ea   : > { %v4879_v13 = vadd.f32 %v10357_v9, %v4848_v38  ;;  %7834 = vmatmul.msk.bf16.gmra.mxu1 %vm1244_vm6, %v4683_v62 }
 0x5ec   : > { %vm4906_vm3 = vcmp.ge.f32.partialorder %v4879_v13, 0.0  ;;  %v4933_v32 = vmul.f32 0.3, %v4879_v13  ;;  %7749 = vmatmul.msk.bf16.gmra.mxu3 %vm1244_vm6, %v4342_v10  ;;  %v10417_v19 = vpop.f32.mrf.mxu0 }
 0x5ee   : > { %v4960_v12 = vsel %vm4906_vm3, %v4879_v13, %v4933_v32 }
 0x5ef   : > { %4987 = vst.msk [vmem:[#allocation3 + $0x20] sm:$0xff] %vm566_vm0, %v4960_v12  ;;  %v4787_v11 = vpop.f32.mrf.mxu1  ;;  %v10422_v56 = vpop.f32.mrf.mxu3 }
 0x5f0   : > { %v4849_v48 = vadd.f32 %v4787_v11, %v4585_v37  ;;  %v4598_v11 = vadd.f32 %v10382_v29, %v10422_v56  ;;  %v8662_v56 = vld [vmem:[%s11065_s3 + $0x98] sm:$0xff] }
 0x5f1   : > { %5383 = vmatpush.bf16.msrb.mxu2 %v8662_v56 }
 0x5f2   : > { %v4880_v63 = vadd.f32 %v10357_v9, %v4849_v48 }
 0x5f4   : > { %vm4907_vm11 = vcmp.ge.f32.partialorder %v4880_v63, 0.0  ;;  %v4934_v27 = vmul.f32 0.3, %v4880_v63  ;;  %v10425_v35 = vpop.f32.mrf.mxu0 }
 0x5f6   : > { %v4961_v14 = vsel %vm4907_vm11, %v4880_v63, %v4934_v27 }
 0x5f7   : > { %4988 = vst.msk [vmem:[#allocation3 + $0x28] sm:$0xff] %vm566_vm0, %v4961_v14  ;;  %v4790_v34 = vpop.f32.mrf.mxu1  ;;  %v10431_v1 = vpop.f32.mrf.mxu3 }
 0x5f8   : > { %v4850_v30 = vadd.f32 %v4790_v34, %v4588_v45  ;;  %v4600_v14 = vadd.f32 %v10397_v39, %v10431_v1 }
 0x5fa   : > { %v4881_v16 = vadd.f32 %v10357_v9, %v4850_v30  ;;  %7835 = vmatmul.msk.bf16.gmra.mxu1 %vm1244_vm6, %v4685_v61  ;;  %v8666_v30 = vld [vmem:[%s11065_s3 + $0xb8] sm:$0xff] }
 0x5fb   : > { %5410 = vmatpush.bf16.msrb.mxu3 %v8666_v30 }
 0x5fc   : > { %vm4908_vm13 = vcmp.ge.f32.partialorder %v4881_v16, 0.0  ;;  %v4935_v31 = vmul.f32 0.3, %v4881_v16  ;;  %v10436_v36 = vpop.f32.mrf.mxu0 }
 0x5fe   : > { %v4962_v47 = vsel %vm4908_vm13, %v4881_v16, %v4935_v31  ;;  %v5096_v58 = vld [vmem:[#allocation3 + $0x3] ss:$6 sm:$0xff]  ;;  %v5061_v23 = vld [vmem:[#allocation3 + $0x2] ss:$6 sm:$0xff] }
 0x5ff   : > { %v5026_v26 = vld [vmem:[#allocation3 + $0x1] ss:$6 sm:$0xff]  ;;  %4989 = vst.msk [vmem:[#allocation3 + $0x30] sm:$0xff] %vm566_vm0, %v4962_v47  ;;  %v4792_v4 = vpop.f32.mrf.mxu1  ;;  %v5101_v22 = vpack.c.bf16 %v5096_v58, %v5096_v58  ;;  %v5066_v5 = vpack.c.bf16 %v5061_v23, %v5061_v23  ;;  %v5011_v17 = vld [vmem:[#allocation3] ss:$6 sm:$0xff]  ;;  %v10441_v0 = vpop.f32.mrf.mxu3 }
 0x600   : > { %v5031_v21 = vpack.c.bf16 %v5026_v26, %v5026_v26  ;;  %v4851_v20 = vadd.f32 %v4792_v4, %v4590_v43  ;;  %v5016_v46 = vpack.c.bf16 %v5011_v17, %v5011_v17  ;;  %v5131_v41 = vld [vmem:[#allocation3 + $0x4] ss:$6 sm:$0xff]  ;;  %v5146_v52 = vld [vmem:[#allocation3 + $0x5] ss:$6 sm:$0xff]  ;;  %v4603_v31 = vadd.f32 %v10405_v60, %v10441_v0 }
 0x601   : > { %5111 = vrot.lane.b32.xlu0 %v5101_v22, %s11090_s21  ;;  %5076 = vrot.lane.b32.xlu1 %v5066_v5, %s11091_s29  ;;  %v5136_v18 = vpack.c.bf16 %v5131_v41, %v5131_v41  ;;  %v5151_v7 = vpack.c.bf16 %v5146_v52, %v5146_v52  ;;  %v8650_v47 = vld [vmem:[%s11065_s3 + $0x38] sm:$0xff] }
 0x602   : > { %v4882_v55 = vadd.f32 %v10357_v9, %v4851_v20  ;;  %5041 = vrot.lane.b32.xlu2 %v5031_v21, %s11092_s25  ;;  %5021 = vst.msk [vmem:[#allocation4] sm:$0xf] %vm1895_vm8, %v5016_v46  ;;  %5510 = vmatpush.bf16.msrb.mxu0 %v8650_v47 }
 0x603   : > { %5141 = vst.msk [vmem:[#allocation4 + $0x4] sm:$0xf] %vm1895_vm8, %v5136_v18 }
 0x604   : > { %vm4909_vm14 = vcmp.ge.f32.partialorder %v4882_v55, 0.0  ;;  %v4936_v40 = vmul.f32 0.3, %v4882_v55  ;;  %v10449_v28 = vpop.f32.mrf.mxu0 }
 0x606   : > { %v4963_v24 = vsel %vm4909_vm14, %v4882_v55, %v4936_v40 }
 0x607   : > { %4990 = vst.msk [vmem:[#allocation3 + $0x38] sm:$0xff] %vm566_vm0, %v4963_v24  ;;  %v4795_v33 = vpop.f32.mrf.mxu1  ;;  %v4462_v59 = vpop.f32.mrf.mxu3 }
 0x608   : > { %v4852_v49 = vadd.f32 %v4795_v33, %v4593_v54  ;;  %v4605_v60 = vadd.f32 %v10417_v19, %v4462_v59 }
 0x60a   : > { %v4883_v53 = vadd.f32 %v10357_v9, %v4852_v49  ;;  %5161 = vrot.lane.b32.xlu2 %v5151_v7, %s11092_s25  ;;  %7836 = vmatmul.msk.bf16.gmra.mxu1 %vm1244_vm6, %v4687_v42 }
 0x60c   : > { %vm4910_vm3 = vcmp.ge.f32.partialorder %v4883_v53, 0.0  ;;  %v4937_v38 = vmul.f32 0.3, %v4883_v53  ;;  %v10458_v62 = vpop.f32.mrf.mxu0 }
 0x60e   : > { %v4964_v50 = vsel %vm4910_vm3, %v4883_v53, %v4937_v38 }
 0x60f   : > { %4991 = vst.msk [vmem:[#allocation3 + $0x40] sm:$0xff] %vm566_vm0, %v4964_v50  ;;  %v4797_v6 = vpop.f32.mrf.mxu1  ;;  %v10463_v10 = vpop.f32.mrf.mxu3 }
 0x610   : > { %v4853_v13 = vadd.f32 %v4797_v6, %v4595_v44  ;;  %v4608_v59 = vadd.f32 %v10425_v35, %v10463_v10  ;;  %v8661_v10 = vld [vmem:[%s11065_s3 + $0x90] sm:$0xff] }
 0x611   : > { %5384 = vmatpush.bf16.msrb.mxu2 %v8661_v10 }
 0x612   : > { %v4884_v32 = vadd.f32 %v10357_v9, %v4853_v13 }
 0x614   : > { %vm4911_vm11 = vcmp.ge.f32.partialorder %v4884_v32, 0.0  ;;  %v4938_v37 = vmul.f32 0.3, %v4884_v32  ;;  %v10466_v12 = vpop.f32.mrf.mxu0 }
 0x616   : > { %v4965_v48 = vsel %vm4911_vm11, %v4884_v32, %v4938_v37 }
 0x617   : > { %4992 = vst.msk [vmem:[#allocation3 + $0x48] sm:$0xff] %vm566_vm0, %v4965_v48  ;;  %v4800_v2 = vpop.f32.mrf.mxu1  ;;  %v10471_v63 = vpop.f32.mrf.mxu3 }
 0x618   : > { %v4854_v57 = vadd.f32 %v4800_v2, %v4598_v11  ;;  %v4610_v32 = vadd.f32 %v10436_v36, %v10471_v63 }
 0x61a   : > { %v4885_v27 = vadd.f32 %v10357_v9, %v4854_v57  ;;  %7837 = vmatmul.msk.bf16.gmra.mxu1 %vm1244_vm6, %v4686_v51 }
 0x61c   : > { %vm4912_vm13 = vcmp.ge.f32.partialorder %v4885_v27, 0.0  ;;  %v4939_v8 = vmul.f32 0.3, %v4885_v27  ;;  %v10475_v45 = vpop.f32.mrf.mxu0 }
 0x61e   : > { %v4966_v34 = vsel %vm4912_vm13, %v4885_v27, %v4939_v8 }
 0x61f   : > { %4993 = vst.msk [vmem:[#allocation3 + $0x50] sm:$0xff] %vm566_vm0, %v4966_v34  ;;  %v4802_v29 = vpop.f32.mrf.mxu1  ;;  %v10486_v16 = vpop.f32.mrf.mxu3 }
 0x620   : > { %v4855_v61 = vadd.f32 %v4802_v29, %v4600_v14  ;;  %v4613_v36 = vadd.f32 %v10449_v28, %v10486_v16  ;;  %v8649_v14 = vld [vmem:[%s11065_s3 + $0x30] sm:$0xff] }
 0x621   : > { %5511 = vmatpush.bf16.msrb.mxu0 %v8649_v14 }
 0x622   : > { %v4886_v15 = vadd.f32 %v10357_v9, %v4855_v61 }
 0x624   : > { %vm4913_vm6 = vcmp.ge.f32.partialorder %v4886_v15, 0.0  ;;  %v4940_v39 = vmul.f32 0.3, %v4886_v15  ;;  %v10489_v1 = vpop.f32.mrf.mxu0 }
 0x626   : > { %v4967_v25 = vsel %vm4913_vm6, %v4886_v15, %v4940_v39 }
 0x627   : > { %4994 = vst.msk [vmem:[#allocation3 + $0x58] sm:$0xff] %vm566_vm0, %v4967_v25  ;;  %v4805_v43 = vpop.f32.mrf.mxu1  ;;  %v10497_v23 = vpop.f32.mrf.mxu3 }
 0x628   : > { %v4856_v58 = vadd.f32 %v4805_v43, %v4603_v31  ;;  %v4615_v28 = vadd.f32 %v10458_v62, %v10497_v23  ;;  %v8660_v62 = vld [vmem:[%s11065_s3 + $0x88] sm:$0xff]  ;;  %v8665_v23 = vld [vmem:[%s11065_s3 + $0xb0] sm:$0xff] }
 0x629   : > { %5385 = vmatpush.bf16.msrb.mxu2 %v8660_v62  ;;  %5411 = vmatpush.bf16.msrb.mxu3 %v8665_v23 }
 0x62a   : > { %v4887_v26 = vadd.f32 %v10357_v9, %v4856_v58 }
 0x62c   : > { %vm4914_vm14 = vcmp.ge.f32.partialorder %v4887_v26, 0.0  ;;  %v4941_v4 = vmul.f32 0.3, %v4887_v26  ;;  %v10500_v22 = vpop.f32.mrf.mxu0 }
 0x62e   : > { %v4968_v5 = vsel %vm4914_vm14, %v4887_v26, %v4941_v4  ;;  %v5027_v21 = vld [vmem:[#allocation3 + $0x31] ss:$6 sm:$0xff]  ;;  %v5062_v20 = vld [vmem:[#allocation3 + $0x32] ss:$6 sm:$0xff] }
 0x62f   : > { %v5097_v17 = vld [vmem:[#allocation3 + $0x33] ss:$6 sm:$0xff]  ;;  %4995 = vst.msk [vmem:[#allocation3 + $0x60] sm:$0xff] %vm566_vm0, %v4968_v5  ;;  %v4807_v0 = vpop.f32.mrf.mxu1  ;;  %v5032_v46 = vpack.c.bf16 %v5027_v21, %v5027_v21  ;;  %v5067_v3 = vpack.c.bf16 %v5062_v20, %v5062_v20  ;;  %v5012_v18 = vld [vmem:[#allocation3 + $0x30] ss:$6 sm:$0xff]  ;;  %v4475_v40 = vpop.f32.mrf.mxu3 }
 0x630   : > { %v5102_v41 = vpack.c.bf16 %v5097_v17, %v5097_v17  ;;  %v4857_v55 = vadd.f32 %v4807_v0, %v4605_v60  ;;  %v5017_v52 = vpack.c.bf16 %v5012_v18, %v5012_v18  ;;  %v5132_v51 = vld [vmem:[#allocation3 + $0x34] ss:$6 sm:$0xff]  ;;  %v5147_v33 = vld [vmem:[#allocation3 + $0x35] ss:$6 sm:$0xff]  ;;  %v4618_v58 = vadd.f32 %v10466_v12, %v4475_v40 }
 0x631   : > { %5043 = vrot.lane.b32.xlu0 %v5032_v46, %s11092_s25  ;;  %v5137_v19 = vpack.c.bf16 %v5132_v51, %v5132_v51  ;;  %5078 = vrot.lane.b32.xlu2 %v5067_v3, %s11091_s29  ;;  %v5152_v53 = vpack.c.bf16 %v5147_v33, %v5147_v33 }
 0x632   : > { %5113 = vrot.lane.b32.xlu1 %v5102_v41, %s11090_s21  ;;  %v4888_v54 = vadd.f32 %v10357_v9, %v4857_v55  ;;  %5022 = vst.msk [vmem:[#allocation4 + $0x8] sm:$0xf] %vm1895_vm8, %v5017_v52 }
 0x633   : > { %5142 = vst.msk [vmem:[#allocation4 + $0xc] sm:$0xf] %vm1895_vm8, %v5137_v19  ;;  %v8648_v19 = vld [vmem:[%s11065_s3 + $0x28] sm:$0xff] }
 0x634   : > { %vm4915_vm3 = vcmp.ge.f32.partialorder %v4888_v54, 0.0  ;;  %v4942_v24 = vmul.f32 0.3, %v4888_v54  ;;  %v10510_v49 = vpop.f32.mrf.mxu0  ;;  %5512 = vmatpush.bf16.msrb.mxu0 %v8648_v19 }
 0x636   : > { %v4969_v7 = vsel %vm4915_vm3, %v4888_v54, %v4942_v24 }
 0x637   : > { %4996 = vst.msk [vmem:[#allocation3 + $0x68] sm:$0xff] %vm566_vm0, %v4969_v7  ;;  %v4810_v42 = vpop.f32.mrf.mxu1  ;;  %v4477_v44 = vpop.f32.mrf.mxu3 }
 0x638   : > { %v4858_v38 = vadd.f32 %v4810_v42, %v4608_v59  ;;  %v4620_v0 = vadd.f32 %v10475_v45, %v4477_v44 }
 0x639   : > { %5163 = vrot.lane.b32.xlu0 %v5152_v53, %s11092_s25 }
 0x63a   : > { %v4889_v50 = vadd.f32 %v10357_v9, %v4858_v38 }
 0x63c   : > { %vm4916_vm11 = vcmp.ge.f32.partialorder %v4889_v50, 0.0  ;;  %v4943_v6 = vmul.f32 0.3, %v4889_v50  ;;  %v10517_v13 = vpop.f32.mrf.mxu0 }
 0x63e   : > { %v4970_v37 = vsel %vm4916_vm11, %v4889_v50, %v4943_v6 }
 0x63f   : > { %4997 = vst.msk [vmem:[#allocation3 + $0x70] sm:$0xff] %vm566_vm0, %v4970_v37  ;;  %v4812_v35 = vpop.f32.mrf.mxu1  ;;  %v10525_v48 = vpop.f32.mrf.mxu3 }
 0x640   : > { %v4859_v11 = vadd.f32 %v4812_v35, %v4610_v32  ;;  %v4623_v44 = vadd.f32 %v10489_v1, %v10525_v48 }
 0x642   : > { %v4890_v2 = vadd.f32 %v10357_v9, %v4859_v11 }
 0x644   : > { %vm4917_vm13 = vcmp.ge.f32.partialorder %v4890_v2, 0.0  ;;  %v4944_v57 = vmul.f32 0.3, %v4890_v2  ;;  %v10528_v27 = vpop.f32.mrf.mxu0 }
 0x646   : > { %v4971_v63 = vsel %vm4917_vm13, %v4890_v2, %v4944_v57 }
 0x647   : > { %4998 = vst.msk [vmem:[#allocation3 + $0x78] sm:$0xff] %vm566_vm0, %v4971_v63  ;;  %v4815_v8 = vpop.f32.mrf.mxu1  ;;  %v10536_v29 = vpop.f32.mrf.mxu3 }
 0x648   : > { %v4860_v34 = vadd.f32 %v4815_v8, %v4613_v36  ;;  %v4625_v11 = vadd.f32 %v10500_v22, %v10536_v29 }
 0x64a   : > { %v4891_v56 = vadd.f32 %v10357_v9, %v4860_v34 }
 0x64c   : > { %vm4918_vm6 = vcmp.ge.f32.partialorder %v4891_v56, 0.0  ;;  %v4945_v30 = vmul.f32 0.3, %v4891_v56  ;;  %v10539_v61 = vpop.f32.mrf.mxu0 }
 0x64e   : > { %v4972_v16 = vsel %vm4918_vm6, %v4891_v56, %v4945_v30  ;;  %v8659_v56 = vld [vmem:[%s11065_s3 + $0x80] sm:$0xff] }
 0x64f   : > { %4999 = vst.msk [vmem:[#allocation3 + $0x80] sm:$0xff] %vm566_vm0, %v4972_v16  ;;  %v4817_v15 = vpop.f32.mrf.mxu1  ;;  %v10544_v31 = vpop.f32.mrf.mxu3  ;;  %5386 = vmatpush.bf16.msrb.mxu2 %v8659_v56 }
 0x650   : > { %v4861_v39 = vadd.f32 %v4817_v15, %v4615_v28  ;;  %v4628_v22 = vadd.f32 %v10510_v49, %v10544_v31  ;;  %v8647_v31 = vld [vmem:[%s11065_s3 + $0x20] sm:$0xff] }
 0x651   : > { %5513 = vmatpush.bf16.msrb.mxu0 %v8647_v31 }
 0x652   : > { %v4892_v25 = vadd.f32 %v10357_v9, %v4861_v39 }
 0x654   : > { %vm4919_vm14 = vcmp.ge.f32.partialorder %v4892_v25, 0.0  ;;  %v4946_v43 = vmul.f32 0.3, %v4892_v25  ;;  %v10547_v47 = vpop.f32.mrf.mxu0 }
 0x656   : > { %v4973_v26 = vsel %vm4919_vm14, %v4892_v25, %v4946_v43 }
 0x657   : > { %5000 = vst.msk [vmem:[#allocation3 + $0x88] sm:$0xff] %vm566_vm0, %v4973_v26  ;;  %v4820_v4 = vpop.f32.mrf.mxu1  ;;  %v10557_v5 = vpop.f32.mrf.mxu3 }
 0x658   : > { %v4862_v60 = vadd.f32 %v4820_v4, %v4618_v58  ;;  %v4630_v39 = vadd.f32 %v10517_v13, %v10557_v5  ;;  %v8646_v13 = vld [vmem:[%s11065_s3 + $0x18] sm:$0xff] }
 0x659   : > { %5514 = vmatpush.bf16.msrb.mxu0 %v8646_v13  ;;  %v8663_v13 = vld [vmem:[%s11065_s3 + $0xa0] sm:$0xff] }
 0x65a   : > { %v4893_v21 = vadd.f32 %v10357_v9, %v4862_v60 }
 0x65c   : > { %vm4920_vm3 = vcmp.ge.f32.partialorder %v4893_v21, 0.0  ;;  %v4947_v12 = vmul.f32 0.3, %v4893_v21  ;;  %v5042_v17 = vpop.permute.xlu2 %5041  ;;  %v4639_v20 = vpop.f32.mrf.mxu0 }
 0x65d   : > { %5056 = vst.msk [vmem:[#allocation4] sm:$0xf] %vm1937_vm15, %v5042_v17  ;;  %v8645_v17 = vld [vmem:[%s11065_s3 + $0x10] sm:$0xff] }
 0x65e   : > { %v4974_v46 = vsel %vm4920_vm3, %v4893_v21, %v4947_v12  ;;  %v5063_v41 = vld [vmem:[#allocation3 + $0x62] ss:$6 sm:$0xff]  ;;  %v5028_v3 = vld [vmem:[#allocation3 + $0x61] ss:$6 sm:$0xff]  ;;  %5515 = vmatpush.bf16.msrb.mxu0 %v8645_v17 }
 0x65f   : > { %v5098_v18 = vld [vmem:[#allocation3 + $0x63] ss:$6 sm:$0xff]  ;;  %5001 = vst.msk [vmem:[#allocation3 + $0x90] sm:$0xff] %vm566_vm0, %v4974_v46  ;;  %v4822_v55 = vpop.f32.mrf.mxu1  ;;  %v5068_v40 = vpack.c.bf16 %v5063_v41, %v5063_v41  ;;  %v5033_v52 = vpack.c.bf16 %v5028_v3, %v5028_v3  ;;  %v5013_v54 = vld [vmem:[#allocation3 + $0x60] ss:$6 sm:$0xff]  ;;  %v4490_v33 = vpop.f32.mrf.mxu3 }
 0x660   : > { %v5103_v51 = vpack.c.bf16 %v5098_v18, %v5098_v18  ;;  %v4863_v24 = vadd.f32 %v4822_v55, %v4620_v0  ;;  %v5018_v59 = vpack.c.bf16 %v5013_v54, %v5013_v54  ;;  %v5133_v7 = vld [vmem:[#allocation3 + $0x64] ss:$6 sm:$0xff]  ;;  %v4633_v4 = vadd.f32 %v10528_v27, %v4490_v33 }
 0x661   : > { %5080 = vrot.lane.b32.xlu0 %v5068_v40, %s11091_s29  ;;  %5045 = vrot.lane.b32.xlu1 %v5033_v52, %s11092_s25  ;;  %v5138_v45 = vpack.c.bf16 %v5133_v7, %v5133_v7  ;;  %v8658_v12 = vld [vmem:[%s11065_s3 + $0x78] sm:$0xff]  ;;  %v8664_v27 = vld [vmem:[%s11065_s3 + $0xa8] sm:$0xff] }
 0x662   : > { %v4894_v42 = vadd.f32 %v10357_v9, %v4863_v24  ;;  %5115 = vrot.lane.b32.xlu2 %v5103_v51, %s11090_s21  ;;  %5023 = vst.msk [vmem:[#allocation4 + $0x10] sm:$0xf] %vm1895_vm8, %v5018_v59  ;;  %5387 = vmatpush.bf16.msrb.mxu2 %v8658_v12  ;;  %v8644_v51 = vld [vmem:[%s11065_s3 + $0x8] sm:$0xff]  ;;  %v8643_v7 = vld [vmem:[%s11065_s3] sm:$0xff]  ;;  %v8654_v17 = vld [vmem:[%s11065_s3 + $0x58] sm:$0xff] }
 0x663   : > { %5143 = vst.msk [vmem:[#allocation4 + $0x14] sm:$0xf] %vm1895_vm8, %v5138_v45  ;;  %5412 = vmatpush.bf16.msrb.mxu3 %v8664_v27  ;;  %5516 = vmatpush.bf16.msrb.mxu0 %v8644_v51 }
 0x664   : > { %vm4921_vm11 = vcmp.ge.f32.partialorder %v4894_v42, 0.0  ;;  %v4948_v53 = vmul.f32 0.3, %v4894_v42  ;;  %v5162_v38 = vpop.permute.xlu2 %5161 }
 0x665   : > { %5176 = vst.msk [vmem:[#allocation4 + $0x4] sm:$0xf] %vm1937_vm15, %v5162_v38 }
 0x666   : > { %v4975_v50 = vsel %vm4921_vm11, %v4894_v42, %v4948_v53  ;;  %v5148_v42 = vld [vmem:[#allocation3 + $0x65] ss:$6 sm:$0xff] }
 0x667   : > { %5002 = vst.msk [vmem:[#allocation3 + $0x98] sm:$0xff] %vm566_vm0, %v4975_v50  ;;  %v4825_v6 = vpop.f32.mrf.mxu1  ;;  %v4492_v37 = vpop.f32.mrf.mxu3  ;;  %5517 = vmatpush.bf16.msrb.mxu0 %v8643_v7  ;;  %5413 = vmatpush.bf16.msrb.mxu3 %v8663_v13 }
 0x668   : > { %v4864_v32 = vadd.f32 %v4825_v6, %v4623_v44  ;;  %v4635_v20 = vadd.f32 %v10539_v61, %v4492_v37  ;;  %v5153_v6 = vpack.c.bf16 %v5148_v42, %v5148_v42  ;;  %v8676_v42 = vld [vmem:[%s11065_s3 + $0x108] sm:$0xff] }
 0x66a   : > { %v4895_v35 = vadd.f32 %v10357_v9, %v4864_v32 }
 0x66c   : > { %vm4922_vm13 = vcmp.ge.f32.partialorder %v4895_v35, 0.0  ;;  %v4949_v10 = vmul.f32 0.3, %v4895_v35 }
 0x66e   : > { %v4976_v2 = vsel %vm4922_vm13, %v4895_v35, %v4949_v10 }
 0x66f   : > { %5003 = vst.msk [vmem:[#allocation3 + $0xa0] sm:$0xff] %vm566_vm0, %v4976_v2  ;;  %v4827_v57 = vpop.f32.mrf.mxu1  ;;  %v10580_v63 = vpop.f32.mrf.mxu3 }
 0x670   : > { %v4865_v36 = vadd.f32 %v4827_v57, %v4625_v11  ;;  %v4638_v38 = vadd.f32 %v10547_v47, %v10580_v63  ;;  %v8657_v47 = vld [vmem:[%s11065_s3 + $0x70] sm:$0xff] }
 0x671   : > { %5388 = vmatpush.bf16.msrb.mxu2 %v8657_v47 }
 0x672   : > { %v4896_v1 = vadd.f32 %v10357_v9, %v4865_v36 }
 0x673   : > { %v5112_v48 = vpop.permute.xlu0 %5111  ;;  %v5077_v8 = vpop.permute.xlu1 %5076 }
 0x674   : > { %vm4923_vm6 = vcmp.ge.f32.partialorder %v4896_v1, 0.0  ;;  %v4950_v14 = vmul.f32 0.3, %v4896_v1  ;;  %5091 = vst.msk [vmem:[#allocation4] sm:$0xf] %vm1979_vm4, %v5077_v8 }
 0x675   : > { %5126 = vst.msk [vmem:[#allocation4] sm:$0xf] %vm2021_vm7, %v5112_v48 }
 0x676   : > { %v4977_v34 = vsel %vm4923_vm6, %v4896_v1, %v4950_v14 }
 0x677   : > { %5004 = vst.msk [vmem:[#allocation3 + $0xa8] sm:$0xff] %vm566_vm0, %v4977_v34  ;;  %v4830_v29 = vpop.f32.mrf.mxu1  ;;  %v4497_v28 = vpop.f32.mrf.mxu3 }
 0x678   : > { %v4866_v30 = vadd.f32 %v4830_v29, %v4628_v22 }
 0x67a   : > { %v4897_v16 = vadd.f32 %v10357_v9, %v4866_v30 }
 0x67c   : > { %vm4924_vm14 = vcmp.ge.f32.partialorder %v4897_v16, 0.0  ;;  %v4951_v15 = vmul.f32 0.3, %v4897_v16 }
 0x67e   : > { %v4978_v25 = vsel %vm4924_vm14, %v4897_v16, %v4951_v15 }
 0x67f   : > { %5005 = vst.msk [vmem:[#allocation3 + $0xb0] sm:$0xff] %vm566_vm0, %v4978_v25  ;;  %v4832_v49 = vpop.f32.mrf.mxu1 }
 0x680   : > { %v4867_v43 = vadd.f32 %v4832_v49, %v4630_v39  ;;  %v5181_v39 = vld [vmem:[#allocation4] sm:$0xff] }
 0x681   : > { %v5239_v49 = vunpack.c.l.b16 %v5181_v39  ;;  %v5240_v31 = vunpack.c.h.b16 %v5181_v39 }
 0x682   : > { %v4898_v58 = vadd.f32 %v10357_v9, %v4867_v43 }
 0x684   : > { %vm4925_vm3 = vcmp.ge.f32.partialorder %v4898_v58, 0.0  ;;  %v4952_v26 = vmul.f32 0.3, %v4898_v58 }
 0x686   : > { %v4979_v62 = vsel %vm4925_vm3, %v4898_v58, %v4952_v26 }
 0x687   : > { %5006 = vst.msk [vmem:[#allocation3 + $0xb8] sm:$0xff] %vm566_vm0, %v4979_v62  ;;  %v4835_v23 = vpop.f32.mrf.mxu1  ;;  %v8656_v62 = vld [vmem:[%s11065_s3 + $0x68] sm:$0xff] }
 0x688   : > { %v4868_v60 = vadd.f32 %v4835_v23, %v4633_v4  ;;  %5389 = vmatpush.bf16.msrb.mxu2 %v8656_v62 }
 0x68a   : > { %v4899_v5 = vadd.f32 %v10357_v9, %v4868_v60 }
 0x68b   : > { %v5079_v14 = vpop.permute.xlu2 %5078 }
 0x68c   : > { %vm4926_vm11 = vcmp.ge.f32.partialorder %v4899_v5, 0.0  ;;  %v4953_v21 = vmul.f32 0.3, %v4899_v5 }
 0x68e   : > { %v4980_v0 = vsel %vm4926_vm11, %v4899_v5, %v4953_v21  ;;  %v5099_v46 = vld [vmem:[#allocation3 + $0x93] ss:$6 sm:$0xff]  ;;  %v5064_v41 = vld [vmem:[#allocation3 + $0x92] ss:$6 sm:$0xff] }
 0x68f   : > { %v5029_v3 = vld [vmem:[#allocation3 + $0x91] ss:$6 sm:$0xff]  ;;  %5007 = vst.msk [vmem:[#allocation3 + $0xc0] sm:$0xff] %vm566_vm0, %v4980_v0  ;;  %v4837_v18 = vpop.f32.mrf.mxu1  ;;  %v5104_v55 = vpack.c.bf16 %v5099_v46, %v5099_v46  ;;  %v5069_v40 = vpack.c.bf16 %v5064_v41, %v5064_v41  ;;  %v5014_v19 = vld [vmem:[#allocation3 + $0x90] ss:$6 sm:$0xff] }
 0x690   : > { %v5034_v52 = vpack.c.bf16 %v5029_v3, %v5029_v3  ;;  %v4869_v54 = vadd.f32 %v4837_v18, %v4635_v20  ;;  %v5019_v61 = vpack.c.bf16 %v5014_v19, %v5014_v19  ;;  %v5134_v24 = vld [vmem:[#allocation3 + $0x94] ss:$6 sm:$0xff]  ;;  %v5149_v53 = vld [vmem:[#allocation3 + $0x95] ss:$6 sm:$0xff] }
 0x691   : > { %5117 = vrot.lane.b32.xlu0 %v5104_v55, %s11090_s21  ;;  %5082 = vrot.lane.b32.xlu1 %v5069_v40, %s11091_s29  ;;  %v5139_v33 = vpack.c.bf16 %v5134_v24, %v5134_v24  ;;  %v5154_v37 = vpack.c.bf16 %v5149_v53, %v5149_v53  ;;  %v8655_v21 = vld [vmem:[%s11065_s3 + $0x60] sm:$0xff]  ;;  %v8674_v20 = vld [vmem:[%s11065_s3 + $0xf8] sm:$0xff] }
 0x692   : > { %v4900_v59 = vadd.f32 %v10357_v9, %v4869_v54  ;;  %5047 = vrot.lane.b32.xlu2 %v5034_v52, %s11092_s25  ;;  %5024 = vst.msk [vmem:[#allocation4 + $0x18] sm:$0xf] %vm1895_vm8, %v5019_v61  ;;  %5390 = vmatpush.bf16.msrb.mxu2 %v8655_v21  ;;  %v8678_v0 = vld [vmem:[%s11065_s3 + $0x118] sm:$0xff]  ;;  %v8673_v46 = vld [vmem:[%s11065_s3 + $0xf0] sm:$0xff]  ;;  %v8672_v55 = vld [vmem:[%s11065_s3 + $0xe8] sm:$0xff] }
 0x693   : > { %5144 = vst.msk [vmem:[#allocation4 + $0x1c] sm:$0xf] %vm1895_vm8, %v5139_v33  ;;  %5686 = vmatpush.bf16.msra.mxu3 %v8674_v20  ;;  %5713 = vmatpush.bf16.msra.mxu0 %v8678_v0  ;;  %v8653_v18 = vld [vmem:[%s11065_s3 + $0x50] sm:$0xff]  ;;  %v8671_v33 = vld [vmem:[%s11065_s3 + $0xe0] sm:$0xff] }
 0x694   : > { %vm4927_vm13 = vcmp.ge.f32.partialorder %v4900_v59, 0.0  ;;  %v4954_v45 = vmul.f32 0.3, %v4900_v59  ;;  %v8677_v24 = vld [vmem:[%s11065_s3 + $0x110] sm:$0xff] }
 0x696   : > { %v4981_v44 = vsel %vm4927_vm13, %v4900_v59, %v4954_v45  ;;  %5537 = vmatpush.bf16.msra.mxu2 %v8654_v17 }
 0x697   : > { %5008 = vst.msk [vmem:[#allocation3 + $0xc8] sm:$0xff] %vm566_vm0, %v4981_v44  ;;  %v4840_v50 = vpop.f32.mrf.mxu1  ;;  %vm11093_vm0 = vcmask 254976   ;;  %5687 = vmatpush.bf16.msra.mxu3 %v8673_v46  ;;  %5714 = vmatpush.bf16.msra.mxu0 %v8677_v24 }
 0x698   : > { %v4870_v32 = vadd.f32 %v4840_v50, %v4638_v38 }
 0x699   : > { %5165 = vrot.lane.b32.xlu1 %v5153_v6, %s11092_s25 }
 0x69a   : > { %v4901_v35 = vadd.f32 %v10357_v9, %v4870_v32  ;;  %5167 = vrot.lane.b32.xlu2 %v5154_v37, %s11092_s25  ;;  %5538 = vmatpush.bf16.msra.mxu2 %v8653_v18 }
 0x69b   : > { %5688 = vmatpush.bf16.msra.mxu3 %v8672_v55  ;;  %5715 = vmatpush.bf16.msra.mxu0 %v8676_v42 }
 0x69c   : > { %vm4928_vm6 = vcmp.ge.f32.partialorder %v4901_v35, 0.0  ;;  %v4955_v10 = vmul.f32 0.3, %v4901_v35 }
 0x69e   : > { %v4982_v11 = vsel %vm4928_vm6, %v4901_v35, %v4955_v10  ;;  %v5030_v2 = vld [vmem:[#allocation3 + $0xc1] ss:$6 sm:$0xf]  ;;  %v5065_v57 = vld [vmem:[#allocation3 + $0xc2] ss:$6 sm:$0xf] }
 0x69f   : > { %5009 = vst.msk [vmem:[#allocation3 + $0xd0] sm:$0x7] %vm1877_vm10, %v4982_v11  ;;  %v4842_v36 = vpop.f32.mrf.mxu1  ;;  %v5035_v63 = vpack.c.bf16 %v5030_v2, %v5030_v2  ;;  %v5070_v1 = vpack.c.bf16 %v5065_v57, %v5065_v57  ;;  %v5100_v48 = vld [vmem:[#allocation3 + $0xc3] ss:$6 sm:$0xf]  ;;  %vm11094_vm10 = vmmov %vm11093_vm0  ;;  %5689 = vmatpush.bf16.msra.mxu3 %v8671_v33 }
 0x6a0   : > { %v5105_v8 = vpack.c.bf16 %v5100_v48, %v5100_v48  ;;  %v8652_v11 = vld [vmem:[%s11065_s3 + $0x48] sm:$0xff]  ;;  %v8670_v2 = vld [vmem:[%s11065_s3 + $0xd8] sm:$0xff]  ;;  %v8675_v57 = vld [vmem:[%s11065_s3 + $0x100] sm:$0xff] }
 0x6a1   : > { %5049 = vrot.lane.b32.xlu0 %v5035_v63, %s11092_s25  ;;  %5084 = vrot.lane.b32.xlu1 %v5070_v1, %s11091_s29 }
 0x6a2   : > { %5119 = vrot.lane.b32.xlu2 %v5105_v8, %s11090_s21  ;;  %5539 = vmatpush.bf16.msra.mxu2 %v8652_v11  ;;  %v8669_v8 = vld [vmem:[%s11065_s3 + $0xd0] sm:$0xff]  ;;  %s8833_s21 = sshra.s32 %s6577_s13, 4  ;;  %s8834_s21 = int_to_ptr.hbm [resolvable:$true] %s8833_s21 }
 0x6a3   : > { %v5044_v9 = vpop.permute.xlu0 %5043  ;;  %5690 = vmatpush.bf16.msra.mxu3 %v8670_v2  ;;  %5716 = vmatpush.bf16.msra.mxu0 %v8675_v57  ;;  %p8840_p0 = scmp.lt.s32.totalorder %s8834_s21, %s11071_s9 }
 0x6a4   : > { %5057 = vst.msk [vmem:[#allocation4 + $0x8] sm:$0xf] %vm1937_vm15, %v5044_v9  ;;  %v5114_v22 = vpop.permute.xlu1 %5113 }
 0x6a5   : > { %5092 = vst.msk [vmem:[#allocation4 + $0x8] sm:$0xf] %vm1979_vm4, %v5079_v14 }
 0x6a6   : > { %5127 = vst.msk [vmem:[#allocation4 + $0x8] sm:$0xf] %vm2021_vm7, %v5114_v22  ;;  %v5150_v34 = vld [vmem:[#allocation3 + $0xc5] ss:$6 sm:$0xf] }
 0x6a7   : > { %v5155_v29 = vpack.c.bf16 %v5150_v34, %v5150_v34  ;;  %v5015_v56 = vld [vmem:[#allocation3 + $0xc0] ss:$6 sm:$0xf]  ;;  %v5135_v30 = vld [vmem:[#allocation3 + $0xc4] ss:$6 sm:$0xf]  ;;  %5691 = vmatpush.bf16.msra.mxu3 %v8669_v8 }
 0x6a8   : > { %v5020_v28 = vpack.c.bf16 %v5015_v56, %v5015_v56  ;;  %v5140_v16 = vpack.c.bf16 %v5135_v30, %v5135_v30  ;;  %v8651_v22 = vld [vmem:[%s11065_s3 + $0x40] sm:$0xff]  ;;  %v8668_v34 = vld [vmem:[%s11065_s3 + $0xc8] sm:$0xff] }
 0x6a9   : > { %5169 = vrot.lane.b32.xlu0 %v5155_v29, %s11092_s25  ;;  %5540 = vmatpush.bf16.msra.mxu2 %v8651_v22  ;;  %v8667_v29 = vld [vmem:[%s11065_s3 + $0xc0] sm:$0xff]  ;;  %s8835_s25 = scalar_lea.hbm %s8834_s21, 8 }
 0x6aa   : > { %5025 = vst.msk [vmem:[#allocation4 + $0x20] sm:$0x3] %vm11093_vm0, %v5020_v28  ;;  %p8836_p11 = scmp.ne.s32.totalorder %s8834_s21, %s8835_s25  ;;  %p8841_p1 = scmp.lt.s32.totalorder %s8839_s26, %s8835_s25 }
 0x6ab   : > { %v5164_v15 = vpop.permute.xlu0 %5163  ;;  %5145 = vst.msk [vmem:[#allocation4 + $0x24] sm:$0x3] %vm11094_vm10, %v5140_v16  ;;  %5692 = vmatpush.bf16.msra.mxu3 %v8668_v34 }
 0x6ac   : > { %5177 = vst.msk [vmem:[#allocation4 + $0xc] sm:$0xf] %vm1937_vm15, %v5164_v15  ;;  %p8837_p12 = pnand %p8836_p11, %p8976_p5  ;;  %p8842_p2 = por %p8841_p1, %p8840_p0 }
 0x6ae   : > { %p8838_p13 = pneg %p8837_p12 }
 0x6af   : > { %5693 = vmatpush.bf16.msra.mxu3 %v8667_v29 }
 0x6b0   : > { %p8843_p3 = pnand %p8842_p2, %p8838_p13 }
 0x6b3   : > { %v10648_v25 = vld [vmem:[#allocation4 + $0x8] sm:$0xff] }
 0x6b4   : > { %v5241_v43 = vunpack.c.l.b16 %v10648_v25  ;;  %v5242_v58 = vunpack.c.h.b16 %v10648_v25 }
 0x6b6   : > { %v5249_v26 = vpack.c.b16 %v5241_v43, %v5239_v49  ;;  %v10656_v4 = vpack.c.b16 %v5242_v58, %v5240_v31 }
 0x6b8   : > { %5518 = vmatmul.bf16.vlgmr.msrb.gmra.mxu0 %v5249_v26  ;;  %v5258_v40 = vshll.u32 %v5249_v26, 16  ;;  %v5256_v59 = vshrl.u32 %v5249_v26, 16  ;;  %v5270_v45 = vshll.u32 %v10656_v4, 16  ;;  %v5268_v36 = vshrl.u32 %v10656_v4, 16 }
 0x6ba   : > { %v5260_v61 = vrot.slane %v5258_v40, 1  ;;  %v5272_v10 = vrot.slane %v5270_v45, 1 }
 0x6bc   : > { %v5116_v5 = vpop.permute.xlu2 %5115  ;;  %v5261_v53 = vor.u32 %v5260_v61, %v5256_v59  ;;  %v5273_v1 = vor.u32 %v5272_v10, %v5268_v36 }
 0x6d3   : > { %v5081_v23 = vpop.permute.xlu0 %5080  ;;  %v5046_v60 = vpop.permute.xlu1 %5045 }
 0x6d4   : > { %5058 = vst.msk [vmem:[#allocation4 + $0x10] sm:$0xf] %vm1937_vm15, %v5046_v60 }
 0x6d5   : > { %5093 = vst.msk [vmem:[#allocation4 + $0x10] sm:$0xf] %vm1979_vm4, %v5081_v23 }
 0x6d6   : > { %5128 = vst.msk [vmem:[#allocation4 + $0x10] sm:$0xf] %vm2021_vm7, %v5116_v5 }
 0x6dd   : > { %v7864_v51 = vld [vmem:[#allocation4 + $0x10] sm:$0xf] }
 0x6ec   : > { %v5048_v12 = vpop.permute.xlu2 %5047 }
 0x6ed   : > { %5059 = vst.msk [vmem:[#allocation4 + $0x18] sm:$0xf] %vm1937_vm15, %v5048_v12  ;;  %v5556_v12 = vld [vmem:[#allocation4] sm:$0xee] }
 0x6f4   : > { %v5168_v27 = vpop.permute.xlu2 %5167 }
 0x6f5   : > { %5179 = vst.msk [vmem:[#allocation4 + $0x1c] sm:$0xf] %vm1937_vm15, %v5168_v27  ;;  %v5585_v27 = vunpack.c.h.b16 %v5556_v12 }
 0x6f7   : > { %v5589_v17 = vpack.c.b16 %v5242_v58, %v5585_v27 }
 0x6f9   : > { %v5595_v0 = vrot.slane %v5589_v17, 1  ;;  %v8710_v17 = vld [vmem:[%s11066_s4 + $0xf8] sm:$0xff] }
 0x6fc   : > { %v7866_v37 = vld [vmem:[#allocation4 + $0x18] sm:$0xf0]  ;;  %v5120_v47 = vpop.permute.xlu2 %5119 }
 0x703   : > { %v5118_v41 = vpop.permute.xlu0 %5117  ;;  %v5083_v3 = vpop.permute.xlu1 %5082 }
 0x704   : > { %5094 = vst.msk [vmem:[#allocation4 + $0x18] sm:$0xf] %vm1979_vm4, %v5083_v3  ;;  %vm11096_vm4 = vcmask 779776  }
 0x705   : > { %5129 = vst.msk [vmem:[#allocation4 + $0x18] sm:$0xf] %vm2021_vm7, %v5118_v41  ;;  %vm11097_vm7 = vcmask 1042176  }
 0x70b   : > { %v5166_v52 = vpop.permute.xlu1 %5165 }
 0x70c   : > { %5178 = vst.msk [vmem:[#allocation4 + $0x14] sm:$0xf] %vm1937_vm15, %v5166_v52  ;;  %v8642_v19 = vld [vmem:[#allocation4 + $0x14] sm:$0xf0]  ;;  %vm11095_vm15 = vcmask 517376  }
 0x70d   : > { %v10693_v54 = vor.u32 %v8642_v19, %v7864_v51  ;;  %vm11098_vm14 = vmmov %vm11095_vm15  ;;  %v5584_v51 = vunpack.c.l.b16 %v5556_v12 }
 0x70f   : > { %5523 = vmatmul.bf16.gmra.mxu0 %v10693_v54  ;;  %v5263_v7 = vshll.u32 %v10693_v54, 16  ;;  %v5279_v39 = vshrl.u32 %v10693_v54, 16  ;;  %v5588_v58 = vpack.c.b16 %v5241_v43, %v5584_v51  ;;  %v5593_v61 = vrot.slane %v10693_v54, 1 }
 0x711   : > { %v5265_v38 = vrot.slane %v5263_v7, 1  ;;  %v5592_v24 = vrot.slane %v5588_v58, 1 }
 0x713   : > { %v5050_v44 = vpop.permute.xlu0 %5049  ;;  %v5085_v50 = vpop.permute.xlu1 %5084  ;;  %v5266_v6 = vsel %vm442_vm1, %v5261_v53, %v5265_v38  ;;  %v8641_v32 = vld [vmem:[#allocation4 + $0x14] sm:$0xf]  ;;  %v5281_v62 = vor.u32 %v5279_v39, %v5265_v38  ;;  %v5594_v33 = vsel %vm1528_vm2, %v5592_v24, %v5593_v61 }
 0x714   : > { %5060 = vst.msk [vmem:[#allocation4 + $0x20] sm:$0x3] %vm11095_vm15, %v5050_v44  ;;  %5391 = vmatmul.bf16.vlgmr.msrb.gmra.mxu2 %v5266_v6  ;;  %v10709_v35 = vor.u32 %v8641_v32, %v7866_v37 }
 0x715   : > { %5095 = vst.msk [vmem:[#allocation4 + $0x20] sm:$0x3] %vm11096_vm4, %v5085_v50  ;;  %6073 = vmatpush.bf16.msrb.mxu2 %v8710_v17  ;;  %v8712_v17 = vld [vmem:[%s11066_s4 + $0x108] sm:$0xff] }
 0x716   : > { %5130 = vst.msk [vmem:[#allocation4 + $0x20] sm:$0x3] %vm11097_vm7, %v5120_v47  ;;  %v5275_v63 = vshll.u32 %v10709_v35, 16  ;;  %v5287_v31 = vshrl.u32 %v10709_v35, 16  ;;  %v5596_v20 = vrot.slane %v10709_v35, 1 }
 0x718   : > { %v5277_v48 = vrot.slane %v5275_v63, 1  ;;  %v5597_v46 = vsel %vm1528_vm2, %v5595_v0, %v5596_v20  ;;  %v8726_v0 = vld [vmem:[%s11066_s4 + $0x178] sm:$0xff] }
 0x719   : > { %6099 = vmatpush.bf16.msrb.mxu0 %v8726_v0  ;;  %v8703_v0 = vld [vmem:[%s11066_s4 + $0xc0] sm:$0xff] }
 0x71a   : > { %v5278_v9 = vsel %vm442_vm1, %v5273_v1, %v5277_v48  ;;  %v5289_v23 = vor.u32 %v5287_v31, %v5277_v48 }
 0x71b   : > { %v5170_v14 = vpop.permute.xlu0 %5169  ;;  %7918 = vmatmul.msk.bf16.vlgmr.msrb.gmra.mxu3 %vm2282_vm9, %v5278_v9 }
 0x71c   : > { %5180 = vst.msk [vmem:[#allocation4 + $0x24] sm:$0x3] %vm11098_vm14, %v5170_v14 }
 0x723   : > { %v5185_v56 = vld [vmem:[#allocation4 + $0x20] sm:$0x11] }
 0x724   : > { %v5247_v30 = vunpack.c.l.b16 %v5185_v56  ;;  %v5248_v28 = vunpack.c.h.b16 %v5185_v56  ;;  %v5557_v41 = vld [vmem:[#allocation4 + $0x20] sm:$0x33] }
 0x725   : > { %v5587_v55 = vunpack.c.h.b16 %v5557_v41  ;;  %v5586_v59 = vunpack.c.l.b16 %v5557_v41 }
 0x726   : > { %v5253_v16 = vpack.c.b16 %v5247_v30, %v5247_v30  ;;  %v5254_v15 = vpack.c.b16 %v5248_v28, %v5248_v28  ;;  %v10776_v30 = vld [vmem:[%s11069_s7] ss:$0 sm:$0xff] }
 0x727   : > { %v5591_v40 = vpack.c.b16 %v5587_v55, %v5587_v55  ;;  %v5590_v7 = vpack.c.b16 %v5586_v59, %v5586_v59  ;;  %v8716_v59 = vld [vmem:[%s11066_s4 + $0x128] sm:$0xff] }
 0x728   : > { %5528 = vmatmul.bf16.gmra.mxu0 %v5253_v16  ;;  %v5283_v49 = vshll.u32 %v5253_v16, 16  ;;  %v5291_v26 = vshll.u32 %v5254_v15, 16  ;;  %v5295_v3 = vshrl.u32 %v5253_v16, 16  ;;  %v5297_v18 = vshrl.u32 %v5254_v15, 16 }
 0x729   : > { %v5600_v52 = vrot.slane %v5591_v40, 1  ;;  %v5598_v45 = vrot.slane %v5590_v7, 1  ;;  %v8724_v7 = vld [vmem:[%s11066_s4 + $0x168] sm:$0xff] }
 0x72a   : > { %v5285_v13 = vrot.slane %v5283_v49, 1  ;;  %v5293_v60 = vrot.slane %v5291_v26, 1 }
 0x72b   : > { %v5601_v19 = vsel %vm1528_vm2, %v5596_v20, %v5600_v52  ;;  %v5599_v25 = vsel %vm1528_vm2, %v5593_v61, %v5598_v45  ;;  %v8718_v20 = vld [vmem:[%s11066_s4 + $0x138] sm:$0xff] }
 0x72c   : > { %v5286_v5 = vsel %vm442_vm1, %v5281_v62, %v5285_v13  ;;  %v5294_v21 = vsel %vm442_vm1, %v5289_v23, %v5293_v60  ;;  %6086 = vmatpush.bf16.msrb.mxu3 %v8718_v20  ;;  %v8720_v20 = vld [vmem:[%s11066_s4 + $0x148] sm:$0xff] }
 0x72d   : > { %5396 = vmatmul.bf16.gmra.mxu2 %v5286_v5  ;;  %7919 = vmatmul.msk.bf16.gmra.mxu3 %vm2282_vm9, %v5294_v21 }
 0x735   : > { %v5519_v43 = vpop.f32.mrf.mxu0 }
 0x738   : > { %8044 = vmatmul.msk.bf16.vlgmr.msra.gmra.mxu0 %vm2282_vm9, %v5597_v46 }
 0x73d   : > { %5401 = vmatmul.bf16.gmra.mxu2 %v5295_v3  ;;  %7920 = vmatmul.msk.bf16.gmra.mxu3 %vm2282_vm9, %v5297_v18  ;;  %v5521_v54 = vpop.f32.mrf.mxu0  ;;  %v8709_v3 = vld [vmem:[%s11066_s4 + $0xf0] sm:$0xff] }
 0x73e   : > { %v8717_v18 = vld [vmem:[%s11066_s4 + $0x130] sm:$0xff]  ;;  %6074 = vmatpush.bf16.msrb.mxu2 %v8709_v3  ;;  %v8686_v3 = vld [vmem:[%s11066_s4 + $0x38] sm:$0xff] }
 0x73f   : > { %6087 = vmatpush.bf16.msrb.mxu3 %v8717_v18  ;;  %v8694_v18 = vld [vmem:[%s11066_s4 + $0x78] sm:$0xff] }
 0x743   : > { %6088 = vmatpush.bf16.msrb.mxu3 %v8716_v59  ;;  %v8699_v59 = vld [vmem:[%s11066_s4 + $0xa0] sm:$0xff] }
 0x748   : > { %8045 = vmatmul.msk.bf16.gmra.mxu0 %vm2282_vm9, %v5601_v19 }
 0x74d   : > { %7969 = vmatmul.msk.bf16.vlgmr.msra.gmra.mxu2 %vm2282_vm9, %v10656_v4  ;;  %5694 = vmatmul.bf16.vlgmr.msra.gmra.mxu3 %v5594_v33  ;;  %v8708_v33 = vld [vmem:[%s11066_s4 + $0xe8] sm:$0xff] }
 0x74e   : > { %6075 = vmatpush.bf16.msrb.mxu2 %v8708_v33  ;;  %v8691_v33 = vld [vmem:[%s11066_s4 + $0x60] sm:$0xff] }
 0x758   : > { %8046 = vmatmul.msk.bf16.gmra.mxu0 %vm2282_vm9, %v5600_v52  ;;  %v8725_v52 = vld [vmem:[%s11066_s4 + $0x170] sm:$0xff] }
 0x759   : > { %6100 = vmatpush.bf16.msrb.mxu0 %v8725_v52  ;;  %v8693_v52 = vld [vmem:[%s11066_s4 + $0x70] sm:$0xff] }
 0x75d   : > { %7970 = vmatmul.msk.bf16.gmra.mxu2 %vm2282_vm9, %v10709_v35  ;;  %5699 = vmatmul.bf16.gmra.mxu3 %v5599_v25 }
 0x75e   : > { %6101 = vmatpush.bf16.msrb.mxu0 %v8724_v7  ;;  %v8682_v7 = vld [vmem:[%s11066_s4 + $0x18] sm:$0xff] }
 0x76d   : > { %7971 = vmatmul.msk.bf16.gmra.mxu2 %vm2282_vm9, %v5254_v15  ;;  %5704 = vmatmul.bf16.gmra.mxu3 %v5598_v45 }
 0x78c   : > { %v5524_v42 = vpop.f32.mrf.mxu0 }
 0x794   : > { %v10763_v53 = vpop.f32.mrf.mxu0 }
 0x797   : > { %v5392_v4 = vpop.f32.mrf.mxu2 }
 0x79e   : > { %v5415_v38 = vpop.f32.mrf.mxu3 }
 0x79f   : > { %v5394_v50 = vpop.f32.mrf.mxu2  ;;  %v5416_v8 = vadd.f32 %v5415_v38, %v5392_v4 }
 0x7a1   : > { %v5520_v14 = vadd.f32 %v5519_v43, %v5416_v8 }
 0x7a5   : > { %v10765_v44 = vpop.f32.mrf.mxu0 }
 0x7a6   : > { %v5417_v6 = vpop.f32.mrf.mxu3 }
 0x7a7   : > { %v5418_v28 = vadd.f32 %v5417_v6, %v5394_v50  ;;  %v8723_v50 = vld [vmem:[%s11066_s4 + $0x160] sm:$0xff] }
 0x7a8   : > { %6102 = vmatpush.bf16.msrb.mxu0 %v8723_v50  ;;  %v8688_v50 = vld [vmem:[%s11066_s4 + $0x48] sm:$0xff] }
 0x7a9   : > { %v5522_v31 = vadd.f32 %v5521_v54, %v5418_v28  ;;  %v8707_v54 = vld [vmem:[%s11066_s4 + $0xe0] sm:$0xff] }
 0x7aa   : > { %6076 = vmatpush.bf16.msrb.mxu2 %v8707_v54  ;;  %v8681_v54 = vld [vmem:[%s11066_s4 + $0x10] sm:$0xff] }
 0x7ad   : > { %v5531_v32 = vpop.f32.mrf.mxu0 }
 0x7b0   : > { %v5397_v37 = vpop.f32.mrf.mxu2  ;;  %v5420_v10 = vpop.f32.mrf.mxu3 }
 0x7b1   : > { %v5421_v5 = vadd.f32 %v5420_v10, %v5397_v37 }
 0x7b3   : > { %v5525_v41 = vadd.f32 %v5524_v42, %v5421_v5  ;;  %v8715_v42 = vld [vmem:[%s11066_s4 + $0x120] sm:$0xff]  ;;  %v8705_v5 = vld [vmem:[%s11066_s4 + $0xd0] sm:$0xff] }
 0x7b4   : > { %6089 = vmatpush.bf16.msrb.mxu3 %v8715_v42  ;;  %v8689_v42 = vld [vmem:[%s11066_s4 + $0x50] sm:$0xff] }
 0x7b5   : > { %v5718_v47 = vpop.f32.mrf.mxu0 }
 0x7b8   : > { %v5399_v35 = vpop.f32.mrf.mxu2  ;;  %v5422_v11 = vpop.f32.mrf.mxu3 }
 0x7b9   : > { %v5423_v61 = vadd.f32 %v5422_v11, %v5399_v35 }
 0x7bb   : > { %v5527_v43 = vadd.f32 %v10763_v53, %v5423_v61  ;;  %v8700_v61 = vld [vmem:[%s11066_s4 + $0xa8] sm:$0xff] }
 0x7bd   : > { %v5720_v2 = vpop.f32.mrf.mxu0 }
 0x7c0   : > { %v10767_v57 = vpop.f32.mrf.mxu2  ;;  %v10769_v36 = vpop.f32.mrf.mxu3 }
 0x7c1   : > { %v5426_v37 = vadd.f32 %v10769_v36, %v10767_v57 }
 0x7c3   : > { %v5530_v11 = vadd.f32 %v10765_v44, %v5426_v37  ;;  %v8695_v37 = vld [vmem:[%s11066_s4 + $0x80] sm:$0xff] }
 0x7c5   : > { %v5723_v63 = vpop.f32.mrf.mxu0 }
 0x7c8   : > { %v5404_v1 = vpop.f32.mrf.mxu2  ;;  %v5427_v48 = vpop.f32.mrf.mxu3 }
 0x7cd   : > { %v10771_v9 = vpop.f32.mrf.mxu0 }
 0x7d0   : > { %v5542_v22 = vpop.f32.mrf.mxu2  ;;  %v5695_v34 = vpop.f32.mrf.mxu3 }
 0x7d1   : > { %v5543_v29 = vadd.f32 %v5542_v22, %v5520_v14  ;;  %v5719_v56 = vadd.f32 %v5718_v47, %v5695_v34 }
 0x7d3   : > { %v5732_v16 = vadd.f32 %v5719_v56, %v5543_v29 }
 0x7d5   : > { %v5741_v15 = vadd.f32 %v10776_v30, %v5732_v16  ;;  %v10779_v39 = vpop.f32.mrf.mxu0 }
 0x7d7   : > { %vm5746_vm1 = vcmp.ge.f32.partialorder %v5741_v15, 0.0  ;;  %v5751_v49 = vmul.f32 0.3, %v5741_v15 }
 0x7d8   : > { %v5544_v26 = vpop.f32.mrf.mxu2  ;;  %v5697_v62 = vpop.f32.mrf.mxu3 }
 0x7d9   : > { %v5756_v13 = vsel %vm5746_vm1, %v5741_v15, %v5751_v49  ;;  %v5545_v23 = vadd.f32 %v5544_v26, %v5522_v31  ;;  %v5721_v60 = vadd.f32 %v5720_v2, %v5697_v62 }
 0x7da   : > { %5761 = vst.msk [vmem:[#allocation5] sm:$0xff] %vm2282_vm9, %v5756_v13  ;;  %v8706_v13 = vld [vmem:[%s11066_s4 + $0xd8] sm:$0xff] }
 0x7db   : > { %v5733_v21 = vadd.f32 %v5721_v60, %v5545_v23  ;;  %v8714_v23 = vld [vmem:[%s11066_s4 + $0x118] sm:$0xff]  ;;  %6077 = vmatpush.bf16.msrb.mxu2 %v8706_v13  ;;  %v8749_v13 = vld [vmem:[%s11066_s4 + $0x230] sm:$0xff] }
 0x7dc   : > { %v8722_v60 = vld [vmem:[%s11066_s4 + $0x158] sm:$0xff]  ;;  %6090 = vmatpush.bf16.msrb.mxu3 %v8714_v23  ;;  %v8732_v23 = vld [vmem:[%s11066_s4 + $0x1a8] sm:$0xff] }
 0x7dd   : > { %v5742_v12 = vadd.f32 %v10776_v30, %v5733_v21  ;;  %v5730_v27 = vpop.f32.mrf.mxu0  ;;  %v8713_v21 = vld [vmem:[%s11066_s4 + $0x110] sm:$0xff]  ;;  %6103 = vmatpush.bf16.msrb.mxu0 %v8722_v60  ;;  %v8740_v60 = vld [vmem:[%s11066_s4 + $0x1e8] sm:$0xff] }
 0x7de   : > { %v8704_v27 = vld [vmem:[%s11066_s4 + $0xc8] sm:$0xff] }
 0x7df   : > { %vm5747_vm2 = vcmp.ge.f32.partialorder %v5742_v12, 0.0  ;;  %v5752_v46 = vmul.f32 0.3, %v5742_v12  ;;  %6078 = vmatpush.bf16.msrb.mxu2 %v8705_v5  ;;  %v8748_v5 = vld [vmem:[%s11066_s4 + $0x228] sm:$0xff] }
 0x7e0   : > { %v5547_v55 = vpop.f32.mrf.mxu2  ;;  %v5700_v40 = vpop.f32.mrf.mxu3  ;;  %6091 = vmatpush.bf16.msrb.mxu3 %v8713_v21 }
 0x7e1   : > { %v5757_v51 = vsel %vm5747_vm2, %v5742_v12, %v5752_v46  ;;  %v5548_v58 = vadd.f32 %v5547_v55, %v5525_v41  ;;  %v5724_v19 = vadd.f32 %v5723_v63, %v5700_v40  ;;  %v8721_v12 = vld [vmem:[%s11066_s4 + $0x150] sm:$0xff]  ;;  %v8711_v46 = vld [vmem:[%s11066_s4 + $0x100] sm:$0xff]  ;;  %v8702_v55 = vld [vmem:[%s11066_s4 + $0xb8] sm:$0xff] }
 0x7e2   : > { %5762 = vst.msk [vmem:[#allocation5 + $0x8] sm:$0xff] %vm2282_vm9, %v5757_v51  ;;  %6104 = vmatpush.bf16.msrb.mxu0 %v8721_v12  ;;  %v8719_v41 = vld [vmem:[%s11066_s4 + $0x140] sm:$0xff]  ;;  %v8685_v40 = vld [vmem:[%s11066_s4 + $0x30] sm:$0xff] }
 0x7e3   : > { %v5734_v24 = vadd.f32 %v5724_v19, %v5548_v58  ;;  %6079 = vmatpush.bf16.msrb.mxu2 %v8704_v27  ;;  %v8701_v51 = vld [vmem:[%s11066_s4 + $0xb0] sm:$0xff]  ;;  %v8684_v58 = vld [vmem:[%s11066_s4 + $0x28] sm:$0xff]  ;;  %v8731_v27 = vld [vmem:[%s11066_s4 + $0x1a0] sm:$0xff] }
 0x7e4   : > { %6092 = vmatpush.bf16.msrb.mxu3 %v8712_v17  ;;  %v8692_v19 = vld [vmem:[%s11066_s4 + $0x68] sm:$0xff]  ;;  %v8739_v17 = vld [vmem:[%s11066_s4 + $0x1e0] sm:$0xff] }
 0x7e5   : > { %v5743_v45 = vadd.f32 %v10776_v30, %v5734_v24  ;;  %v8683_v24 = vld [vmem:[%s11066_s4 + $0x20] sm:$0xff] }
 0x7e6   : > { %6105 = vmatpush.bf16.msrb.mxu0 %v8720_v20 }
 0x7e7   : > { %vm5748_vm3 = vcmp.ge.f32.partialorder %v5743_v45, 0.0  ;;  %v5753_v25 = vmul.f32 0.3, %v5743_v45  ;;  %6080 = vmatpush.bf16.msrb.mxu2 %v8703_v0  ;;  %v8747_v0 = vld [vmem:[%s11066_s4 + $0x220] sm:$0xff] }
 0x7e8   : > { %v5549_v4 = vpop.f32.mrf.mxu2  ;;  %v5702_v38 = vpop.f32.mrf.mxu3  ;;  %6093 = vmatpush.bf16.msrb.mxu3 %v8711_v46 }
 0x7e9   : > { %v5758_v6 = vsel %vm5748_vm3, %v5743_v45, %v5753_v25  ;;  %v5550_v32 = vadd.f32 %v5549_v4, %v5527_v43  ;;  %v5726_v53 = vadd.f32 %v10771_v9, %v5702_v38  ;;  %v8690_v45 = vld [vmem:[%s11066_s4 + $0x58] sm:$0xff]  ;;  %v8697_v4 = vld [vmem:[%s11066_s4 + $0x90] sm:$0xff]  ;;  %v8680_v38 = vld [vmem:[%s11066_s4 + $0x8] sm:$0xff] }
 0x7ea   : > { %5763 = vst.msk [vmem:[#allocation5 + $0x10] sm:$0xff] %vm2282_vm9, %v5758_v6  ;;  %6106 = vmatpush.bf16.msrb.mxu0 %v8719_v41  ;;  %v8698_v25 = vld [vmem:[%s11066_s4 + $0x98] sm:$0xff]  ;;  %v8696_v6 = vld [vmem:[%s11066_s4 + $0x88] sm:$0xff] }
 0x7eb   : > { %v5735_v10 = vadd.f32 %v5726_v53, %v5550_v32  ;;  %6267 = vmatpush.bf16.msra.mxu2 %v8686_v3  ;;  %v8679_v32 = vld [vmem:[%s11066_s4] sm:$0xff] }
 0x7ec   : > { %6280 = vmatpush.bf16.msra.mxu3 %v8694_v18  ;;  %v8687_v53 = vld [vmem:[%s11066_s4 + $0x40] sm:$0xff]  ;;  %v8730_v18 = vld [vmem:[%s11066_s4 + $0x198] sm:$0xff] }
 0x7ed   : > { %v5744_v47 = vadd.f32 %v10776_v30, %v5735_v10 }
 0x7ee   : > { %6293 = vmatpush.bf16.msra.mxu0 %v8702_v55  ;;  %v8738_v55 = vld [vmem:[%s11066_s4 + $0x1d8] sm:$0xff] }
 0x7ef   : > { %vm5749_vm11 = vcmp.ge.f32.partialorder %v5744_v47, 0.0  ;;  %v5754_v35 = vmul.f32 0.3, %v5744_v47  ;;  %6268 = vmatpush.bf16.msra.mxu2 %v8685_v40 }
 0x7f0   : > { %v5552_v2 = vpop.f32.mrf.mxu2  ;;  %v5705_v63 = vpop.f32.mrf.mxu3  ;;  %6281 = vmatpush.bf16.msra.mxu3 %v8693_v52 }
 0x7f1   : > { %v5759_v1 = vsel %vm5749_vm11, %v5744_v47, %v5754_v35  ;;  %v5553_v48 = vadd.f32 %v5552_v2, %v5530_v11  ;;  %v5729_v8 = vadd.f32 %v10779_v39, %v5705_v63 }
 0x7f2   : > { %5764 = vst.msk [vmem:[#allocation5 + $0x18] sm:$0xff] %vm2282_vm9, %v5759_v1  ;;  %6294 = vmatpush.bf16.msra.mxu0 %v8701_v51  ;;  %v8746_v51 = vld [vmem:[%s11066_s4 + $0x218] sm:$0xff] }
 0x7f3   : > { %v5736_v9 = vadd.f32 %v5729_v8, %v5553_v48  ;;  %6269 = vmatpush.bf16.msra.mxu2 %v8684_v58  ;;  %v8729_v58 = vld [vmem:[%s11066_s4 + $0x190] sm:$0xff] }
 0x7f4   : > { %6282 = vmatpush.bf16.msra.mxu3 %v8692_v19  ;;  %v8737_v19 = vld [vmem:[%s11066_s4 + $0x1d0] sm:$0xff] }
 0x7f5   : > { %v5745_v57 = vadd.f32 %v10776_v30, %v5736_v9 }
 0x7f6   : > { %6295 = vmatpush.bf16.msra.mxu0 %v8700_v61  ;;  %v8745_v61 = vld [vmem:[%s11066_s4 + $0x210] sm:$0xff] }
 0x7f7   : > { %vm5750_vm13 = vcmp.ge.f32.partialorder %v5745_v57, 0.0  ;;  %v5755_v36 = vmul.f32 0.3, %v5745_v57  ;;  %6270 = vmatpush.bf16.msra.mxu2 %v8683_v24 }
 0x7f8   : > { %v5554_v14 = vpop.f32.mrf.mxu2  ;;  %v5707_v22 = vpop.f32.mrf.mxu3  ;;  %6283 = vmatpush.bf16.msra.mxu3 %v8691_v33 }
 0x7f9   : > { %v5760_v34 = vsel %vm5750_vm13, %v5745_v57, %v5755_v36  ;;  %v5790_v29 = vld [vmem:[#allocation5 + $0x5] ss:$6 sm:$0x3f]  ;;  %v5770_v16 = vld [vmem:[#allocation5 + $0x1] ss:$6 sm:$0x3f] }
 0x7fa   : > { %v5780_v56 = vld [vmem:[#allocation5 + $0x3] ss:$6 sm:$0x3f]  ;;  %5765 = vst.msk [vmem:[#allocation5 + $0x20] sm:$0x1] %vm2675_vm12, %v5760_v34  ;;  %v5791_v44 = vpack.c.bf16 %v5790_v29, %v5790_v29  ;;  %v5771_v15 = vpack.c.bf16 %v5770_v16, %v5770_v16  ;;  %6296 = vmatpush.bf16.msra.mxu0 %v8699_v59  ;;  %vm11099_vm12 = vcmask 1042944  }
 0x7fb   : > { %v5781_v28 = vpack.c.bf16 %v5780_v56, %v5780_v56  ;;  %v5787_v49 = vld [vmem:[#allocation5 + $0x4] ss:$6 sm:$0x3f]  ;;  %v5767_v39 = vld [vmem:[#allocation5] ss:$6 sm:$0x3f]  ;;  %6271 = vmatpush.bf16.msra.mxu2 %v8682_v7  ;;  %vm11100_vm9 = vmmov %vm11099_vm12 }
 0x7fc   : > { %5793 = vrot.lane.b32.xlu0 %v5791_v44, %s11091_s29  ;;  %v5788_v30 = vpack.c.bf16 %v5787_v49, %v5787_v49  ;;  %v5768_v31 = vpack.c.bf16 %v5767_v39, %v5767_v39  ;;  %5773 = vrot.lane.b32.xlu1 %v5771_v15, %s11091_s29  ;;  %v8734_v15 = vld [vmem:[%s11066_s4 + $0x1b8] sm:$0xff]  ;;  %v8728_v59 = vld [vmem:[%s11066_s4 + $0x188] sm:$0xff] }
 0x7fd   : > { %5783 = vrot.lane.b32.xlu2 %v5781_v28, %s11091_s29  ;;  %6284 = vmatpush.bf16.msra.mxu3 %v8690_v45  ;;  %v8742_v49 = vld [vmem:[%s11066_s4 + $0x1f8] sm:$0xff]  ;;  %v8736_v7 = vld [vmem:[%s11066_s4 + $0x1c8] sm:$0xff] }
 0x7fe   : > { %5789 = vst.msk [vmem:[#allocation6 + $0x8] sm:$0x7] %vm2677_vm5, %v5788_v30  ;;  %6297 = vmatpush.bf16.msra.mxu0 %v8698_v25  ;;  %v8744_v45 = vld [vmem:[%s11066_s4 + $0x208] sm:$0xff] }
 0x7ff   : > { %5769 = vst.msk [vmem:[#allocation6] sm:$0x7] %vm2677_vm5, %v5768_v31  ;;  %6272 = vmatpush.bf16.msra.mxu2 %v8681_v54  ;;  %v8750_v31 = vld [vmem:[%s11066_s4 + $0x238] sm:$0xff] }
 0x801   : > { %v5777_v26 = vld [vmem:[#allocation5 + $0x2] ss:$6 sm:$0x3f]  ;;  %6285 = vmatpush.bf16.msra.mxu3 %v8689_v42 }
 0x802   : > { %v5778_v62 = vpack.c.bf16 %v5777_v26, %v5777_v26  ;;  %6298 = vmatpush.bf16.msra.mxu0 %v8697_v4  ;;  %v8733_v26 = vld [vmem:[%s11066_s4 + $0x1b0] sm:$0xff]  ;;  %v8727_v42 = vld [vmem:[%s11066_s4 + $0x180] sm:$0xff] }
 0x803   : > { %6273 = vmatpush.bf16.msra.mxu2 %v8680_v38  ;;  %v8735_v4 = vld [vmem:[%s11066_s4 + $0x1c0] sm:$0xff] }
 0x804   : > { %5779 = vst.msk [vmem:[#allocation6 + $0x4] sm:$0x7] %vm2677_vm5, %v5778_v62  ;;  %vm11101_vm5 = vmmov %vm11100_vm9  ;;  %v8741_v62 = vld [vmem:[%s11066_s4 + $0x1f0] sm:$0xff]  ;;  %v8743_v38 = vld [vmem:[%s11066_s4 + $0x200] sm:$0xff] }
 0x805   : > { %6286 = vmatpush.bf16.msra.mxu3 %v8688_v50 }
 0x806   : > { %6299 = vmatpush.bf16.msra.mxu0 %v8696_v6 }
 0x807   : > { %6274 = vmatpush.bf16.msra.mxu2 %v8679_v32 }
 0x809   : > { %6287 = vmatpush.bf16.msra.mxu3 %v8687_v53 }
 0x80a   : > { %6300 = vmatpush.bf16.msra.mxu0 %v8695_v37 }
 0x857   : > { %v5784_v43 = vpop.permute.xlu2 %5783 }
 0x858   : > { %5786 = vst.msk [vmem:[#allocation6 + $0x4] sm:$0x7] %vm11099_vm12, %v5784_v43 }
 0x86e   : > { %v5794_v10 = vpop.permute.xlu0 %5793  ;;  %v5774_v47 = vpop.permute.xlu1 %5773 }
 0x86f   : > { %5796 = vst.msk [vmem:[#allocation6 + $0x8] sm:$0x7] %vm11100_vm9, %v5794_v10 }
 0x870   : > { %5776 = vst.msk [vmem:[#allocation6] sm:$0x7] %vm11101_vm5, %v5774_v47 }
 0x876   : > { %v5848_v35 = vld [vmem:[#allocation6 + $0x8] sm:$0x7] }
 0x877   : > { %v5847_v11 = vld [vmem:[#allocation6] sm:$0x77]  ;;  %v5901_v2 = vunpack.c.l.b16 %v5848_v35  ;;  %v5798_v21 = vld [vmem:[#allocation6 + $0x8] sm:$0x3] }
 0x878   : > { %v5899_v63 = vunpack.c.l.b16 %v5847_v11  ;;  %v5900_v1 = vunpack.c.h.b16 %v5847_v11  ;;  %v5797_v12 = vld [vmem:[#allocation6] sm:$0x33]  ;;  %v6116_v20 = vunpack.c.l.b16 %v5798_v21  ;;  %v6307_v33 = vld [vmem:[#allocation6 + $0x8] sm:$0x6] }
 0x879   : > { %v5904_v48 = vpack.c.b16 %v5901_v2, %v5901_v2  ;;  %v6114_v46 = vunpack.c.l.b16 %v5797_v12  ;;  %v6115_v41 = vunpack.c.h.b16 %v5797_v12  ;;  %v6306_v24 = vld [vmem:[#allocation6] sm:$0x66]  ;;  %v6360_v54 = vunpack.c.l.b16 %v6307_v33 }
 0x87a   : > { %v5902_v8 = vpack.c.b16 %v5899_v63, %v5899_v63  ;;  %v5903_v9 = vpack.c.b16 %v5900_v1, %v5900_v1  ;;  %v6119_v3 = vpack.c.b16 %v6116_v20, %v6116_v20  ;;  %v6358_v25 = vunpack.c.l.b16 %v6306_v24 }
 0x87b   : > { %v5922_v57 = vshll.u32 %v5904_v48, 16  ;;  %v5920_v22 = vshrl.u32 %v5904_v48, 16  ;;  %v6117_v40 = vpack.c.b16 %v6114_v46, %v6114_v46  ;;  %v6118_v52 = vpack.c.b16 %v6115_v41, %v6115_v41 }
 0x87c   : > { %v5908_v36 = vshll.u32 %v5902_v8, 16  ;;  %v5915_v14 = vshll.u32 %v5903_v9, 16  ;;  %v5906_v29 = vshrl.u32 %v5902_v8, 16  ;;  %v5913_v44 = vshrl.u32 %v5903_v9, 16 }
 0x87d   : > { %v5924_v34 = vrot.slane %v5922_v57, 1  ;;  %v6359_v43 = vunpack.c.h.b16 %v6306_v24  ;;  %v6361_v50 = vpack.c.b16 %v6358_v25, %v6358_v25  ;;  %v6363_v32 = vpack.c.b16 %v6360_v54, %v6360_v54 }
 0x87e   : > { %v5910_v56 = vrot.slane %v5908_v36, 1  ;;  %v5917_v28 = vrot.slane %v5915_v14, 1 }
 0x87f   : > { %v5925_v16 = vor.u32 %v5924_v34, %v5920_v22  ;;  %v6362_v6 = vpack.c.b16 %v6359_v43, %v6359_v43  ;;  %v6364_v53 = vrot.slane %v6361_v50, 1  ;;  %v6366_v10 = vrot.slane %v6363_v32, 1 }
 0x880   : > { %v5911_v39 = vor.u32 %v5910_v56, %v5906_v29  ;;  %v5918_v30 = vor.u32 %v5917_v28, %v5913_v44 }
 0x881   : > { %6107 = vmatmul.bf16.vlgmr.msrb.gmra.mxu0 %v5925_v16  ;;  %v6365_v37 = vrot.slane %v6362_v6, 1 }
 0x882   : > { %6081 = vmatmul.bf16.vlgmr.msrb.gmra.mxu2 %v5911_v39  ;;  %6094 = vmatmul.bf16.vlgmr.msrb.gmra.mxu3 %v5918_v30  ;;  %v8818_v30 = vld [vmem:[%s11070_s8] ss:$0 sm:$0xff] }
 0x883   : > { %6514 = vmatpush.bf16.msrb.mxu2 %v8734_v15  ;;  %6527 = vmatpush.bf16.msrb.mxu3 %v8742_v49 }
 0x884   : > { %6540 = vmatpush.bf16.msrb.mxu0 %v8750_v31 }
 0x887   : > { %6515 = vmatpush.bf16.msrb.mxu2 %v8733_v26  ;;  %6528 = vmatpush.bf16.msrb.mxu3 %v8741_v62 }
 0x888   : > { %6541 = vmatpush.bf16.msrb.mxu0 %v8749_v13 }
 0x88b   : > { %6516 = vmatpush.bf16.msrb.mxu2 %v8732_v23  ;;  %6529 = vmatpush.bf16.msrb.mxu3 %v8740_v60 }
 0x88c   : > { %6542 = vmatpush.bf16.msrb.mxu0 %v8748_v5 }
 0x88f   : > { %6517 = vmatpush.bf16.msrb.mxu2 %v8731_v27  ;;  %6530 = vmatpush.bf16.msrb.mxu3 %v8739_v17 }
 0x890   : > { %6543 = vmatpush.bf16.msrb.mxu0 %v8747_v0 }
 0x891   : > { %6301 = vmatmul.bf16.vlgmr.msra.gmra.mxu0 %v6119_v3 }
 0x892   : > { %6275 = vmatmul.bf16.vlgmr.msra.gmra.mxu2 %v6117_v40  ;;  %6288 = vmatmul.bf16.vlgmr.msra.gmra.mxu3 %v6118_v52 }
 0x893   : > { %6518 = vmatpush.bf16.msrb.mxu2 %v8730_v18  ;;  %6531 = vmatpush.bf16.msrb.mxu3 %v8738_v55 }
 0x894   : > { %6544 = vmatpush.bf16.msrb.mxu0 %v8746_v51 }
 0x897   : > { %6519 = vmatpush.bf16.msrb.mxu2 %v8729_v58  ;;  %6532 = vmatpush.bf16.msrb.mxu3 %v8737_v19 }
 0x898   : > { %6545 = vmatpush.bf16.msrb.mxu0 %v8745_v61 }
 0x89b   : > { %6520 = vmatpush.bf16.msrb.mxu2 %v8728_v59  ;;  %6533 = vmatpush.bf16.msrb.mxu3 %v8736_v7 }
 0x89c   : > { %6546 = vmatpush.bf16.msrb.mxu0 %v8744_v45 }
 0x89f   : > { %6521 = vmatpush.bf16.msrb.mxu2 %v8727_v42  ;;  %6534 = vmatpush.bf16.msrb.mxu3 %v8735_v4 }
 0x8a0   : > { %6547 = vmatpush.bf16.msrb.mxu0 %v8743_v38 }
 0x8a2   : > { %6522 = vmatmul.bf16.vlgmr.msrb.gmra.mxu2 %v6364_v53  ;;  %6535 = vmatmul.bf16.vlgmr.msrb.gmra.mxu3 %v6365_v37 }
 0x8a3   : > { %6548 = vmatmul.bf16.vlgmr.msrb.gmra.mxu0 %v6366_v10 }
 0x8fe   : > { %v6108_v47 = vpop.f32.mrf.mxu0 }
 0x905   : > { %v6082_v35 = vpop.f32.mrf.mxu2  ;;  %v6095_v11 = vpop.f32.mrf.mxu3 }
 0x906   : > { %v6110_v2 = vpop.f32.mrf.mxu0  ;;  %v6096_v36 = vadd.f32 %v6095_v11, %v6082_v35 }
 0x908   : > { %v6109_v34 = vadd.f32 %v6108_v47, %v6096_v36 }
 0x90d   : > { %v6084_v63 = vpop.f32.mrf.mxu2  ;;  %v6097_v1 = vpop.f32.mrf.mxu3 }
 0x90e   : > { %v6302_v48 = vpop.f32.mrf.mxu0 }
 0x915   : > { %v6276_v8 = vpop.f32.mrf.mxu2  ;;  %v6289_v9 = vpop.f32.mrf.mxu3 }
 0x916   : > { %v6304_v57 = vpop.f32.mrf.mxu0  ;;  %v6277_v29 = vadd.f32 %v6276_v8, %v6109_v34 }
 0x918   : > { %v6290_v44 = vadd.f32 %v6289_v9, %v6277_v29 }
 0x91a   : > { %v6303_v49 = vadd.f32 %v6302_v48, %v6290_v44 }
 0x91d   : > { %v6278_v14 = vpop.f32.mrf.mxu2  ;;  %v6291_v22 = vpop.f32.mrf.mxu3 }
 0x920   : > { %v6549_v56 = vpop.f32.mrf.mxu0 }
 0x925   : > { %v6523_v28 = vpop.f32.mrf.mxu2  ;;  %v6536_v16 = vpop.f32.mrf.mxu3 }
 0x926   : > { %v6537_v15 = vadd.f32 %v6536_v16, %v6523_v28 }
 0x928   : > { %v6550_v39 = vadd.f32 %v6549_v56, %v6537_v15  ;;  %v6551_v31 = vpop.f32.mrf.mxu0 }
 0x92a   : > { %v6553_v26 = vadd.f32 %v6550_v39, %v6303_v49 }
 0x92c   : > { %v6558_v62 = vadd.f32 %v8818_v30, %v6553_v26 }
 0x92d   : > { %v6525_v13 = vpop.f32.mrf.mxu2  ;;  %v6538_v23 = vpop.f32.mrf.mxu3 }
 0x92e   : > { %8431 = vst.msk [vmem:[%s10092_s28 + $0x4] sm:$0xf] %vm1895_vm8, %v6558_v62 }
 0x92f   : > { %8846 = shalt.err (!%p8843_p3)
}
 0x930   : > { %s8887_s28 = smov 4  }
 0x931   : > { %8767 = dma.vmem_to_hbm [thread:$0]  (%p8976_p5), %s6575_s27, 128, %s6577_s13, %s6562_s22, %s11091_s29, %s11091_s29, %s8887_s28  }
 0x932 PF: > { %p8773_p4 = scmp.ge.s32.totalorder %s8881_s12, 2  ;;  %s6591_s14 = sand.u32 1, %s8869_s30  }
 0x933   : > { %s6592_s23 = scalar_lea.sflag [#allocation8], %s6591_s14 }
 0x934   : > { %p8770_p7 = pnand %p8773_p4, %p8980_p6 }
 0x936   : > { %p8771_p8 = pneg %p8770_p7 }
 0x938   : > { %8864 = dma.done.wait (%p8771_p8), %s6592_s23, 128  }
 0x939   : > { %8866 = vsyncadd (%p8771_p8), %s6592_s23, 4294967168  ;;  %p19_p9 = scmp.ge.s32.totalorder %s8963_s15, 4   ;;  %s11103_s30 = smov %s8873_s10 }
 0x93a   : > { %s11104_s10 = smov %s8877_s11  ;;  %s11105_s11 = smov %s8974_s18 }
 0x93b   : > { %s11106_s12 = smov %s8963_s15  ;;  %21 = sbr.rel (!%p19_p9) target bundleno = 5 (0x5), region = 134 }
 0x940   :  { %6598 = vsyncpa [#allocation8], 1 }
 0x941   :  { %6600 = vsyncpa [#allocation8 + $0x1], 1 }

</bundles_post_ra>
